<compile_context>
chip_gen: v7x
topology: tpu7x:2x2x1
jax: 0.10.0
libtpu: 0.0.40
codegen_flags: <defaults>
</compile_context>

<pallas_src>
import functools

import jax
import jax.numpy as jnp
from jax.experimental import pallas as pl
from jax.experimental.pallas import tpu as pltpu

# ---------------- scaled-down bert-base config ----------------
HIDDEN = 128
NUM_LAYERS = 2
NUM_HEADS = 4
HEAD_DIM = HIDDEN // NUM_HEADS
INTERMEDIATE = 256
VOCAB = 64
MAX_POS = 16
NUM_CLASSES = 4
CLS_PAD = 128           # lane-dense classifier output width (real logits in [:4])
LN_EPS = 1e-12
NEG_INF = -1e9


# ---------------- in-kernel helpers (traced inside the Pallas kernel) ----------------
def _layernorm(x, g, b):
    # single-pass statistics: two independent reductions, var = E[x^2] - mean^2
    inv_n = jnp.float32(1.0 / x.shape[-1])
    mean = jnp.sum(x, axis=-1, keepdims=True) * inv_n
    msq = jnp.sum(x * x, axis=-1, keepdims=True) * inv_n
    var = jnp.maximum(msq - mean * mean, 0.0)
    return (x - mean) * jax.lax.rsqrt(var + jnp.float32(LN_EPS)) * g + b


def _gelu(x):
    # TODO(synk): HF BERT uses exact erf-GELU; tanh approximation used here.
    c = jnp.float32(0.7978845608028654)  # sqrt(2/pi)
    return 0.5 * x * (1.0 + jnp.tanh(c * (x + 0.044715 * x * x * x)))


def _bf16(x):
    return x.astype(jnp.bfloat16)


# ---------------- the single fused kernel ----------------
def _bert_fused_kernel(emb_ref, attn_bias_ref,
                       emb_ln_g_ref, emb_ln_b_ref,
                       qkv_w_ref, qkv_b_ref, o_w_ref, o_b_ref,
                       ln1_g_ref, ln1_b_ref,
                       i_w_ref, i_b_ref, f_w_ref, f_b_ref,
                       ln2_g_ref, ln2_b_ref,
                       pool_w_ref, pool_b_ref, cls_w_ref, cls_b_ref,
                       out_ref,
                       qf_ref, kf_ref, vf_ref, ctx_ref,
                       *, batch, seq_len):
    scale = jnp.float32(1.0 / (HEAD_DIM ** 0.5))
    rows = batch * seq_len                       # tokens per head-block of the fold
    attn_bias = attn_bias_ref[...]               # (NH*B*L, NH*B*L) block-diag additive bias

    # embeddings LayerNorm (no residual, no zero slab)
    h = _layernorm(emb_ref[...], emb_ln_g_ref[...], emb_ln_b_ref[...])   # (B*L, H) f32

    for l in range(NUM_LAYERS):
        # fused QKV projection: one lane-dense (H, 3H) bf16 matmul
        qkv = jnp.dot(_bf16(h), qkv_w_ref[l],
                      preferred_element_type=jnp.float32) + qkv_b_ref[l]  # (B*L, 3H) f32

        # fold heads into the sublane axis (row order = (head, batch, position)):
        # static-offset scratch writes, no concatenates.
        for hh in range(NUM_HEADS):
            c0 = hh * HEAD_DIM
            r0 = hh * rows
            qf_ref[r0:r0 + rows, :] = qkv[:, c0:c0 + HEAD_DIM]
            kf_ref[r0:r0 + rows, :] = qkv[:, HIDDEN + c0:HIDDEN + c0 + HEAD_DIM]
            vf_ref[r0:r0 + rows, :] = qkv[:, 2 * HIDDEN + c0:2 * HIDDEN + c0 + HEAD_DIM]

        # one block-diagonal score matmul for ALL batches and heads
        s = jax.lax.dot_general(
            _bf16(qf_ref[...]), _bf16(kf_ref[...]),
            (((1,), (1,)), ((), ())),
            preferred_element_type=jnp.float32) * scale                  # (NH*B*L, NH*B*L)
        s = s + attn_bias                       # structural block-diag + padding mask
        s = s - jnp.max(s, axis=-1, keepdims=True)
        p = jnp.exp(s)
        p = p * pl.reciprocal(jnp.sum(p, axis=-1, keepdims=True), approx=True)

        # one PV matmul for all batches/heads (off-block probs are ~0)
        ctx_f = jnp.dot(_bf16(p), _bf16(vf_ref[...]),
                        preferred_element_type=jnp.float32)              # (NH*B*L, Dh)

        # unfold heads back into lanes via static-offset scratch writes
        for hh in range(NUM_HEADS):
            ctx_ref[:, hh * HEAD_DIM:(hh + 1) * HEAD_DIM] = \
                ctx_f[hh * rows:(hh + 1) * rows, :]
        ctx = ctx_ref[...]                                               # (B*L, H) f32

        # attention output projection + residual + LayerNorm
        attn_out = jnp.dot(_bf16(ctx), o_w_ref[l],
                           preferred_element_type=jnp.float32) + o_b_ref[l]
        h1 = _layernorm(attn_out + h, ln1_g_ref[l], ln1_b_ref[l])

        # feed-forward (GELU) + residual + LayerNorm
        inter = _gelu(jnp.dot(_bf16(h1), i_w_ref[l],
                              preferred_element_type=jnp.float32) + i_b_ref[l])
        ffn = jnp.dot(_bf16(inter), f_w_ref[l],
                      preferred_element_type=jnp.float32) + f_b_ref[l]
        h = _layernorm(ffn + h1, ln2_g_ref[l], ln2_b_ref[l])

    # pooler + classifier run on ALL B*L rows (extra rows free on MXU); the wrapper
    # picks the CLS rows.  nn.Dropout(0.5) is identity at inference (eval mode).
    pooled = jnp.tanh(jnp.dot(_bf16(h), pool_w_ref[...],
                              preferred_element_type=jnp.float32) + pool_b_ref[...])
    logits = jnp.dot(_bf16(pooled), cls_w_ref[...],
                     preferred_element_type=jnp.float32) + cls_b_ref[...]
    out_ref[...] = jnp.maximum(logits, 0.0)      # ReLU, lane-dense (B*L, 128) slab


# ---------------- parameter init (deterministic, BERT-style N(0, 0.02)) ----------------
def init_params(key):
    keys = iter(jax.random.split(key, 64))

    def normal(shape):
        return 0.02 * jax.random.normal(next(keys), shape, jnp.float32)

    def normal_bf16(shape):
        return normal(shape).astype(jnp.bfloat16)

    p = {
        # embedding tables stay f32 (gathered in the JAX wrapper)
        "word_emb": normal((VOCAB, HIDDEN)),
        "pos_emb": normal((MAX_POS, HIDDEN)),
        "type_emb": normal((2, HIDDEN)),
        "emb_ln_g": jnp.ones((1, HIDDEN), jnp.float32),
        "emb_ln_b": jnp.zeros((1, HIDDEN), jnp.float32),
        # matmul weights stored bf16 (MXU-native on v6e/v7x); biases / LN params f32
        "qkv_w": normal_bf16((NUM_LAYERS, HIDDEN, 3 * HIDDEN)),
        "qkv_b": jnp.zeros((NUM_LAYERS, 1, 3 * HIDDEN), jnp.float32),
        "o_w": normal_bf16((NUM_LAYERS, HIDDEN, HIDDEN)),
        "o_b": jnp.zeros((NUM_LAYERS, 1, HIDDEN), jnp.float32),
        "ln1_g": jnp.ones((NUM_LAYERS, 1, HIDDEN), jnp.float32),
        "ln1_b": jnp.zeros((NUM_LAYERS, 1, HIDDEN), jnp.float32),
        "i_w": normal_bf16((NUM_LAYERS, HIDDEN, INTERMEDIATE)),
        "i_b": jnp.zeros((NUM_LAYERS, 1, INTERMEDIATE), jnp.float32),
        "f_w": normal_bf16((NUM_LAYERS, INTERMEDIATE, HIDDEN)),
        "f_b": jnp.zeros((NUM_LAYERS, 1, HIDDEN), jnp.float32),
        "ln2_g": jnp.ones((NUM_LAYERS, 1, HIDDEN), jnp.float32),
        "ln2_b": jnp.zeros((NUM_LAYERS, 1, HIDDEN), jnp.float32),
        "pool_w": normal_bf16((HIDDEN, HIDDEN)),
        "pool_b": jnp.zeros((1, HIDDEN), jnp.float32),
    }
    # classifier zero-padded to a lane-dense (H, 128); real logits live in columns [:4]
    cls_w = normal((HIDDEN, NUM_CLASSES))
    cls_b = normal((1, NUM_CLASSES))
    p["cls_w_pad"] = (jnp.zeros((HIDDEN, CLS_PAD), jnp.float32)
                      .at[:, :NUM_CLASSES].set(cls_w).astype(jnp.bfloat16))
    p["cls_b_pad"] = jnp.zeros((1, CLS_PAD), jnp.float32).at[:, :NUM_CLASSES].set(cls_b)
    return p


# ---------------- attention-bias construction (block-diag + HF padding mask) ----------------
def _build_attention_bias(attention_mask):
    """(B, L) int mask -> (NH*B*L, NH*B*L) additive bias for the folded attention."""
    B, L = attention_mask.shape
    fold = NUM_HEADS * B * L
    neg = jnp.float32(NEG_INF)
    key_bias = (1.0 - attention_mask.astype(jnp.float32)) * neg          # (B, L)
    idx = jnp.arange(fold)
    blk = idx // L                         # block id = head * B + batch
    col_b = blk % B                        # batch of each key row
    col_j = idx % L                        # position of each key row
    kb = key_bias[col_b, col_j]            # (fold,)
    same = blk[:, None] == blk[None, :]    # block-diagonal structural mask
    return jnp.where(same, kb[None, :], neg)


# ---------------- forward pass ----------------
def bert_classifier_forward(params, input_id, attention_mask):
    B, L = input_id.shape
    fold_rows = NUM_HEADS * B * L

    # embedding-table gathers are glue in plain JAX; everything else runs in the fused kernel
    pos = jnp.arange(L)
    emb = (params["word_emb"][input_id]
           + params["pos_emb"][pos][None, :, :]
           + params["type_emb"][0][None, None, :]).reshape(B * L, HIDDEN)
    attn_bias = _build_attention_bias(attention_mask)                    # (fold, fold) f32

    out_slab = pl.pallas_call(
        functools.partial(_bert_fused_kernel, batch=B, seq_len=L),
        out_shape=jax.ShapeDtypeStruct((B * L, CLS_PAD), jnp.float32),
        scratch_shapes=[
            pltpu.VMEM((fold_rows, HEAD_DIM), jnp.float32),   # q folded (head,batch,pos)
            pltpu.VMEM((fold_rows, HEAD_DIM), jnp.float32),   # k folded
            pltpu.VMEM((fold_rows, HEAD_DIM), jnp.float32),   # v folded
            pltpu.VMEM((B * L, HIDDEN), jnp.float32),         # ctx (heads merged to lanes)
        ],
    )(emb, attn_bias,
      params["emb_ln_g"], params["emb_ln_b"],
      params["qkv_w"], params["qkv_b"], params["o_w"], params["o_b"],
      params["ln1_g"], params["ln1_b"],
      params["i_w"], params["i_b"], params["f_w"], params["f_b"],
      params["ln2_g"], params["ln2_b"],
      params["pool_w"], params["pool_b"], params["cls_w_pad"], params["cls_b_pad"])

    # pick the CLS row of each sequence and the 4 real logit columns
    return out_slab.reshape(B, L, CLS_PAD)[:, 0, :NUM_CLASSES]


if __name__ == "__main__":
    root = jax.random.PRNGKey(0)
    k_params, k_ids = jax.random.split(root)

    params = init_params(k_params)

    B, L = 2, 8
    input_id = jax.random.randint(k_ids, (B, L), 0, VOCAB, dtype=jnp.int32)
    attention_mask = jnp.array([[1, 1, 1, 1, 1, 1, 1, 1],
                                [1, 1, 1, 1, 1, 1, 0, 0]], dtype=jnp.int32)

    fwd = jax.jit(bert_classifier_forward)
    out = fwd(params, input_id, attention_mask)
    out = jax.block_until_ready(out)

    assert out.shape == (B, NUM_CLASSES)
    assert bool(jnp.all(out >= 0.0))          # ReLU output
    assert bool(jnp.all(jnp.isfinite(out)))
    print("KERNEL_OK")
</pallas_src>

<mosaic_0001>
module attributes {stable_mosaic.version = 11 : i64} {
  func.func @_bert_fused_kernel(%arg0: memref<16x128xf32, #tpu.memory_space<vmem>>, %arg1: memref<64x64xf32, #tpu.memory_space<vmem>>, %arg2: memref<1x128xf32, #tpu.memory_space<vmem>>, %arg3: memref<1x128xf32, #tpu.memory_space<vmem>>, %arg4: memref<2x128x384xbf16, #tpu.memory_space<vmem>>, %arg5: memref<2x1x384xf32, #tpu.memory_space<vmem>>, %arg6: memref<2x128x128xbf16, #tpu.memory_space<vmem>>, %arg7: memref<2x1x128xf32, #tpu.memory_space<vmem>>, %arg8: memref<2x1x128xf32, #tpu.memory_space<vmem>>, %arg9: memref<2x1x128xf32, #tpu.memory_space<vmem>>, %arg10: memref<2x128x256xbf16, #tpu.memory_space<vmem>>, %arg11: memref<2x1x256xf32, #tpu.memory_space<vmem>>, %arg12: memref<2x256x128xbf16, #tpu.memory_space<vmem>>, %arg13: memref<2x1x128xf32, #tpu.memory_space<vmem>>, %arg14: memref<2x1x128xf32, #tpu.memory_space<vmem>>, %arg15: memref<2x1x128xf32, #tpu.memory_space<vmem>>, %arg16: memref<128x128xbf16, #tpu.memory_space<vmem>>, %arg17: memref<1x128xf32, #tpu.memory_space<vmem>>, %arg18: memref<128x128xbf16, #tpu.memory_space<vmem>>, %arg19: memref<1x128xf32, #tpu.memory_space<vmem>>, %arg20: memref<16x128xf32, #tpu.memory_space<vmem>>, %arg21: memref<64x32xf32, #tpu.memory_space<vmem>>, %arg22: memref<64x32xf32, #tpu.memory_space<vmem>>, %arg23: memref<64x32xf32, #tpu.memory_space<vmem>>, %arg24: memref<16x128xf32, #tpu.memory_space<vmem>>) attributes {dimension_semantics = [], scalar_prefetch = 0 : i64, scratch_operands = 4 : i64, tpu.core_type = #tpu.core_type<tc>} {
    %c0 = arith.constant 0 : index
    %c0_0 = arith.constant 0 : index
    %0 = vector.load %arg1[%c0, %c0_0] : memref<64x64xf32, #tpu.memory_space<vmem>>, vector<64x64xf32>
    %c0_1 = arith.constant 0 : index
    %c0_2 = arith.constant 0 : index
    %1 = vector.load %arg0[%c0_1, %c0_2] : memref<16x128xf32, #tpu.memory_space<vmem>>, vector<16x128xf32>
    %c0_3 = arith.constant 0 : index
    %c0_4 = arith.constant 0 : index
    %2 = vector.load %arg2[%c0_3, %c0_4] : memref<1x128xf32, #tpu.memory_space<vmem>>, vector<1x128xf32>
    %c0_5 = arith.constant 0 : index
    %c0_6 = arith.constant 0 : index
    %3 = vector.load %arg3[%c0_5, %c0_6] : memref<1x128xf32, #tpu.memory_space<vmem>>, vector<1x128xf32>
    %cst = arith.constant dense<0.000000e+00> : vector<16xf32>
    %4 = vector.multi_reduction <add>, %1, %cst [1] : vector<16x128xf32> to vector<16xf32>
    %5 = vector.shape_cast %4 : vector<16xf32> to vector<16x1xf32>
    %cst_7 = arith.constant 7.812500e-03 : f32
    %6 = vector.broadcast %cst_7 : f32 to vector<16x1xf32>
    %7 = arith.mulf %5, %6 : vector<16x1xf32>
    %8 = arith.mulf %1, %1 : vector<16x128xf32>
    %cst_8 = arith.constant dense<0.000000e+00> : vector<16xf32>
    %9 = vector.multi_reduction <add>, %8, %cst_8 [1] : vector<16x128xf32> to vector<16xf32>
    %10 = vector.shape_cast %9 : vector<16xf32> to vector<16x1xf32>
    %cst_9 = arith.constant 7.812500e-03 : f32
    %11 = vector.broadcast %cst_9 : f32 to vector<16x1xf32>
    %12 = arith.mulf %10, %11 : vector<16x1xf32>
    %13 = arith.mulf %7, %7 : vector<16x1xf32>
    %14 = arith.subf %12, %13 : vector<16x1xf32>
    %cst_10 = arith.constant 0.000000e+00 : f32
    %15 = vector.broadcast %cst_10 : f32 to vector<16x1xf32>
    %16 = arith.maximumf %14, %15 : vector<16x1xf32>
    %17 = vector.broadcast %7 : vector<16x1xf32> to vector<16x128xf32>
    %18 = arith.subf %1, %17 : vector<16x128xf32>
    %cst_11 = arith.constant 9.99999996E-13 : f32
    %19 = vector.broadcast %cst_11 : f32 to vector<16x1xf32>
    %20 = arith.addf %16, %19 : vector<16x1xf32>
    %21 = math.rsqrt %20 : vector<16x1xf32>
    %22 = vector.broadcast %21 : vector<16x1xf32> to vector<16x128xf32>
    %23 = arith.mulf %18, %22 : vector<16x128xf32>
    %24 = vector.broadcast %2 : vector<1x128xf32> to vector<16x128xf32>
    %25 = arith.mulf %23, %24 : vector<16x128xf32>
    %26 = vector.broadcast %3 : vector<1x128xf32> to vector<16x128xf32>
    %27 = arith.addf %25, %26 : vector<16x128xf32>
    %28 = arith.truncf %27 : vector<16x128xf32> to vector<16x128xbf16>
    %c0_12 = arith.constant 0 : index
    %c0_13 = arith.constant 0 : index
    %c0_14 = arith.constant 0 : index
    %29 = vector.load %arg4[%c0_12, %c0_13, %c0_14] : memref<2x128x384xbf16, #tpu.memory_space<vmem>>, vector<1x128x384xbf16>
    %30 = vector.shape_cast %29 : vector<1x128x384xbf16> to vector<128x384xbf16>
    %cst_15 = arith.constant dense<0.000000e+00> : vector<16x384xf32>
    %31 = tpu.matmul %28, %30, %cst_15 {dimension_numbers = #tpu.dot_dimension_numbers<[1], [0], [0], [1], [0, 0, 1, 1], [], []>} : vector<16x128xbf16>, vector<128x384xbf16>, vector<16x384xf32> -> vector<16x384xf32>
    %c0_16 = arith.constant 0 : index
    %c0_17 = arith.constant 0 : index
    %c0_18 = arith.constant 0 : index
    %32 = vector.load %arg5[%c0_16, %c0_17, %c0_18] : memref<2x1x384xf32, #tpu.memory_space<vmem>>, vector<1x1x384xf32>
    %33 = vector.shape_cast %32 : vector<1x1x384xf32> to vector<1x384xf32>
    %34 = vector.broadcast %33 : vector<1x384xf32> to vector<16x384xf32>
    %35 = arith.addf %31, %34 : vector<16x384xf32>
    %36 = vector.extract_strided_slice %35 {offsets = [0, 0], sizes = [16, 32], strides = [1, 1]} : vector<16x384xf32> to vector<16x32xf32>
    %c0_19 = arith.constant 0 : index
    %c0_20 = arith.constant 0 : index
    %37 = vector.load %arg21[%c0_19, %c0_20] : memref<64x32xf32, #tpu.memory_space<vmem>>, vector<16x32xf32>
    tpu.vector_store %arg21[%c0_19, %c0_20], %36 {strides = array<i32>} : memref<64x32xf32, #tpu.memory_space<vmem>>, vector<16x32xf32>,
    %38 = vector.extract_strided_slice %35 {offsets = [0, 128], sizes = [16, 32], strides = [1, 1]} : vector<16x384xf32> to vector<16x32xf32>
    %c0_21 = arith.constant 0 : index
    %c0_22 = arith.constant 0 : index
    %39 = vector.load %arg22[%c0_21, %c0_22] : memref<64x32xf32, #tpu.memory_space<vmem>>, vector<16x32xf32>
    tpu.vector_store %arg22[%c0_21, %c0_22], %38 {strides = array<i32>} : memref<64x32xf32, #tpu.memory_space<vmem>>, vector<16x32xf32>,
    %40 = vector.extract_strided_slice %35 {offsets = [0, 256], sizes = [16, 32], strides = [1, 1]} : vector<16x384xf32> to vector<16x32xf32>
    %c0_23 = arith.constant 0 : index
    %c0_24 = arith.constant 0 : index
    %41 = vector.load %arg23[%c0_23, %c0_24] : memref<64x32xf32, #tpu.memory_space<vmem>>, vector<16x32xf32>
    tpu.vector_store %arg23[%c0_23, %c0_24], %40 {strides = array<i32>} : memref<64x32xf32, #tpu.memory_space<vmem>>, vector<16x32xf32>,
    %42 = vector.extract_strided_slice %35 {offsets = [0, 32], sizes = [16, 32], strides = [1, 1]} : vector<16x384xf32> to vector<16x32xf32>
    %c16 = arith.constant 16 : index
    %c0_25 = arith.constant 0 : index
    %43 = vector.load %arg21[%c16, %c0_25] : memref<64x32xf32, #tpu.memory_space<vmem>>, vector<16x32xf32>
    tpu.vector_store %arg21[%c16, %c0_25], %42 {strides = array<i32>} : memref<64x32xf32, #tpu.memory_space<vmem>>, vector<16x32xf32>,
    %44 = vector.extract_strided_slice %35 {offsets = [0, 160], sizes = [16, 32], strides = [1, 1]} : vector<16x384xf32> to vector<16x32xf32>
    %c16_26 = arith.constant 16 : index
    %c0_27 = arith.constant 0 : index
    %45 = vector.load %arg22[%c16_26, %c0_27] : memref<64x32xf32, #tpu.memory_space<vmem>>, vector<16x32xf32>
    tpu.vector_store %arg22[%c16_26, %c0_27], %44 {strides = array<i32>} : memref<64x32xf32, #tpu.memory_space<vmem>>, vector<16x32xf32>,
    %46 = vector.extract_strided_slice %35 {offsets = [0, 288], sizes = [16, 32], strides = [1, 1]} : vector<16x384xf32> to vector<16x32xf32>
    %c16_28 = arith.constant 16 : index
    %c0_29 = arith.constant 0 : index
    %47 = vector.load %arg23[%c16_28, %c0_29] : memref<64x32xf32, #tpu.memory_space<vmem>>, vector<16x32xf32>
    tpu.vector_store %arg23[%c16_28, %c0_29], %46 {strides = array<i32>} : memref<64x32xf32, #tpu.memory_space<vmem>>, vector<16x32xf32>,
    %48 = vector.extract_strided_slice %35 {offsets = [0, 64], sizes = [16, 32], strides = [1, 1]} : vector<16x384xf32> to vector<16x32xf32>
    %c32 = arith.constant 32 : index
    %c0_30 = arith.constant 0 : index
    %49 = vector.load %arg21[%c32, %c0_30] : memref<64x32xf32, #tpu.memory_space<vmem>>, vector<16x32xf32>
    tpu.vector_store %arg21[%c32, %c0_30], %48 {strides = array<i32>} : memref<64x32xf32, #tpu.memory_space<vmem>>, vector<16x32xf32>,
    %50 = vector.extract_strided_slice %35 {offsets = [0, 192], sizes = [16, 32], strides = [1, 1]} : vector<16x384xf32> to vector<16x32xf32>
    %c32_31 = arith.constant 32 : index
    %c0_32 = arith.constant 0 : index
    %51 = vector.load %arg22[%c32_31, %c0_32] : memref<64x32xf32, #tpu.memory_space<vmem>>, vector<16x32xf32>
    tpu.vector_store %arg22[%c32_31, %c0_32], %50 {strides = array<i32>} : memref<64x32xf32, #tpu.memory_space<vmem>>, vector<16x32xf32>,
    %52 = vector.extract_strided_slice %35 {offsets = [0, 320], sizes = [16, 32], strides = [1, 1]} : vector<16x384xf32> to vector<16x32xf32>
    %c32_33 = arith.constant 32 : index
    %c0_34 = arith.constant 0 : index
    %53 = vector.load %arg23[%c32_33, %c0_34] : memref<64x32xf32, #tpu.memory_space<vmem>>, vector<16x32xf32>
    tpu.vector_store %arg23[%c32_33, %c0_34], %52 {strides = array<i32>} : memref<64x32xf32, #tpu.memory_space<vmem>>, vector<16x32xf32>,
    %54 = vector.extract_strided_slice %35 {offsets = [0, 96], sizes = [16, 32], strides = [1, 1]} : vector<16x384xf32> to vector<16x32xf32>
    %c48 = arith.constant 48 : index
    %c0_35 = arith.constant 0 : index
    %55 = vector.load %arg21[%c48, %c0_35] : memref<64x32xf32, #tpu.memory_space<vmem>>, vector<16x32xf32>
    tpu.vector_store %arg21[%c48, %c0_35], %54 {strides = array<i32>} : memref<64x32xf32, #tpu.memory_space<vmem>>, vector<16x32xf32>,
    %56 = vector.extract_strided_slice %35 {offsets = [0, 224], sizes = [16, 32], strides = [1, 1]} : vector<16x384xf32> to vector<16x32xf32>
    %c48_36 = arith.constant 48 : index
    %c0_37 = arith.constant 0 : index
    %57 = vector.load %arg22[%c48_36, %c0_37] : memref<64x32xf32, #tpu.memory_space<vmem>>, vector<16x32xf32>
    tpu.vector_store %arg22[%c48_36, %c0_37], %56 {strides = array<i32>} : memref<64x32xf32, #tpu.memory_space<vmem>>, vector<16x32xf32>,
    %58 = vector.extract_strided_slice %35 {offsets = [0, 352], sizes = [16, 32], strides = [1, 1]} : vector<16x384xf32> to vector<16x32xf32>
    %c48_38 = arith.constant 48 : index
    %c0_39 = arith.constant 0 : index
    %59 = vector.load %arg23[%c48_38, %c0_39] : memref<64x32xf32, #tpu.memory_space<vmem>>, vector<16x32xf32>
    tpu.vector_store %arg23[%c48_38, %c0_39], %58 {strides = array<i32>} : memref<64x32xf32, #tpu.memory_space<vmem>>, vector<16x32xf32>,
    %c0_40 = arith.constant 0 : index
    %c0_41 = arith.constant 0 : index
    %60 = vector.load %arg21[%c0_40, %c0_41] : memref<64x32xf32, #tpu.memory_space<vmem>>, vector<64x32xf32>
    %61 = arith.truncf %60 : vector<64x32xf32> to vector<64x32xbf16>
    %c0_42 = arith.constant 0 : index
    %c0_43 = arith.constant 0 : index
    %62 = vector.load %arg22[%c0_42, %c0_43] : memref<64x32xf32, #tpu.memory_space<vmem>>, vector<64x32xf32>
    %63 = arith.truncf %62 : vector<64x32xf32> to vector<64x32xbf16>
    %cst_44 = arith.constant dense<0.000000e+00> : vector<64x64xf32>
    %64 = tpu.matmul %61, %63, %cst_44 {dimension_numbers = #tpu.dot_dimension_numbers<[1], [1], [0], [0], [0, 0, 1, 0], [], []>} : vector<64x32xbf16>, vector<64x32xbf16>, vector<64x64xf32> -> vector<64x64xf32>
    %cst_45 = arith.constant 0.176776692 : f32
    %65 = vector.broadcast %cst_45 : f32 to vector<64x64xf32>
    %66 = arith.mulf %64, %65 : vector<64x64xf32>
    %67 = arith.addf %66, %0 : vector<64x64xf32>
    %cst_46 = arith.constant dense<0xFF800000> : vector<64xf32>
    %68 = vector.multi_reduction <maximumf>, %67, %cst_46 [1] : vector<64x64xf32> to vector<64xf32>
    %69 = vector.shape_cast %68 : vector<64xf32> to vector<64x1xf32>
    %70 = vector.broadcast %69 : vector<64x1xf32> to vector<64x64xf32>
    %71 = arith.subf %67, %70 : vector<64x64xf32>
    %72 = math.exp %71 : vector<64x64xf32>
    %cst_47 = arith.constant dense<0.000000e+00> : vector<64xf32>
    %73 = vector.multi_reduction <add>, %72, %cst_47 [1] : vector<64x64xf32> to vector<64xf32>
    %74 = vector.shape_cast %73 : vector<64xf32> to vector<64x1xf32>
    %75 = tpu.reciprocal %74 {approx = true} : vector<64x1xf32> -> vector<64x1xf32>
    %76 = vector.broadcast %75 : vector<64x1xf32> to vector<64x64xf32>
    %77 = arith.mulf %72, %76 : vector<64x64xf32>
    %78 = arith.truncf %77 : vector<64x64xf32> to vector<64x64xbf16>
    %c0_48 = arith.constant 0 : index
    %c0_49 = arith.constant 0 : index
    %79 = vector.load %arg23[%c0_48, %c0_49] : memref<64x32xf32, #tpu.memory_space<vmem>>, vector<64x32xf32>
    %80 = arith.truncf %79 : vector<64x32xf32> to vector<64x32xbf16>
    %cst_50 = arith.constant dense<0.000000e+00> : vector<64x32xf32>
    %81 = tpu.matmul %78, %80, %cst_50 {dimension_numbers = #tpu.dot_dimension_numbers<[1], [0], [0], [1], [0, 0, 1, 1], [], []>} : vector<64x64xbf16>, vector<64x32xbf16>, vector<64x32xf32> -> vector<64x32xf32>
    %82 = vector.extract_strided_slice %81 {offsets = [0, 0], sizes = [16, 32], strides = [1, 1]} : vector<64x32xf32> to vector<16x32xf32>
    %c0_51 = arith.constant 0 : index
    %c0_52 = arith.constant 0 : index
    %83 = vector.load %arg24[%c0_51, %c0_52] : memref<16x128xf32, #tpu.memory_space<vmem>>, vector<16x32xf32>
    tpu.vector_store %arg24[%c0_51, %c0_52], %82 {strides = array<i32>} : memref<16x128xf32, #tpu.memory_space<vmem>>, vector<16x32xf32>,
    %84 = vector.extract_strided_slice %81 {offsets = [16, 0], sizes = [16, 32], strides = [1, 1]} : vector<64x32xf32> to vector<16x32xf32>
    %c0_53 = arith.constant 0 : index
    %c32_54 = arith.constant 32 : index
    %85 = vector.load %arg24[%c0_53, %c32_54] : memref<16x128xf32, #tpu.memory_space<vmem>>, vector<16x32xf32>
    tpu.vector_store %arg24[%c0_53, %c32_54], %84 {strides = array<i32>} : memref<16x128xf32, #tpu.memory_space<vmem>>, vector<16x32xf32>,
    %86 = vector.extract_strided_slice %81 {offsets = [32, 0], sizes = [16, 32], strides = [1, 1]} : vector<64x32xf32> to vector<16x32xf32>
    %c0_55 = arith.constant 0 : index
    %c64 = arith.constant 64 : index
    %87 = vector.load %arg24[%c0_55, %c64] : memref<16x128xf32, #tpu.memory_space<vmem>>, vector<16x32xf32>
    tpu.vector_store %arg24[%c0_55, %c64], %86 {strides = array<i32>} : memref<16x128xf32, #tpu.memory_space<vmem>>, vector<16x32xf32>,
    %88 = vector.extract_strided_slice %81 {offsets = [48, 0], sizes = [16, 32], strides = [1, 1]} : vector<64x32xf32> to vector<16x32xf32>
    %c0_56 = arith.constant 0 : index
    %c96 = arith.constant 96 : index
    %89 = vector.load %arg24[%c0_56, %c96] : memref<16x128xf32, #tpu.memory_space<vmem>>, vector<16x32xf32>
    tpu.vector_store %arg24[%c0_56, %c96], %88 {strides = array<i32>} : memref<16x128xf32, #tpu.memory_space<vmem>>, vector<16x32xf32>,
    %c0_57 = arith.constant 0 : index
    %c0_58 = arith.constant 0 : index
    %90 = vector.load %arg24[%c0_57, %c0_58] : memref<16x128xf32, #tpu.memory_space<vmem>>, vector<16x128xf32>
    %91 = arith.truncf %90 : vector<16x128xf32> to vector<16x128xbf16>
    %c0_59 = arith.constant 0 : index
    %c0_60 = arith.constant 0 : index
    %c0_61 = arith.constant 0 : index
    %92 = vector.load %arg6[%c0_59, %c0_60, %c0_61] : memref<2x128x128xbf16, #tpu.memory_space<vmem>>, vector<1x128x128xbf16>
    %93 = vector.shape_cast %92 : vector<1x128x128xbf16> to vector<128x128xbf16>
    %cst_62 = arith.constant dense<0.000000e+00> : vector<16x128xf32>
    %94 = tpu.matmul %91, %93, %cst_62 {dimension_numbers = #tpu.dot_dimension_numbers<[1], [0], [0], [1], [0, 0, 1, 1], [], []>} : vector<16x128xbf16>, vector<128x128xbf16>, vector<16x128xf32> -> vector<16x128xf32>
    %c0_63 = arith.constant 0 : index
    %c0_64 = arith.constant 0 : index
    %c0_65 = arith.constant 0 : index
    %95 = vector.load %arg7[%c0_63, %c0_64, %c0_65] : memref<2x1x128xf32, #tpu.memory_space<vmem>>, vector<1x1x128xf32>
    %96 = vector.shape_cast %95 : vector<1x1x128xf32> to vector<1x128xf32>
    %97 = vector.broadcast %96 : vector<1x128xf32> to vector<16x128xf32>
    %98 = arith.addf %94, %97 : vector<16x128xf32>
    %99 = arith.addf %98, %27 : vector<16x128xf32>
    %c0_66 = arith.constant 0 : index
    %c0_67 = arith.constant 0 : index
    %c0_68 = arith.constant 0 : index
    %100 = vector.load %arg8[%c0_66, %c0_67, %c0_68] : memref<2x1x128xf32, #tpu.memory_space<vmem>>, vector<1x1x128xf32>
    %101 = vector.shape_cast %100 : vector<1x1x128xf32> to vector<1x128xf32>
    %c0_69 = arith.constant 0 : index
    %c0_70 = arith.constant 0 : index
    %c0_71 = arith.constant 0 : index
    %102 = vector.load %arg9[%c0_69, %c0_70, %c0_71] : memref<2x1x128xf32, #tpu.memory_space<vmem>>, vector<1x1x128xf32>
    %103 = vector.shape_cast %102 : vector<1x1x128xf32> to vector<1x128xf32>
    %cst_72 = arith.constant dense<0.000000e+00> : vector<16xf32>
    %104 = vector.multi_reduction <add>, %99, %cst_72 [1] : vector<16x128xf32> to vector<16xf32>
    %105 = vector.shape_cast %104 : vector<16xf32> to vector<16x1xf32>
    %cst_73 = arith.constant 7.812500e-03 : f32
    %106 = vector.broadcast %cst_73 : f32 to vector<16x1xf32>
    %107 = arith.mulf %105, %106 : vector<16x1xf32>
    %108 = arith.mulf %99, %99 : vector<16x128xf32>
    %cst_74 = arith.constant dense<0.000000e+00> : vector<16xf32>
    %109 = vector.multi_reduction <add>, %108, %cst_74 [1] : vector<16x128xf32> to vector<16xf32>
    %110 = vector.shape_cast %109 : vector<16xf32> to vector<16x1xf32>
    %cst_75 = arith.constant 7.812500e-03 : f32
    %111 = vector.broadcast %cst_75 : f32 to vector<16x1xf32>
    %112 = arith.mulf %110, %111 : vector<16x1xf32>
    %113 = arith.mulf %107, %107 : vector<16x1xf32>
    %114 = arith.subf %112, %113 : vector<16x1xf32>
    %cst_76 = arith.constant 0.000000e+00 : f32
    %115 = vector.broadcast %cst_76 : f32 to vector<16x1xf32>
    %116 = arith.maximumf %114, %115 : vector<16x1xf32>
    %117 = vector.broadcast %107 : vector<16x1xf32> to vector<16x128xf32>
    %118 = arith.subf %99, %117 : vector<16x128xf32>
    %cst_77 = arith.constant 9.99999996E-13 : f32
    %119 = vector.broadcast %cst_77 : f32 to vector<16x1xf32>
    %120 = arith.addf %116, %119 : vector<16x1xf32>
    %121 = math.rsqrt %120 : vector<16x1xf32>
    %122 = vector.broadcast %121 : vector<16x1xf32> to vector<16x128xf32>
    %123 = arith.mulf %118, %122 : vector<16x128xf32>
    %124 = vector.broadcast %101 : vector<1x128xf32> to vector<16x128xf32>
    %125 = arith.mulf %123, %124 : vector<16x128xf32>
    %126 = vector.broadcast %103 : vector<1x128xf32> to vector<16x128xf32>
    %127 = arith.addf %125, %126 : vector<16x128xf32>
    %128 = arith.truncf %127 : vector<16x128xf32> to vector<16x128xbf16>
    %c0_78 = arith.constant 0 : index
    %c0_79 = arith.constant 0 : index
    %c0_80 = arith.constant 0 : index
    %129 = vector.load %arg10[%c0_78, %c0_79, %c0_80] : memref<2x128x256xbf16, #tpu.memory_space<vmem>>, vector<1x128x256xbf16>
    %130 = vector.shape_cast %129 : vector<1x128x256xbf16> to vector<128x256xbf16>
    %cst_81 = arith.constant dense<0.000000e+00> : vector<16x256xf32>
    %131 = tpu.matmul %128, %130, %cst_81 {dimension_numbers = #tpu.dot_dimension_numbers<[1], [0], [0], [1], [0, 0, 1, 1], [], []>} : vector<16x128xbf16>, vector<128x256xbf16>, vector<16x256xf32> -> vector<16x256xf32>
    %c0_82 = arith.constant 0 : index
    %c0_83 = arith.constant 0 : index
    %c0_84 = arith.constant 0 : index
    %132 = vector.load %arg11[%c0_82, %c0_83, %c0_84] : memref<2x1x256xf32, #tpu.memory_space<vmem>>, vector<1x1x256xf32>
    %133 = vector.shape_cast %132 : vector<1x1x256xf32> to vector<1x256xf32>
    %134 = vector.broadcast %133 : vector<1x256xf32> to vector<16x256xf32>
    %135 = arith.addf %131, %134 : vector<16x256xf32>
    %cst_85 = arith.constant 5.000000e-01 : f32
    %136 = vector.broadcast %cst_85 : f32 to vector<16x256xf32>
    %137 = arith.mulf %136, %135 : vector<16x256xf32>
    %cst_86 = arith.constant 4.471500e-02 : f32
    %138 = vector.broadcast %cst_86 : f32 to vector<16x256xf32>
    %139 = arith.mulf %138, %135 : vector<16x256xf32>
    %140 = arith.mulf %139, %135 : vector<16x256xf32>
    %141 = arith.mulf %140, %135 : vector<16x256xf32>
    %142 = arith.addf %135, %141 : vector<16x256xf32>
    %cst_87 = arith.constant 0.797884583 : f32
    %143 = vector.broadcast %cst_87 : f32 to vector<16x256xf32>
    %144 = arith.mulf %143, %142 : vector<16x256xf32>
    %145 = math.tanh %144 : vector<16x256xf32>
    %cst_88 = arith.constant 1.000000e+00 : f32
    %146 = vector.broadcast %cst_88 : f32 to vector<16x256xf32>
    %147 = arith.addf %146, %145 : vector<16x256xf32>
    %148 = arith.mulf %137, %147 : vector<16x256xf32>
    %149 = arith.truncf %148 : vector<16x256xf32> to vector<16x256xbf16>
    %c0_89 = arith.constant 0 : index
    %c0_90 = arith.constant 0 : index
    %c0_91 = arith.constant 0 : index
    %150 = vector.load %arg12[%c0_89, %c0_90, %c0_91] : memref<2x256x128xbf16, #tpu.memory_space<vmem>>, vector<1x256x128xbf16>
    %151 = vector.shape_cast %150 : vector<1x256x128xbf16> to vector<256x128xbf16>
    %cst_92 = arith.constant dense<0.000000e+00> : vector<16x128xf32>
    %152 = tpu.matmul %149, %151, %cst_92 {dimension_numbers = #tpu.dot_dimension_numbers<[1], [0], [0], [1], [0, 0, 1, 1], [], []>} : vector<16x256xbf16>, vector<256x128xbf16>, vector<16x128xf32> -> vector<16x128xf32>
    %c0_93 = arith.constant 0 : index
    %c0_94 = arith.constant 0 : index
    %c0_95 = arith.constant 0 : index
    %153 = vector.load %arg13[%c0_93, %c0_94, %c0_95] : memref<2x1x128xf32, #tpu.memory_space<vmem>>, vector<1x1x128xf32>
    %154 = vector.shape_cast %153 : vector<1x1x128xf32> to vector<1x128xf32>
    %155 = vector.broadcast %154 : vector<1x128xf32> to vector<16x128xf32>
    %156 = arith.addf %152, %155 : vector<16x128xf32>
    %157 = arith.addf %156, %127 : vector<16x128xf32>
    %c0_96 = arith.constant 0 : index
    %c0_97 = arith.constant 0 : index
    %c0_98 = arith.constant 0 : index
    %158 = vector.load %arg14[%c0_96, %c0_97, %c0_98] : memref<2x1x128xf32, #tpu.memory_space<vmem>>, vector<1x1x128xf32>
    %159 = vector.shape_cast %158 : vector<1x1x128xf32> to vector<1x128xf32>
    %c0_99 = arith.constant 0 : index
    %c0_100 = arith.constant 0 : index
    %c0_101 = arith.constant 0 : index
    %160 = vector.load %arg15[%c0_99, %c0_100, %c0_101] : memref<2x1x128xf32, #tpu.memory_space<vmem>>, vector<1x1x128xf32>
    %161 = vector.shape_cast %160 : vector<1x1x128xf32> to vector<1x128xf32>
    %cst_102 = arith.constant dense<0.000000e+00> : vector<16xf32>
    %162 = vector.multi_reduction <add>, %157, %cst_102 [1] : vector<16x128xf32> to vector<16xf32>
    %163 = vector.shape_cast %162 : vector<16xf32> to vector<16x1xf32>
    %cst_103 = arith.constant 7.812500e-03 : f32
    %164 = vector.broadcast %cst_103 : f32 to vector<16x1xf32>
    %165 = arith.mulf %163, %164 : vector<16x1xf32>
    %166 = arith.mulf %157, %157 : vector<16x128xf32>
    %cst_104 = arith.constant dense<0.000000e+00> : vector<16xf32>
    %167 = vector.multi_reduction <add>, %166, %cst_104 [1] : vector<16x128xf32> to vector<16xf32>
    %168 = vector.shape_cast %167 : vector<16xf32> to vector<16x1xf32>
    %cst_105 = arith.constant 7.812500e-03 : f32
    %169 = vector.broadcast %cst_105 : f32 to vector<16x1xf32>
    %170 = arith.mulf %168, %169 : vector<16x1xf32>
    %171 = arith.mulf %165, %165 : vector<16x1xf32>
    %172 = arith.subf %170, %171 : vector<16x1xf32>
    %cst_106 = arith.constant 0.000000e+00 : f32
    %173 = vector.broadcast %cst_106 : f32 to vector<16x1xf32>
    %174 = arith.maximumf %172, %173 : vector<16x1xf32>
    %175 = vector.broadcast %165 : vector<16x1xf32> to vector<16x128xf32>
    %176 = arith.subf %157, %175 : vector<16x128xf32>
    %cst_107 = arith.constant 9.99999996E-13 : f32
    %177 = vector.broadcast %cst_107 : f32 to vector<16x1xf32>
    %178 = arith.addf %174, %177 : vector<16x1xf32>
    %179 = math.rsqrt %178 : vector<16x1xf32>
    %180 = vector.broadcast %179 : vector<16x1xf32> to vector<16x128xf32>
    %181 = arith.mulf %176, %180 : vector<16x128xf32>
    %182 = vector.broadcast %159 : vector<1x128xf32> to vector<16x128xf32>
    %183 = arith.mulf %181, %182 : vector<16x128xf32>
    %184 = vector.broadcast %161 : vector<1x128xf32> to vector<16x128xf32>
    %185 = arith.addf %183, %184 : vector<16x128xf32>
    %186 = arith.truncf %185 : vector<16x128xf32> to vector<16x128xbf16>
    %c1 = arith.constant 1 : index
    %c0_108 = arith.constant 0 : index
    %c0_109 = arith.constant 0 : index
    %187 = vector.load %arg4[%c1, %c0_108, %c0_109] : memref<2x128x384xbf16, #tpu.memory_space<vmem>>, vector<1x128x384xbf16>
    %188 = vector.shape_cast %187 : vector<1x128x384xbf16> to vector<128x384xbf16>
    %cst_110 = arith.constant dense<0.000000e+00> : vector<16x384xf32>
    %189 = tpu.matmul %186, %188, %cst_110 {dimension_numbers = #tpu.dot_dimension_numbers<[1], [0], [0], [1], [0, 0, 1, 1], [], []>} : vector<16x128xbf16>, vector<128x384xbf16>, vector<16x384xf32> -> vector<16x384xf32>
    %c1_111 = arith.constant 1 : index
    %c0_112 = arith.constant 0 : index
    %c0_113 = arith.constant 0 : index
    %190 = vector.load %arg5[%c1_111, %c0_112, %c0_113] : memref<2x1x384xf32, #tpu.memory_space<vmem>>, vector<1x1x384xf32>
    %191 = vector.shape_cast %190 : vector<1x1x384xf32> to vector<1x384xf32>
    %192 = vector.broadcast %191 : vector<1x384xf32> to vector<16x384xf32>
    %193 = arith.addf %189, %192 : vector<16x384xf32>
    %194 = vector.extract_strided_slice %193 {offsets = [0, 0], sizes = [16, 32], strides = [1, 1]} : vector<16x384xf32> to vector<16x32xf32>
    %c0_114 = arith.constant 0 : index
    %c0_115 = arith.constant 0 : index
    %195 = vector.load %arg21[%c0_114, %c0_115] : memref<64x32xf32, #tpu.memory_space<vmem>>, vector<16x32xf32>
    tpu.vector_store %arg21[%c0_114, %c0_115], %194 {strides = array<i32>} : memref<64x32xf32, #tpu.memory_space<vmem>>, vector<16x32xf32>,
    %196 = vector.extract_strided_slice %193 {offsets = [0, 128], sizes = [16, 32], strides = [1, 1]} : vector<16x384xf32> to vector<16x32xf32>
    %c0_116 = arith.constant 0 : index
    %c0_117 = arith.constant 0 : index
    %197 = vector.load %arg22[%c0_116, %c0_117] : memref<64x32xf32, #tpu.memory_space<vmem>>, vector<16x32xf32>
    tpu.vector_store %arg22[%c0_116, %c0_117], %196 {strides = array<i32>} : memref<64x32xf32, #tpu.memory_space<vmem>>, vector<16x32xf32>,
    %198 = vector.extract_strided_slice %193 {offsets = [0, 256], sizes = [16, 32], strides = [1, 1]} : vector<16x384xf32> to vector<16x32xf32>
    %c0_118 = arith.constant 0 : index
    %c0_119 = arith.constant 0 : index
    %199 = vector.load %arg23[%c0_118, %c0_119] : memref<64x32xf32, #tpu.memory_space<vmem>>, vector<16x32xf32>
    tpu.vector_store %arg23[%c0_118, %c0_119], %198 {strides = array<i32>} : memref<64x32xf32, #tpu.memory_space<vmem>>, vector<16x32xf32>,
    %200 = vector.extract_strided_slice %193 {offsets = [0, 32], sizes = [16, 32], strides = [1, 1]} : vector<16x384xf32> to vector<16x32xf32>
    %c16_120 = arith.constant 16 : index
    %c0_121 = arith.constant 0 : index
    %201 = vector.load %arg21[%c16_120, %c0_121] : memref<64x32xf32, #tpu.memory_space<vmem>>, vector<16x32xf32>
    tpu.vector_store %arg21[%c16_120, %c0_121], %200 {strides = array<i32>} : memref<64x32xf32, #tpu.memory_space<vmem>>, vector<16x32xf32>,
    %202 = vector.extract_strided_slice %193 {offsets = [0, 160], sizes = [16, 32], strides = [1, 1]} : vector<16x384xf32> to vector<16x32xf32>
    %c16_122 = arith.constant 16 : index
    %c0_123 = arith.constant 0 : index
    %203 = vector.load %arg22[%c16_122, %c0_123] : memref<64x32xf32, #tpu.memory_space<vmem>>, vector<16x32xf32>
    tpu.vector_store %arg22[%c16_122, %c0_123], %202 {strides = array<i32>} : memref<64x32xf32, #tpu.memory_space<vmem>>, vector<16x32xf32>,
    %204 = vector.extract_strided_slice %193 {offsets = [0, 288], sizes = [16, 32], strides = [1, 1]} : vector<16x384xf32> to vector<16x32xf32>
    %c16_124 = arith.constant 16 : index
    %c0_125 = arith.constant 0 : index
    %205 = vector.load %arg23[%c16_124, %c0_125] : memref<64x32xf32, #tpu.memory_space<vmem>>, vector<16x32xf32>
    tpu.vector_store %arg23[%c16_124, %c0_125], %204 {strides = array<i32>} : memref<64x32xf32, #tpu.memory_space<vmem>>, vector<16x32xf32>,
    %206 = vector.extract_strided_slice %193 {offsets = [0, 64], sizes = [16, 32], strides = [1, 1]} : vector<16x384xf32> to vector<16x32xf32>
    %c32_126 = arith.constant 32 : index
    %c0_127 = arith.constant 0 : index
    %207 = vector.load %arg21[%c32_126, %c0_127] : memref<64x32xf32, #tpu.memory_space<vmem>>, vector<16x32xf32>
    tpu.vector_store %arg21[%c32_126, %c0_127], %206 {strides = array<i32>} : memref<64x32xf32, #tpu.memory_space<vmem>>, vector<16x32xf32>,
    %208 = vector.extract_strided_slice %193 {offsets = [0, 192], sizes = [16, 32], strides = [1, 1]} : vector<16x384xf32> to vector<16x32xf32>
    %c32_128 = arith.constant 32 : index
    %c0_129 = arith.constant 0 : index
    %209 = vector.load %arg22[%c32_128, %c0_129] : memref<64x32xf32, #tpu.memory_space<vmem>>, vector<16x32xf32>
    tpu.vector_store %arg22[%c32_128, %c0_129], %208 {strides = array<i32>} : memref<64x32xf32, #tpu.memory_space<vmem>>, vector<16x32xf32>,
    %210 = vector.extract_strided_slice %193 {offsets = [0, 320], sizes = [16, 32], strides = [1, 1]} : vector<16x384xf32> to vector<16x32xf32>
    %c32_130 = arith.constant 32 : index
    %c0_131 = arith.constant 0 : index
    %211 = vector.load %arg23[%c32_130, %c0_131] : memref<64x32xf32, #tpu.memory_space<vmem>>, vector<16x32xf32>
    tpu.vector_store %arg23[%c32_130, %c0_131], %210 {strides = array<i32>} : memref<64x32xf32, #tpu.memory_space<vmem>>, vector<16x32xf32>,
    %212 = vector.extract_strided_slice %193 {offsets = [0, 96], sizes = [16, 32], strides = [1, 1]} : vector<16x384xf32> to vector<16x32xf32>
    %c48_132 = arith.constant 48 : index
    %c0_133 = arith.constant 0 : index
    %213 = vector.load %arg21[%c48_132, %c0_133] : memref<64x32xf32, #tpu.memory_space<vmem>>, vector<16x32xf32>
    tpu.vector_store %arg21[%c48_132, %c0_133], %212 {strides = array<i32>} : memref<64x32xf32, #tpu.memory_space<vmem>>, vector<16x32xf32>,
    %214 = vector.extract_strided_slice %193 {offsets = [0, 224], sizes = [16, 32], strides = [1, 1]} : vector<16x384xf32> to vector<16x32xf32>
    %c48_134 = arith.constant 48 : index
    %c0_135 = arith.constant 0 : index
    %215 = vector.load %arg22[%c48_134, %c0_135] : memref<64x32xf32, #tpu.memory_space<vmem>>, vector<16x32xf32>
    tpu.vector_store %arg22[%c48_134, %c0_135], %214 {strides = array<i32>} : memref<64x32xf32, #tpu.memory_space<vmem>>, vector<16x32xf32>,
    %216 = vector.extract_strided_slice %193 {offsets = [0, 352], sizes = [16, 32], strides = [1, 1]} : vector<16x384xf32> to vector<16x32xf32>
    %c48_136 = arith.constant 48 : index
    %c0_137 = arith.constant 0 : index
    %217 = vector.load %arg23[%c48_136, %c0_137] : memref<64x32xf32, #tpu.memory_space<vmem>>, vector<16x32xf32>
    tpu.vector_store %arg23[%c48_136, %c0_137], %216 {strides = array<i32>} : memref<64x32xf32, #tpu.memory_space<vmem>>, vector<16x32xf32>,
    %c0_138 = arith.constant 0 : index
    %c0_139 = arith.constant 0 : index
    %218 = vector.load %arg21[%c0_138, %c0_139] : memref<64x32xf32, #tpu.memory_space<vmem>>, vector<64x32xf32>
    %219 = arith.truncf %218 : vector<64x32xf32> to vector<64x32xbf16>
    %c0_140 = arith.constant 0 : index
    %c0_141 = arith.constant 0 : index
    %220 = vector.load %arg22[%c0_140, %c0_141] : memref<64x32xf32, #tpu.memory_space<vmem>>, vector<64x32xf32>
    %221 = arith.truncf %220 : vector<64x32xf32> to vector<64x32xbf16>
    %cst_142 = arith.constant dense<0.000000e+00> : vector<64x64xf32>
    %222 = tpu.matmul %219, %221, %cst_142 {dimension_numbers = #tpu.dot_dimension_numbers<[1], [1], [0], [0], [0, 0, 1, 0], [], []>} : vector<64x32xbf16>, vector<64x32xbf16>, vector<64x64xf32> -> vector<64x64xf32>
    %cst_143 = arith.constant 0.176776692 : f32
    %223 = vector.broadcast %cst_143 : f32 to vector<64x64xf32>
    %224 = arith.mulf %222, %223 : vector<64x64xf32>
    %225 = arith.addf %224, %0 : vector<64x64xf32>
    %cst_144 = arith.constant dense<0xFF800000> : vector<64xf32>
    %226 = vector.multi_reduction <maximumf>, %225, %cst_144 [1] : vector<64x64xf32> to vector<64xf32>
    %227 = vector.shape_cast %226 : vector<64xf32> to vector<64x1xf32>
    %228 = vector.broadcast %227 : vector<64x1xf32> to vector<64x64xf32>
    %229 = arith.subf %225, %228 : vector<64x64xf32>
    %230 = math.exp %229 : vector<64x64xf32>
    %cst_145 = arith.constant dense<0.000000e+00> : vector<64xf32>
    %231 = vector.multi_reduction <add>, %230, %cst_145 [1] : vector<64x64xf32> to vector<64xf32>
    %232 = vector.shape_cast %231 : vector<64xf32> to vector<64x1xf32>
    %233 = tpu.reciprocal %232 {approx = true} : vector<64x1xf32> -> vector<64x1xf32>
    %234 = vector.broadcast %233 : vector<64x1xf32> to vector<64x64xf32>
    %235 = arith.mulf %230, %234 : vector<64x64xf32>
    %236 = arith.truncf %235 : vector<64x64xf32> to vector<64x64xbf16>
    %c0_146 = arith.constant 0 : index
    %c0_147 = arith.constant 0 : index
    %237 = vector.load %arg23[%c0_146, %c0_147] : memref<64x32xf32, #tpu.memory_space<vmem>>, vector<64x32xf32>
    %238 = arith.truncf %237 : vector<64x32xf32> to vector<64x32xbf16>
    %cst_148 = arith.constant dense<0.000000e+00> : vector<64x32xf32>
    %239 = tpu.matmul %236, %238, %cst_148 {dimension_numbers = #tpu.dot_dimension_numbers<[1], [0], [0], [1], [0, 0, 1, 1], [], []>} : vector<64x64xbf16>, vector<64x32xbf16>, vector<64x32xf32> -> vector<64x32xf32>
    %240 = vector.extract_strided_slice %239 {offsets = [0, 0], sizes = [16, 32], strides = [1, 1]} : vector<64x32xf32> to vector<16x32xf32>
    %c0_149 = arith.constant 0 : index
    %c0_150 = arith.constant 0 : index
    %241 = vector.load %arg24[%c0_149, %c0_150] : memref<16x128xf32, #tpu.memory_space<vmem>>, vector<16x32xf32>
    tpu.vector_store %arg24[%c0_149, %c0_150], %240 {strides = array<i32>} : memref<16x128xf32, #tpu.memory_space<vmem>>, vector<16x32xf32>,
    %242 = vector.extract_strided_slice %239 {offsets = [16, 0], sizes = [16, 32], strides = [1, 1]} : vector<64x32xf32> to vector<16x32xf32>
    %c0_151 = arith.constant 0 : index
    %c32_152 = arith.constant 32 : index
    %243 = vector.load %arg24[%c0_151, %c32_152] : memref<16x128xf32, #tpu.memory_space<vmem>>, vector<16x32xf32>
    tpu.vector_store %arg24[%c0_151, %c32_152], %242 {strides = array<i32>} : memref<16x128xf32, #tpu.memory_space<vmem>>, vector<16x32xf32>,
    %244 = vector.extract_strided_slice %239 {offsets = [32, 0], sizes = [16, 32], strides = [1, 1]} : vector<64x32xf32> to vector<16x32xf32>
    %c0_153 = arith.constant 0 : index
    %c64_154 = arith.constant 64 : index
    %245 = vector.load %arg24[%c0_153, %c64_154] : memref<16x128xf32, #tpu.memory_space<vmem>>, vector<16x32xf32>
    tpu.vector_store %arg24[%c0_153, %c64_154], %244 {strides = array<i32>} : memref<16x128xf32, #tpu.memory_space<vmem>>, vector<16x32xf32>,
    %246 = vector.extract_strided_slice %239 {offsets = [48, 0], sizes = [16, 32], strides = [1, 1]} : vector<64x32xf32> to vector<16x32xf32>
    %c0_155 = arith.constant 0 : index
    %c96_156 = arith.constant 96 : index
    %247 = vector.load %arg24[%c0_155, %c96_156] : memref<16x128xf32, #tpu.memory_space<vmem>>, vector<16x32xf32>
    tpu.vector_store %arg24[%c0_155, %c96_156], %246 {strides = array<i32>} : memref<16x128xf32, #tpu.memory_space<vmem>>, vector<16x32xf32>,
    %c0_157 = arith.constant 0 : index
    %c0_158 = arith.constant 0 : index
    %248 = vector.load %arg24[%c0_157, %c0_158] : memref<16x128xf32, #tpu.memory_space<vmem>>, vector<16x128xf32>
    %249 = arith.truncf %248 : vector<16x128xf32> to vector<16x128xbf16>
    %c1_159 = arith.constant 1 : index
    %c0_160 = arith.constant 0 : index
    %c0_161 = arith.constant 0 : index
    %250 = vector.load %arg6[%c1_159, %c0_160, %c0_161] : memref<2x128x128xbf16, #tpu.memory_space<vmem>>, vector<1x128x128xbf16>
    %251 = vector.shape_cast %250 : vector<1x128x128xbf16> to vector<128x128xbf16>
    %cst_162 = arith.constant dense<0.000000e+00> : vector<16x128xf32>
    %252 = tpu.matmul %249, %251, %cst_162 {dimension_numbers = #tpu.dot_dimension_numbers<[1], [0], [0], [1], [0, 0, 1, 1], [], []>} : vector<16x128xbf16>, vector<128x128xbf16>, vector<16x128xf32> -> vector<16x128xf32>
    %c1_163 = arith.constant 1 : index
    %c0_164 = arith.constant 0 : index
    %c0_165 = arith.constant 0 : index
    %253 = vector.load %arg7[%c1_163, %c0_164, %c0_165] : memref<2x1x128xf32, #tpu.memory_space<vmem>>, vector<1x1x128xf32>
    %254 = vector.shape_cast %253 : vector<1x1x128xf32> to vector<1x128xf32>
    %255 = vector.broadcast %254 : vector<1x128xf32> to vector<16x128xf32>
    %256 = arith.addf %252, %255 : vector<16x128xf32>
    %257 = arith.addf %256, %185 : vector<16x128xf32>
    %c1_166 = arith.constant 1 : index
    %c0_167 = arith.constant 0 : index
    %c0_168 = arith.constant 0 : index
    %258 = vector.load %arg8[%c1_166, %c0_167, %c0_168] : memref<2x1x128xf32, #tpu.memory_space<vmem>>, vector<1x1x128xf32>
    %259 = vector.shape_cast %258 : vector<1x1x128xf32> to vector<1x128xf32>
    %c1_169 = arith.constant 1 : index
    %c0_170 = arith.constant 0 : index
    %c0_171 = arith.constant 0 : index
    %260 = vector.load %arg9[%c1_169, %c0_170, %c0_171] : memref<2x1x128xf32, #tpu.memory_space<vmem>>, vector<1x1x128xf32>
    %261 = vector.shape_cast %260 : vector<1x1x128xf32> to vector<1x128xf32>
    %cst_172 = arith.constant dense<0.000000e+00> : vector<16xf32>
    %262 = vector.multi_reduction <add>, %257, %cst_172 [1] : vector<16x128xf32> to vector<16xf32>
    %263 = vector.shape_cast %262 : vector<16xf32> to vector<16x1xf32>
    %cst_173 = arith.constant 7.812500e-03 : f32
    %264 = vector.broadcast %cst_173 : f32 to vector<16x1xf32>
    %265 = arith.mulf %263, %264 : vector<16x1xf32>
    %266 = arith.mulf %257, %257 : vector<16x128xf32>
    %cst_174 = arith.constant dense<0.000000e+00> : vector<16xf32>
    %267 = vector.multi_reduction <add>, %266, %cst_174 [1] : vector<16x128xf32> to vector<16xf32>
    %268 = vector.shape_cast %267 : vector<16xf32> to vector<16x1xf32>
    %cst_175 = arith.constant 7.812500e-03 : f32
    %269 = vector.broadcast %cst_175 : f32 to vector<16x1xf32>
    %270 = arith.mulf %268, %269 : vector<16x1xf32>
    %271 = arith.mulf %265, %265 : vector<16x1xf32>
    %272 = arith.subf %270, %271 : vector<16x1xf32>
    %cst_176 = arith.constant 0.000000e+00 : f32
    %273 = vector.broadcast %cst_176 : f32 to vector<16x1xf32>
    %274 = arith.maximumf %272, %273 : vector<16x1xf32>
    %275 = vector.broadcast %265 : vector<16x1xf32> to vector<16x128xf32>
    %276 = arith.subf %257, %275 : vector<16x128xf32>
    %cst_177 = arith.constant 9.99999996E-13 : f32
    %277 = vector.broadcast %cst_177 : f32 to vector<16x1xf32>
    %278 = arith.addf %274, %277 : vector<16x1xf32>
    %279 = math.rsqrt %278 : vector<16x1xf32>
    %280 = vector.broadcast %279 : vector<16x1xf32> to vector<16x128xf32>
    %281 = arith.mulf %276, %280 : vector<16x128xf32>
    %282 = vector.broadcast %259 : vector<1x128xf32> to vector<16x128xf32>
    %283 = arith.mulf %281, %282 : vector<16x128xf32>
    %284 = vector.broadcast %261 : vector<1x128xf32> to vector<16x128xf32>
    %285 = arith.addf %283, %284 : vector<16x128xf32>
    %286 = arith.truncf %285 : vector<16x128xf32> to vector<16x128xbf16>
    %c1_178 = arith.constant 1 : index
    %c0_179 = arith.constant 0 : index
    %c0_180 = arith.constant 0 : index
    %287 = vector.load %arg10[%c1_178, %c0_179, %c0_180] : memref<2x128x256xbf16, #tpu.memory_space<vmem>>, vector<1x128x256xbf16>
    %288 = vector.shape_cast %287 : vector<1x128x256xbf16> to vector<128x256xbf16>
    %cst_181 = arith.constant dense<0.000000e+00> : vector<16x256xf32>
    %289 = tpu.matmul %286, %288, %cst_181 {dimension_numbers = #tpu.dot_dimension_numbers<[1], [0], [0], [1], [0, 0, 1, 1], [], []>} : vector<16x128xbf16>, vector<128x256xbf16>, vector<16x256xf32> -> vector<16x256xf32>
    %c1_182 = arith.constant 1 : index
    %c0_183 = arith.constant 0 : index
    %c0_184 = arith.constant 0 : index
    %290 = vector.load %arg11[%c1_182, %c0_183, %c0_184] : memref<2x1x256xf32, #tpu.memory_space<vmem>>, vector<1x1x256xf32>
    %291 = vector.shape_cast %290 : vector<1x1x256xf32> to vector<1x256xf32>
    %292 = vector.broadcast %291 : vector<1x256xf32> to vector<16x256xf32>
    %293 = arith.addf %289, %292 : vector<16x256xf32>
    %cst_185 = arith.constant 5.000000e-01 : f32
    %294 = vector.broadcast %cst_185 : f32 to vector<16x256xf32>
    %295 = arith.mulf %294, %293 : vector<16x256xf32>
    %cst_186 = arith.constant 4.471500e-02 : f32
    %296 = vector.broadcast %cst_186 : f32 to vector<16x256xf32>
    %297 = arith.mulf %296, %293 : vector<16x256xf32>
    %298 = arith.mulf %297, %293 : vector<16x256xf32>
    %299 = arith.mulf %298, %293 : vector<16x256xf32>
    %300 = arith.addf %293, %299 : vector<16x256xf32>
    %cst_187 = arith.constant 0.797884583 : f32
    %301 = vector.broadcast %cst_187 : f32 to vector<16x256xf32>
    %302 = arith.mulf %301, %300 : vector<16x256xf32>
    %303 = math.tanh %302 : vector<16x256xf32>
    %cst_188 = arith.constant 1.000000e+00 : f32
    %304 = vector.broadcast %cst_188 : f32 to vector<16x256xf32>
    %305 = arith.addf %304, %303 : vector<16x256xf32>
    %306 = arith.mulf %295, %305 : vector<16x256xf32>
    %307 = arith.truncf %306 : vector<16x256xf32> to vector<16x256xbf16>
    %c1_189 = arith.constant 1 : index
    %c0_190 = arith.constant 0 : index
    %c0_191 = arith.constant 0 : index
    %308 = vector.load %arg12[%c1_189, %c0_190, %c0_191] : memref<2x256x128xbf16, #tpu.memory_space<vmem>>, vector<1x256x128xbf16>
    %309 = vector.shape_cast %308 : vector<1x256x128xbf16> to vector<256x128xbf16>
    %cst_192 = arith.constant dense<0.000000e+00> : vector<16x128xf32>
    %310 = tpu.matmul %307, %309, %cst_192 {dimension_numbers = #tpu.dot_dimension_numbers<[1], [0], [0], [1], [0, 0, 1, 1], [], []>} : vector<16x256xbf16>, vector<256x128xbf16>, vector<16x128xf32> -> vector<16x128xf32>
    %c1_193 = arith.constant 1 : index
    %c0_194 = arith.constant 0 : index
    %c0_195 = arith.constant 0 : index
    %311 = vector.load %arg13[%c1_193, %c0_194, %c0_195] : memref<2x1x128xf32, #tpu.memory_space<vmem>>, vector<1x1x128xf32>
    %312 = vector.shape_cast %311 : vector<1x1x128xf32> to vector<1x128xf32>
    %313 = vector.broadcast %312 : vector<1x128xf32> to vector<16x128xf32>
    %314 = arith.addf %310, %313 : vector<16x128xf32>
    %315 = arith.addf %314, %285 : vector<16x128xf32>
    %c1_196 = arith.constant 1 : index
    %c0_197 = arith.constant 0 : index
    %c0_198 = arith.constant 0 : index
    %316 = vector.load %arg14[%c1_196, %c0_197, %c0_198] : memref<2x1x128xf32, #tpu.memory_space<vmem>>, vector<1x1x128xf32>
    %317 = vector.shape_cast %316 : vector<1x1x128xf32> to vector<1x128xf32>
    %c1_199 = arith.constant 1 : index
    %c0_200 = arith.constant 0 : index
    %c0_201 = arith.constant 0 : index
    %318 = vector.load %arg15[%c1_199, %c0_200, %c0_201] : memref<2x1x128xf32, #tpu.memory_space<vmem>>, vector<1x1x128xf32>
    %319 = vector.shape_cast %318 : vector<1x1x128xf32> to vector<1x128xf32>
    %cst_202 = arith.constant dense<0.000000e+00> : vector<16xf32>
    %320 = vector.multi_reduction <add>, %315, %cst_202 [1] : vector<16x128xf32> to vector<16xf32>
    %321 = vector.shape_cast %320 : vector<16xf32> to vector<16x1xf32>
    %cst_203 = arith.constant 7.812500e-03 : f32
    %322 = vector.broadcast %cst_203 : f32 to vector<16x1xf32>
    %323 = arith.mulf %321, %322 : vector<16x1xf32>
    %324 = arith.mulf %315, %315 : vector<16x128xf32>
    %cst_204 = arith.constant dense<0.000000e+00> : vector<16xf32>
    %325 = vector.multi_reduction <add>, %324, %cst_204 [1] : vector<16x128xf32> to vector<16xf32>
    %326 = vector.shape_cast %325 : vector<16xf32> to vector<16x1xf32>
    %cst_205 = arith.constant 7.812500e-03 : f32
    %327 = vector.broadcast %cst_205 : f32 to vector<16x1xf32>
    %328 = arith.mulf %326, %327 : vector<16x1xf32>
    %329 = arith.mulf %323, %323 : vector<16x1xf32>
    %330 = arith.subf %328, %329 : vector<16x1xf32>
    %cst_206 = arith.constant 0.000000e+00 : f32
    %331 = vector.broadcast %cst_206 : f32 to vector<16x1xf32>
    %332 = arith.maximumf %330, %331 : vector<16x1xf32>
    %333 = vector.broadcast %323 : vector<16x1xf32> to vector<16x128xf32>
    %334 = arith.subf %315, %333 : vector<16x128xf32>
    %cst_207 = arith.constant 9.99999996E-13 : f32
    %335 = vector.broadcast %cst_207 : f32 to vector<16x1xf32>
    %336 = arith.addf %332, %335 : vector<16x1xf32>
    %337 = math.rsqrt %336 : vector<16x1xf32>
    %338 = vector.broadcast %337 : vector<16x1xf32> to vector<16x128xf32>
    %339 = arith.mulf %334, %338 : vector<16x128xf32>
    %340 = vector.broadcast %317 : vector<1x128xf32> to vector<16x128xf32>
    %341 = arith.mulf %339, %340 : vector<16x128xf32>
    %342 = vector.broadcast %319 : vector<1x128xf32> to vector<16x128xf32>
    %343 = arith.addf %341, %342 : vector<16x128xf32>
    %344 = arith.truncf %343 : vector<16x128xf32> to vector<16x128xbf16>
    %c0_208 = arith.constant 0 : index
    %c0_209 = arith.constant 0 : index
    %345 = vector.load %arg16[%c0_208, %c0_209] : memref<128x128xbf16, #tpu.memory_space<vmem>>, vector<128x128xbf16>
    %cst_210 = arith.constant dense<0.000000e+00> : vector<16x128xf32>
    %346 = tpu.matmul %344, %345, %cst_210 {dimension_numbers = #tpu.dot_dimension_numbers<[1], [0], [0], [1], [0, 0, 1, 1], [], []>} : vector<16x128xbf16>, vector<128x128xbf16>, vector<16x128xf32> -> vector<16x128xf32>
    %c0_211 = arith.constant 0 : index
    %c0_212 = arith.constant 0 : index
    %347 = vector.load %arg17[%c0_211, %c0_212] : memref<1x128xf32, #tpu.memory_space<vmem>>, vector<1x128xf32>
    %348 = vector.broadcast %347 : vector<1x128xf32> to vector<16x128xf32>
    %349 = arith.addf %346, %348 : vector<16x128xf32>
    %350 = math.tanh %349 : vector<16x128xf32>
    %351 = arith.truncf %350 : vector<16x128xf32> to vector<16x128xbf16>
    %c0_213 = arith.constant 0 : index
    %c0_214 = arith.constant 0 : index
    %352 = vector.load %arg18[%c0_213, %c0_214] : memref<128x128xbf16, #tpu.memory_space<vmem>>, vector<128x128xbf16>
    %cst_215 = arith.constant dense<0.000000e+00> : vector<16x128xf32>
    %353 = tpu.matmul %351, %352, %cst_215 {dimension_numbers = #tpu.dot_dimension_numbers<[1], [0], [0], [1], [0, 0, 1, 1], [], []>} : vector<16x128xbf16>, vector<128x128xbf16>, vector<16x128xf32> -> vector<16x128xf32>
    %c0_216 = arith.constant 0 : index
    %c0_217 = arith.constant 0 : index
    %354 = vector.load %arg19[%c0_216, %c0_217] : memref<1x128xf32, #tpu.memory_space<vmem>>, vector<1x128xf32>
    %355 = vector.broadcast %354 : vector<1x128xf32> to vector<16x128xf32>
    %356 = arith.addf %353, %355 : vector<16x128xf32>
    %cst_218 = arith.constant 0.000000e+00 : f32
    %357 = vector.broadcast %cst_218 : f32 to vector<16x128xf32>
    %358 = arith.maximumf %356, %357 : vector<16x128xf32>
    %c0_219 = arith.constant 0 : index
    %c0_220 = arith.constant 0 : index
    %359 = vector.load %arg20[%c0_219, %c0_220] : memref<16x128xf32, #tpu.memory_space<vmem>>, vector<16x128xf32>
    tpu.vector_store %arg20[%c0_219, %c0_220], %358 {strides = array<i32>} : memref<16x128xf32, #tpu.memory_space<vmem>>, vector<16x128xf32>,
    return
  }
}

</mosaic_0001>

<bundles_post_ra>
// kernel: bert_classifier_forward.1
= control target key start
LH: loop header
LB: loop body
LE: loop exit
PB: predicated region body
PF: predicated region fallthrough
CT: control target
= control target key end

     0   :  { %v3801_v6 = vmov 0.0   ;;  %v3802_v25 = vmov 0   ;;  %vm3803_vm0 = vmmov 0   ;;  %v157_v59 = vlaneseq  ;;  %s3805_s27 = smov 32   ;;  %s3806_s28 = smov 64   ;;  %s4873_s0 = inlined_call_operand.vmem [shape: f32[16,128], index: 0, kind: input, shape index: {}]   ;;  %s4874_s4 = inlined_call_operand.vmem [shape: bf16[2,128,384], index: 4, kind: input, shape index: {}]   ;;  %s4875_s2 = inlined_call_operand.vmem [shape: f32[1,128], index: 2, kind: input, shape index: {}]   ;;  %s4876_s3 = inlined_call_operand.vmem [shape: f32[1,128], index: 3, kind: input, shape index: {}]   ;;  %s4877_s5 = inlined_call_operand.vmem [shape: f32[2,1,384], index: 5, kind: input, shape index: {}]   ;;  %s4878_s1 = inlined_call_operand.vmem [shape: f32[64,64], index: 1, kind: input, shape index: {}]   ;;  %s4879_s6 = inlined_call_operand.vmem [shape: bf16[2,128,128], index: 6, kind: input, shape index: {}]   ;;  %s4880_s7 = inlined_call_operand.vmem [shape: f32[2,1,128], index: 7, kind: input, shape index: {}]   ;;  %s4881_s10 = inlined_call_operand.vmem [shape: bf16[2,128,256], index: 10, kind: input, shape index: {}]   ;;  %s4882_s8 = inlined_call_operand.vmem [shape: f32[2,1,128], index: 8, kind: input, shape index: {}]   ;;  %s4883_s9 = inlined_call_operand.vmem [shape: f32[2,1,128], index: 9, kind: input, shape index: {}]   ;;  %s4884_s12 = inlined_call_operand.vmem [shape: bf16[2,256,128], index: 12, kind: input, shape index: {}]   ;;  %s4885_s11 = inlined_call_operand.vmem [shape: f32[2,1,256], index: 11, kind: input, shape index: {}]   ;;  %s4886_s13 = inlined_call_operand.vmem [shape: f32[2,1,128], index: 13, kind: input, shape index: {}]   ;;  %s4887_s14 = inlined_call_operand.vmem [shape: f32[2,1,128], index: 14, kind: input, shape index: {}]   ;;  %s4888_s15 = inlined_call_operand.vmem [shape: f32[2,1,128], index: 15, kind: input, shape index: {}]   ;;  %s4889_s16 = inlined_call_operand.vmem [shape: bf16[128,128], index: 16, kind: input, shape index: {}]   ;;  %s4890_s18 = inlined_call_operand.vmem [shape: bf16[128,128], index: 18, kind: input, shape index: {}]   ;;  %s4891_s17 = inlined_call_operand.vmem [shape: f32[1,128], index: 17, kind: input, shape index: {}]   ;;  %s4892_s19 = inlined_call_operand.vmem [shape: f32[1,128], index: 19, kind: input, shape index: {}]   ;;  %s4893_s20 = inlined_call_operand.vmem [shape: f32[16,128], index: 20, kind: output, shape index: {}]  }
   0x1   :  { %4897 = sst [smem:[#allocation6_spill]] %s4873_s0  ;;  %3315 = vmatprep.subr.bf16.mxu1 %v3801_v6  ;;  %332 = vmatprep.mubr.bf16.mxu0 %v3802_v25  ;;  %vm384_vm1 = vcmask 261120   ;;  %vm598_vm2 = vcmask 523264   ;;  %vm790_vm3 = vcmask 523520   ;;  %vm801_vm4 = vcmask 785920  }
   0x2   :  { %4898 = sst [smem:[#allocation7_spill]] %s4874_s4  ;;  %s4902_s23 = sld [smem:[#allocation6_spill]]  ;;  %3331 = vmatprep.mubr.msk.bf16.mxu1 %vm3803_vm0, %v3801_v6  ;;  %v4025_v60 = vshrl.u32 %v157_v59, 7  ;;  %vm812_vm5 = vcmask 1048320  }
   0x3   :  { %4899 = sst [smem:[#allocation8_spill]] %s4875_s2  ;;  %s4903_s26 = sld [smem:[#allocation7_spill]] }
   0x4   :  { %4900 = sst [smem:[#allocation9_spill]] %s4876_s3  ;;  %s4904_s21 = sld [smem:[#allocation8_spill]]  ;;  %v4028_v61 = vsub.s32 0, %v4025_v60  ;;  %v167_v62 = vsub.s32 2, %v4025_v60 }
   0x5   :  { %4901 = sst [smem:[#allocation10_spill]] %s4877_s5  ;;  %s3804_s3 = smov 96  }
   0x6   :  { %s4906_s25 = sld [smem:[#allocation10_spill]] }
   0x8   :  { %v3915_v0 = vld [vmem:[%s4902_s23] sm:$0xff]  ;;  %v3920_v1 = vld [vmem:[%s4902_s23 + $0x8] sm:$0xff]  ;;  %s4905_s23 = sld [smem:[#allocation9_spill]] }
   0x9   :  { %78 = vadd.xlane.f32.xlu0 %v3915_v0  ;;  %v84_v2 = vmul.f32 %v3915_v0, %v3915_v0  ;;  %v85_v3 = vmul.f32 %v3920_v1, %v3920_v1  ;;  %v3513_v4 = vld [vmem:[%s4903_s26 + $0x4] ss:$12 sps:$4 sm:$0xff]   ;;  %v3515_v5 = vld [vmem:[%s4903_s26] ss:$12 sps:$4 sm:$0xff]   ;;  %v3516_v7 = vld [vmem:[%s4903_s26 + $0x8] ss:$12 sps:$4 sm:$0xff]  }
   0xa   :  { %300 = vmatprep.subr.bf16.mxu0 %v3513_v4  ;;  %3316 = vmatpush3.bf16.msra.mxu1 %v3516_v7  ;;  %v3517_v8 = vld [vmem:[%s4903_s26 + $0x1c] ss:$12 sps:$4 sm:$0xff]   ;;  %v3519_v9 = vld [vmem:[%s4903_s26 + $0x18] ss:$12 sps:$4 sm:$0xff]   ;;  %v3520_v10 = vld [vmem:[%s4903_s26 + $0x20] ss:$12 sps:$4 sm:$0xff]  }
   0xb   :  { %86 = vadd.xlane.f32.xlu1 %v84_v2  ;;  %301 = vmatpush1.bf16.msra.mxu0 %v3515_v5  ;;  %v3521_v11 = vld [vmem:[%s4903_s26 + $0x34] ss:$12 sps:$4 sm:$0xff]   ;;  %v3523_v12 = vld [vmem:[%s4903_s26 + $0x30] ss:$12 sps:$4 sm:$0xff]   ;;  %v3524_v13 = vld [vmem:[%s4903_s26 + $0x38] ss:$12 sps:$4 sm:$0xff]  }
   0xc   :  { %3317 = vmatprep.subr.bf16.mxu1 %v3801_v6  ;;  %302 = vmatprep.subr.bf16.mxu0 %v3517_v8  ;;  %v3525_v14 = vld [vmem:[%s4903_s26 + $0x4c] ss:$12 sps:$4 sm:$0xff]   ;;  %v3527_v15 = vld [vmem:[%s4903_s26 + $0x48] ss:$12 sps:$4 sm:$0xff]   ;;  %v3528_v16 = vld [vmem:[%s4903_s26 + $0x50] ss:$12 sps:$4 sm:$0xff]  }
   0xd   :  { %80 = vadd.xlane.f32.xlu0 %v3920_v1  ;;  %v3529_v17 = vld [vmem:[%s4903_s26 + $0x64] ss:$12 sps:$4 sm:$0xff]   ;;  %v3531_v18 = vld [vmem:[%s4903_s26 + $0x60] ss:$12 sps:$4 sm:$0xff]   ;;  %v3532_v19 = vld [vmem:[%s4903_s26 + $0x68] ss:$12 sps:$4 sm:$0xff]  }
   0xe   :  { %3318 = vmatpush3.bf16.msra.mxu1 %v3520_v10  ;;  %v3533_v20 = vld [vmem:[%s4903_s26 + $0x7c] ss:$12 sps:$4 sm:$0xff]   ;;  %v3535_v21 = vld [vmem:[%s4903_s26 + $0x78] ss:$12 sps:$4 sm:$0xff]   ;;  %v3536_v22 = vld [vmem:[%s4903_s26 + $0x80] ss:$12 sps:$4 sm:$0xff]  }
   0xf   :  { %88 = vadd.xlane.f32.xlu1 %v85_v3  ;;  %303 = vmatpush1.bf16.msra.mxu0 %v3519_v9  ;;  %v3537_v23 = vld [vmem:[%s4903_s26 + $0x94] ss:$12 sps:$4 sm:$0xff]   ;;  %v3539_v24 = vld [vmem:[%s4903_s26 + $0x90] ss:$12 sps:$4 sm:$0xff]   ;;  %v3540_v26 = vld [vmem:[%s4903_s26 + $0x98] ss:$12 sps:$4 sm:$0xff]  }
  0x10   :  { %3319 = vmatprep.subr.bf16.mxu1 %v3801_v6  ;;  %304 = vmatprep.subr.bf16.mxu0 %v3521_v11  ;;  %v3541_v27 = vld [vmem:[%s4903_s26 + $0xac] ss:$12 sps:$4 sm:$0xff]   ;;  %v3543_v28 = vld [vmem:[%s4903_s26 + $0xa8] ss:$12 sps:$4 sm:$0xff]   ;;  %v3544_v29 = vld [vmem:[%s4903_s26 + $0xb0] ss:$12 sps:$4 sm:$0xff]  }
  0x11   :  { %v2905_v49 = vld [vmem:[%s4904_s21] ss:$0 sm:$0xff] }
  0x12   :  { %3320 = vmatpush3.bf16.msra.mxu1 %v3524_v13  ;;  %v2906_v54 = vld [vmem:[%s4905_s23] ss:$0 sm:$0xff] }
  0x13   :  { %305 = vmatpush1.bf16.msra.mxu0 %v3523_v12  ;;  %3321 = vmatprep.subr.bf16.mxu1 %v3801_v6  ;;  %v155_v63 = vld [vmem:[%s4906_s25] sm:$0x7] }
  0x14   :  { %306 = vmatprep.subr.bf16.mxu0 %v3525_v14  ;;  %v168_v2 = vrot.slane %v155_v63, %v167_v62 }
  0x16   :  { %3322 = vmatpush3.bf16.msra.mxu1 %v3528_v16 }
  0x17   :  { %307 = vmatpush1.bf16.msra.mxu0 %v3527_v15  ;;  %3323 = vmatprep.subr.bf16.mxu1 %v3801_v6 }
  0x18   :  { %308 = vmatprep.subr.bf16.mxu0 %v3529_v17 }
  0x1a   :  { %3324 = vmatpush3.bf16.msra.mxu1 %v3532_v19 }
  0x1b   :  { %309 = vmatpush1.bf16.msra.mxu0 %v3531_v18  ;;  %3325 = vmatprep.subr.bf16.mxu1 %v3801_v6 }
  0x1c   :  { %310 = vmatprep.subr.bf16.mxu0 %v3533_v20 }
  0x1e   :  { %3326 = vmatpush3.bf16.msra.mxu1 %v3536_v22 }
  0x1f   :  { %311 = vmatpush1.bf16.msra.mxu0 %v3535_v21  ;;  %3327 = vmatprep.subr.bf16.mxu1 %v3801_v6 }
  0x20   :  { %312 = vmatprep.subr.bf16.mxu0 %v3537_v23 }
  0x22   :  { %3328 = vmatpush3.bf16.msra.mxu1 %v3540_v26 }
  0x23   :  { %313 = vmatpush1.bf16.msra.mxu0 %v3539_v24  ;;  %3329 = vmatprep.subr.bf16.mxu1 %v3801_v6 }
  0x24   :  { %314 = vmatprep.subr.bf16.mxu0 %v3541_v27 }
  0x26   :  { %3330 = vmatpush3.bf16.msra.mxu1 %v3544_v29 }
  0x27   :  { %315 = vmatpush1.bf16.msra.mxu0 %v3543_v28 }
  0x96   :  { %v79_v30 = vpop.xlane.xlu0 %78 }
  0x97   :  { %v82_v31 = vmul.f32 0.0078125, %v79_v30 }
  0x98   :  { %v87_v32 = vpop.xlane.xlu1 %86 }
  0x99   :  { %v92_v33 = vmul.f32 %v82_v31, %v82_v31  ;;  %v90_v34 = vmul.f32 0.0078125, %v87_v32  ;;  %v98_v46 = vsub.f32 %v3915_v0, %v82_v31  ;;  %v4035_v0 = vsub.s32 1, %v4025_v60 }
  0x9a   :  { %v81_v35 = vpop.xlane.xlu0 %80 }
  0x9b   :  { %v94_v36 = vsub.f32 %v90_v34, %v92_v33  ;;  %v83_v37 = vmul.f32 0.0078125, %v81_v35  ;;  %v164_v3 = vrot.slane %v155_v63, %v4035_v0 }
  0x9c   :  { %v89_v38 = vpop.xlane.xlu1 %88 }
  0x9d   :  { %v96_v39 = vmax.f32 %v94_v36, 0.0  ;;  %v93_v40 = vmul.f32 %v83_v37, %v83_v37  ;;  %v91_v41 = vmul.f32 0.0078125, %v89_v38  ;;  %v99_v50 = vsub.f32 %v3920_v1, %v83_v37 }
  0x9e   :  { %v160_v1 = vrot.slane %v155_v63, %v4028_v61 }
  0x9f   :  { %v100_v42 = vadd.f32 1e-12, %v96_v39  ;;  %v95_v43 = vsub.f32 %v91_v41, %v93_v40 }
  0xa1   :  { %3689 = vrsqrt.f32 %v100_v42  ;;  %v97_v44 = vmax.f32 %v95_v43, 0.0 }
  0xa3   :  { %v101_v45 = vadd.f32 1e-12, %v97_v44 }
  0xa5   :  { %3691 = vrsqrt.f32 %v101_v45 }
  0xab   :  { %v3690_v47 = vpop.eup %3689 }
  0xac   :  { %v104_v48 = vmul.f32 %v3690_v47, %v98_v46 }
  0xae   :  { %v112_v53 = vmul.f32 %v2905_v49, %v104_v48 }
  0xaf   :  { %v3692_v51 = vpop.eup %3691 }
  0xb0   :  { %v105_v52 = vmul.f32 %v3692_v51, %v99_v50  ;;  %v4019_v56 = vadd.f32 %v2906_v54, %v112_v53 }
  0xb2   :  { %v113_v55 = vmul.f32 %v2905_v49, %v105_v52 }
  0xb4   :  { %v4021_v57 = vadd.f32 %v2906_v54, %v113_v55 }
  0xb6   :  { %v122_v58 = vpack.c.bf16 %v4021_v57, %v4019_v56 }
  0xb8   :  { %333 = vmatmul.mubr.bf16.vlgmr.msra.gmra.mrb[0].mxu0 %v122_v58  ;;  %3332 = vmatmul.mubr.bf16.vlgmr.msra.gmra.mrb[0].mxu1 %v122_v58 }
 0x18b   :  { %v334_v4 = vpop.f32.mrb[0].mxu0  ;;  %v377_v5 = vpop.f32.mrb[0].mxu1 }
 0x18c   :  { %v335_v7 = vadd.f32 %v334_v4, %v160_v1  ;;  %v4041_v8 = vadd.f32 %v377_v5, %v168_v2  ;;  %v336_v9 = vpop.f32.mrb[1].mxu0  ;;  %v3333_v10 = vpop.f32.mrb[1].mxu1 }
 0x18d   :  { %v337_v11 = vadd.f32 %v336_v9, %v164_v3  ;;  %v338_v12 = vpop.f32.mrb[2].mxu0  ;;  %v380_v13 = vpop.f32.mrb[2].mxu1 }
 0x18e   :  { %385 = vst.msk [vmem:[#allocation2] sm:$0xff] %vm384_vm1, %v335_v7  ;;  %389 = vst.msk [vmem:[#allocation4] sm:$0xff] %vm384_vm1, %v4041_v8  ;;  %v339_v14 = vadd.f32 %v338_v12, %v160_v1  ;;  %v4046_v15 = vadd.f32 %v380_v13, %v168_v2  ;;  %v340_v16 = vpop.f32.mrb[3].mxu0  ;;  %v3334_v17 = vpop.f32.mrb[3].mxu1  ;;  %v66_v13 = vld [vmem:[%s4878_s1] sm:$0xff] }
 0x18f   :  { %387 = vst.msk [vmem:[#allocation3] sm:$0xff] %vm384_vm1, %v337_v11  ;;  %v341_v18 = vadd.f32 %v340_v16, %v164_v3  ;;  %403 = vrot.lane.b32.xlu0 %v337_v11, %s3804_s3  ;;  %v67_v17 = vld [vmem:[%s4878_s1 + $0x8] sm:$0xff] }
 0x190   :  { %386 = vst.msk [vmem:[#allocation2 + $0x8] sm:$0xff] %vm384_vm1, %v339_v14  ;;  %390 = vst.msk [vmem:[#allocation4 + $0x8] sm:$0xff] %vm384_vm1, %v4046_v15 }
 0x191   :  { %388 = vst.msk [vmem:[#allocation3 + $0x8] sm:$0xff] %vm384_vm1, %v341_v18  ;;  %405 = vrot.lane.b32.xlu1 %v341_v18, %s3804_s3 }
 0x193   :  { %453 = vrot.lane.b32.xlu0 %v337_v11, %s3805_s27 }
 0x195   :  { %429 = vrot.lane.b32.xlu1 %v337_v11, %s3806_s28  ;;  %v469_v19 = vld [vmem:[#allocation2] sm:$0xff] }
 0x196   :  { %v691_v21 = vld [vmem:[#allocation4] sm:$0xff] }
 0x197   :  { %393 = vrot.lane.b32.xlu0 %v335_v7, %s3804_s3  ;;  %v470_v20 = vld [vmem:[#allocation2 + $0x8] sm:$0xff]  ;;  %v481_v26 = vld [vmem:[#allocation3] sm:$0xff] }
 0x198   :  { %v692_v22 = vld [vmem:[#allocation4 + $0x8] sm:$0xff]  ;;  %v477_v23 = vpack.c.bf16 %v470_v20, %v469_v19 }
 0x199   :  { %v699_v24 = vpack.c.bf16 %v692_v22, %v691_v21  ;;  %v482_v27 = vld [vmem:[#allocation3 + $0x8] sm:$0xff]  ;;  %431 = vrot.lane.b32.xlu1 %v341_v18, %s3806_s28 }
 0x19a   :  { %v489_v28 = vpack.c.bf16 %v482_v27, %v481_v26  ;;  %3343 = vmatprep.mubr.msk.bf16.mxu0 %vm384_vm1, %v477_v23  ;;  %v69_v23 = vld [vmem:[%s4878_s1 + $0x18] sm:$0xff] }
 0x19b   :  { %3351 = vmatprep.subr.bf16.mxu1 %v699_v24  ;;  %421 = vrot.lane.b32.xlu0 %v335_v7, %s3806_s28 }
 0x19c   :  { %3499 = vmatprep.subr.msk.bf16.mxu0 %vm384_vm1, %v489_v28  ;;  %3352 = vmatpush3.bf16.msra.mxu1 %v699_v24  ;;  %v506_v29 = vsel %vm384_vm1, %v489_v28, 0 }
 0x19d   :  { %3336 = vmatpush3.bf16.xpose.msra.mxu0 %v506_v29  ;;  %455 = vrot.lane.b32.xlu1 %v341_v18, %s3805_s27 }
 0x19f   :  { %445 = vrot.lane.b32.xlu0 %v335_v7, %s3805_s27  ;;  %v68_v7 = vld [vmem:[%s4878_s1 + $0x10] sm:$0xff] }
 0x1a1   :  { %395 = vrot.lane.b32.xlu1 %v339_v14, %s3804_s3 }
 0x1a5   :  { %423 = vrot.lane.b32.xlu1 %v339_v14, %s3806_s28 }
 0x1a9   :  { %447 = vrot.lane.b32.xlu1 %v339_v14, %s3805_s27 }
 0x201   :  { %v404_v30 = vpop.permute.xlu0 %403 }
 0x202   :  { %409 = vst.msk [vmem:[#allocation3 + $0x10] sm:$0xff] %vm384_vm1, %v404_v30 }
 0x203   :  { %v406_v31 = vpop.permute.xlu1 %405 }
 0x204   :  { %410 = vst.msk [vmem:[#allocation3 + $0x18] sm:$0xff] %vm384_vm1, %v406_v31 }
 0x205   :  { %v454_v32 = vpop.permute.xlu0 %453 }
 0x206   :  { %459 = vst.msk [vmem:[#allocation3 + $0x30] sm:$0xff] %vm384_vm1, %v454_v32  ;;  %v73_v32 = vld [vmem:[%s4878_s1 + $0x38] sm:$0xff] }
 0x207   :  { %v430_v33 = vpop.permute.xlu1 %429 }
 0x208   :  { %435 = vst.msk [vmem:[#allocation3 + $0x20] sm:$0xff] %vm384_vm1, %v430_v33  ;;  %v72_v33 = vld [vmem:[%s4878_s1 + $0x30] sm:$0xff] }
 0x209   :  { %v394_v34 = vpop.permute.xlu0 %393  ;;  %v483_v36 = vld [vmem:[#allocation3 + $0x10] sm:$0xff] }
 0x20a   :  { %399 = vst.msk [vmem:[#allocation2 + $0x10] sm:$0xff] %vm384_vm1, %v394_v34 }
 0x20b   :  { %v432_v35 = vpop.permute.xlu1 %431  ;;  %v484_v37 = vld [vmem:[#allocation3 + $0x18] sm:$0xff] }
 0x20c   :  { %436 = vst.msk [vmem:[#allocation3 + $0x28] sm:$0xff] %vm384_vm1, %v432_v35  ;;  %v490_v38 = vpack.c.bf16 %v484_v37, %v483_v36  ;;  %v71_v37 = vld [vmem:[%s4878_s1 + $0x28] sm:$0xff] }
 0x20d   :  { %v422_v39 = vpop.permute.xlu0 %421  ;;  %v487_v49 = vld [vmem:[#allocation3 + $0x30] sm:$0xff] }
 0x20e   :  { %3500 = vmatprep.subr.msk.bf16.mxu0 %vm384_vm1, %v490_v38  ;;  %v509_v40 = vsel %vm384_vm1, %v490_v38, 0  ;;  %427 = vst.msk [vmem:[#allocation2 + $0x20] sm:$0xff] %vm384_vm1, %v422_v39 }
 0x20f   :  { %v456_v41 = vpop.permute.xlu1 %455  ;;  %3338 = vmatpush3.bf16.xpose.msra.mxu0 %v509_v40  ;;  %v485_v44 = vld [vmem:[#allocation3 + $0x20] sm:$0xff] }
 0x210   :  { %460 = vst.msk [vmem:[#allocation3 + $0x38] sm:$0xff] %vm384_vm1, %v456_v41 }
 0x211   :  { %v446_v42 = vpop.permute.xlu0 %445  ;;  %v471_v58 = vld [vmem:[#allocation2 + $0x10] sm:$0xff] }
 0x212   :  { %451 = vst.msk [vmem:[#allocation2 + $0x30] sm:$0xff] %vm384_vm1, %v446_v42  ;;  %v70_v42 = vld [vmem:[%s4878_s1 + $0x20] sm:$0xff] }
 0x213   :  { %v396_v43 = vpop.permute.xlu1 %395  ;;  %v486_v45 = vld [vmem:[#allocation3 + $0x28] sm:$0xff] }
 0x214   :  { %400 = vst.msk [vmem:[#allocation2 + $0x18] sm:$0xff] %vm384_vm1, %v396_v43  ;;  %v491_v46 = vpack.c.bf16 %v486_v45, %v485_v44 }
 0x215   :  { %v473_v63 = vld [vmem:[#allocation2 + $0x20] sm:$0xff] }
 0x216   :  { %3501 = vmatprep.subr.msk.bf16.mxu0 %vm384_vm1, %v491_v46  ;;  %v512_v47 = vsel %vm384_vm1, %v491_v46, 0 }
 0x217   :  { %v424_v48 = vpop.permute.xlu1 %423  ;;  %3340 = vmatpush3.bf16.xpose.msra.mxu0 %v512_v47  ;;  %v488_v50 = vld [vmem:[#allocation3 + $0x38] sm:$0xff] }
 0x218   :  { %428 = vst.msk [vmem:[#allocation2 + $0x28] sm:$0xff] %vm384_vm1, %v424_v48  ;;  %v492_v51 = vpack.c.bf16 %v488_v50, %v487_v49 }
 0x219   :  { %v475_v3 = vld [vmem:[#allocation2 + $0x30] sm:$0xff] }
 0x21a   :  { %3502 = vmatprep.subr.msk.bf16.mxu0 %vm384_vm1, %v492_v51  ;;  %v515_v53 = vsel %vm384_vm1, %v492_v51, 0 }
 0x21b   :  { %v448_v52 = vpop.permute.xlu1 %447  ;;  %v472_v54 = vld [vmem:[#allocation2 + $0x18] sm:$0xff] }
 0x21c   :  { %452 = vst.msk [vmem:[#allocation2 + $0x38] sm:$0xff] %vm384_vm1, %v448_v52  ;;  %v478_v59 = vpack.c.bf16 %v472_v54, %v471_v58 }
 0x21f   :  { %3342 = vmatpush3.bf16.xpose.msra.mxu0 %v515_v53  ;;  %v474_v55 = vld [vmem:[#allocation2 + $0x28] sm:$0xff] }
 0x220   :  { %v479_v1 = vpack.c.bf16 %v474_v55, %v473_v63 }
 0x223   :  { %v476_v2 = vld [vmem:[#allocation2 + $0x38] sm:$0xff] }
 0x224   :  { %v480_v4 = vpack.c.bf16 %v476_v2, %v475_v3 }
 0x226   :  { %3344 = vmatmul.mubr.msk.bf16.vlgmr.msra.gmra.mrb[4].mxu0 %vm384_vm1, %v478_v59 }
 0x227   :  { %3347 = vmatprep.mubr.msk.bf16.mxu0 %vm384_vm1, %v479_v1 }
 0x22e   :  { %3348 = vmatmul.mubr.msk.bf16.gmra.mrb[8].mxu0 %vm384_vm1, %v480_v4 }
 0x22f   :  { %1119 = vmatprep.mubr.bf16.mxu0 %v3802_v25 }
 0x2f9   :  { %v3345_v5 = vpop.f32.mrb[4].mxu0 }
 0x2fa   :  { %v584_v9 = vmul.f32 0.17677669, %v3345_v5  ;;  %v551_v10 = vpop.f32.mrb[5].mxu0 }
 0x2fb   :  { %v582_v11 = vmul.f32 0.17677669, %v551_v10  ;;  %v3346_v12 = vpop.f32.mrb[6].mxu0 }
 0x2fc   :  { %v554_v14 = vpop.f32.mrb[7].mxu0  ;;  %v592_v16 = vadd.f32 %v584_v9, %v68_v7  ;;  %v585_v19 = vmul.f32 0.17677669, %v3346_v12 }
 0x2fd   :  { %v583_v18 = vmul.f32 0.17677669, %v554_v14  ;;  %v590_v21 = vadd.f32 %v582_v11, %v66_v13 }
 0x2fe   :  { %v605_v20 = vsel %vm598_vm2, %v592_v16, -inf  ;;  %v593_v30 = vadd.f32 %v585_v19, %v69_v23 }
 0x2ff   :  { %606 = vmax.xlane.f32.xlu0 %v605_v20  ;;  %v591_v22 = vadd.f32 %v583_v18, %v67_v17  ;;  %v599_v29 = vsel %vm598_vm2, %v590_v21, -inf }
 0x300   :  { %v608_v39 = vsel %vm598_vm2, %v593_v30, -inf }
 0x301   :  { %v3349_v24 = vpop.f32.mrb[8].mxu0  ;;  %v602_v26 = vsel %vm598_vm2, %v591_v22, -inf }
 0x302   :  { %v588_v27 = vmul.f32 0.17677669, %v3349_v24  ;;  %603 = vmax.xlane.f32.xlu1 %v602_v26  ;;  %v567_v28 = vpop.f32.mrb[9].mxu0 }
 0x303   :  { %600 = vmax.xlane.f32.xlu0 %v599_v29  ;;  %v3350_v31 = vpop.f32.mrb[10].mxu0  ;;  %v586_v38 = vmul.f32 0.17677669, %v567_v28 }
 0x304   :  { %v589_v34 = vmul.f32 0.17677669, %v3350_v31  ;;  %v570_v35 = vpop.f32.mrb[11].mxu0  ;;  %v596_v41 = vadd.f32 %v588_v27, %v72_v33 }
 0x305   :  { %v587_v36 = vmul.f32 0.17677669, %v570_v35  ;;  %v594_v46 = vadd.f32 %v586_v38, %v70_v42 }
 0x306   :  { %v597_v40 = vadd.f32 %v589_v34, %v73_v32  ;;  %v617_v45 = vsel %vm598_vm2, %v596_v41, -inf }
 0x307   :  { %609 = vmax.xlane.f32.xlu0 %v608_v39  ;;  %v595_v44 = vadd.f32 %v587_v36, %v71_v37  ;;  %v611_v48 = vsel %vm598_vm2, %v594_v46, -inf }
 0x308   :  { %v620_v43 = vsel %vm598_vm2, %v597_v40, -inf }
 0x309   :  { %621 = vmax.xlane.f32.xlu1 %v620_v43  ;;  %v614_v47 = vsel %vm598_vm2, %v595_v44, -inf }
 0x30b   :  { %618 = vmax.xlane.f32.xlu0 %v617_v45 }
 0x30d   :  { %615 = vmax.xlane.f32.xlu1 %v614_v47 }
 0x30f   :  { %612 = vmax.xlane.f32.xlu0 %v611_v48 }
 0x31e   :  { %415 = vrot.lane.b32.xlu1 %v4046_v15, %s3804_s3 }
 0x325   :  { %413 = vrot.lane.b32.xlu0 %v4041_v8, %s3804_s3 }
 0x38c   :  { %v607_v49 = vpop.xlane.xlu0 %606 }
 0x38d   :  { %v625_v50 = vsub.f32 %v592_v16, %v607_v49 }
 0x38f   :  { %v635_v51 = vmul.f32 1.442695, %v625_v50  ;;  %v604_v52 = vpop.xlane.xlu1 %603 }
 0x390   :  { %v601_v53 = vpop.xlane.xlu0 %600  ;;  %v624_v55 = vsub.f32 %v591_v22, %v604_v52 }
 0x391   :  { %3693 = vpow2.f32 %v635_v51  ;;  %v623_v54 = vsub.f32 %v590_v21, %v601_v53 }
 0x392   :  { %v633_v2 = vmul.f32 1.442695, %v624_v55 }
 0x393   :  { %v631_v58 = vmul.f32 1.442695, %v623_v54 }
 0x394   :  { %v610_v59 = vpop.xlane.xlu0 %609 }
 0x395   :  { %3695 = vpow2.f32 %v631_v58  ;;  %v626_v63 = vsub.f32 %v593_v30, %v610_v59 }
 0x396   :  { %v622_v1 = vpop.xlane.xlu1 %621 }
 0x397   :  { %v637_v3 = vmul.f32 1.442695, %v626_v63  ;;  %v630_v10 = vsub.f32 %v597_v40, %v622_v1 }
 0x398   :  { %v619_v4 = vpop.xlane.xlu0 %618 }
 0x399   :  { %3697 = vpow2.f32 %v637_v3  ;;  %v629_v5 = vsub.f32 %v596_v41, %v619_v4  ;;  %v645_v20 = vmul.f32 1.442695, %v630_v10 }
 0x39a   :  { %v616_v7 = vpop.xlane.xlu1 %615  ;;  %3699 = vpow2.f32 %v633_v2 }
 0x39b   :  { %v4126_v9 = vpop.eup %3693  ;;  %v643_v11 = vmul.f32 1.442695, %v629_v5  ;;  %v628_v12 = vsub.f32 %v595_v44, %v616_v7 }
 0x39c   :  { %v613_v13 = vpop.xlane.xlu0 %612  ;;  %v653_v14 = vsel %vm598_vm2, %v4126_v9, 0.0 }
 0x39d   :  { %3701 = vpow2.f32 %v643_v11  ;;  %v641_v16 = vmul.f32 1.442695, %v628_v12  ;;  %v627_v17 = vsub.f32 %v594_v46, %v613_v13  ;;  %654 = vadd.xlane.f32.xlu0 %v653_v14 }
 0x39e   :  { %v416_v18 = vpop.permute.xlu1 %415 }
 0x39f   :  { %v3696_v19 = vpop.eup %3695  ;;  %3703 = vpow2.f32 %v641_v16  ;;  %v639_v21 = vmul.f32 1.442695, %v627_v17  ;;  %420 = vst.msk [vmem:[#allocation4 + $0x18] sm:$0xff] %vm384_vm1, %v416_v18 }
 0x3a0   :  { %v414_v22 = vpop.permute.xlu0 %413  ;;  %v647_v23 = vsel %vm598_vm2, %v3696_v19, 0.0 }
 0x3a1   :  { %3705 = vpow2.f32 %v639_v21  ;;  %419 = vst.msk [vmem:[#allocation4 + $0x10] sm:$0xff] %vm384_vm1, %v414_v22  ;;  %648 = vadd.xlane.f32.xlu0 %v647_v23  ;;  %v3546_v22 = vld [vmem:[%s4879_s6 + $0x8] sm:$0xff]   ;;  %v3547_v23 = vld [vmem:[%s4879_s6 + $0x10] sm:$0xff]  }
 0x3a2   :  { %3707 = vpow2.f32 %v645_v20 }
 0x3a3   :  { %v4133_v24 = vpop.eup %3697 }
 0x3a4   :  { %v656_v26 = vsel %vm598_vm2, %v4133_v24, 0.0  ;;  %v3700_v27 = vpop.eup %3699 }
 0x3a5   :  { %657 = vadd.xlane.f32.xlu1 %v656_v26  ;;  %v650_v30 = vsel %vm598_vm2, %v3700_v27, 0.0  ;;  %v3549_v26 = vld [vmem:[%s4879_s6 + $0x20] sm:$0xff]  }
 0x3a6   :  { %v694_v32 = vld [vmem:[#allocation4 + $0x18] sm:$0xff] }
 0x3a7   :  { %v4137_v28 = vpop.eup %3701 }
 0x3a8   :  { %v665_v29 = vsel %vm598_vm2, %v4137_v28, 0.0  ;;  %v693_v31 = vld [vmem:[#allocation4 + $0x10] sm:$0xff] }
 0x3a9   :  { %v3704_v33 = vpop.eup %3703  ;;  %666 = vadd.xlane.f32.xlu0 %v665_v29  ;;  %651 = vadd.xlane.f32.xlu1 %v650_v30  ;;  %v700_v34 = vpack.c.bf16 %v694_v32, %v693_v31  ;;  %v3550_v29 = vld [vmem:[%s4879_s6 + $0x28] sm:$0xff]   ;;  %v3551_v32 = vld [vmem:[%s4879_s6 + $0x30] sm:$0xff]  }
 0x3aa   :  { %v662_v37 = vsel %vm598_vm2, %v3704_v33, 0.0 }
 0x3ab   :  { %v3706_v35 = vpop.eup %3705  ;;  %3353 = vmatprep.subr.bf16.mxu1 %v700_v34 }
 0x3ac   :  { %3354 = vmatpush3.bf16.msra.mxu1 %v700_v34  ;;  %v659_v36 = vsel %vm598_vm2, %v3706_v35, 0.0  ;;  %v4144_v38 = vpop.eup %3707 }
 0x3ad   :  { %660 = vadd.xlane.f32.xlu1 %v659_v36  ;;  %663 = vadd.xlane.f32.xlu0 %v662_v37  ;;  %v668_v39 = vsel %vm598_vm2, %v4144_v38, 0.0 }
 0x3b1   :  { %669 = vadd.xlane.f32.xlu1 %v668_v39 }
 0x3c2   :  { %439 = vrot.lane.b32.xlu1 %v4046_v15, %s3806_s28 }
 0x3c3   :  { %437 = vrot.lane.b32.xlu0 %v4041_v8, %s3806_s28 }
 0x3c6   :  { %461 = vrot.lane.b32.xlu1 %v4041_v8, %s3805_s27 }
 0x3ca   :  { %463 = vrot.lane.b32.xlu1 %v4046_v15, %s3805_s27 }
 0x42a   :  { %v655_v40 = vpop.xlane.xlu0 %654 }
 0x42e   :  { %v649_v41 = vpop.xlane.xlu0 %648 }
 0x42f   :  { %3709 = vrcp.f32 %v649_v41 }
 0x432   :  { %v658_v42 = vpop.xlane.xlu1 %657 }
 0x436   :  { %v667_v43 = vpop.xlane.xlu0 %666  ;;  %v652_v44 = vpop.xlane.xlu1 %651 }
 0x437   :  { %3711 = vrcp.f32 %v652_v44 }
 0x438   :  { %3713 = vrcp.f32 %v658_v42 }
 0x439   :  { %v3710_v49 = vpop.eup %3709 }
 0x43a   :  { %v664_v45 = vpop.xlane.xlu0 %663  ;;  %v661_v46 = vpop.xlane.xlu1 %660  ;;  %v679_v8 = vmul.f32 %v3710_v49, %v3696_v19 }
 0x43b   :  { %3715 = vrcp.f32 %v664_v45 }
 0x43c   :  { %3717 = vrcp.f32 %v661_v46 }
 0x43d   :  { %3719 = vrcp.f32 %v655_v40 }
 0x43e   :  { %v438_v47 = vpop.permute.xlu0 %437  ;;  %v670_v48 = vpop.xlane.xlu1 %669 }
 0x43f   :  { %443 = vst.msk [vmem:[#allocation4 + $0x20] sm:$0xff] %vm384_vm1, %v438_v47  ;;  %3721 = vrcp.f32 %v670_v48  ;;  %v2939_v47 = vld [vmem:[%s4880_s7] ss:$0 sm:$0xff] }
 0x440   :  { %3723 = vrcp.f32 %v667_v43 }
 0x441   :  { %v3712_v50 = vpop.eup %3711 }
 0x442   :  { %v440_v51 = vpop.permute.xlu1 %439  ;;  %v680_v15 = vmul.f32 %v3712_v50, %v3700_v27  ;;  %v3714_v63 = vpop.eup %3713 }
 0x443   :  { %444 = vst.msk [vmem:[#allocation4 + $0x28] sm:$0xff] %vm384_vm1, %v440_v51  ;;  %v682_v7 = vmul.f32 %v3714_v63, %v4133_v24  ;;  %v3548_v24 = vld [vmem:[%s4879_s6 + $0x18] sm:$0xff]   ;;  %v3561_v63 = vld [vmem:[%s4881_s10 + $0x24] ss:$8 sps:$4 sm:$0xff]  }
 0x444   :  { %v687_v52 = vpack.c.bf16 %v680_v15, %v679_v8 }
 0x445   :  { %v3716_v1 = vpop.eup %3715 }
 0x446   :  { %v462_v53 = vpop.permute.xlu1 %461  ;;  %3359 = vmatprep.mubr.msk.bf16.mxu1 %vm598_vm2, %v687_v52  ;;  %v695_v55 = vld [vmem:[#allocation4 + $0x20] sm:$0xff]  ;;  %v3718_v2 = vpop.eup %3717  ;;  %v684_v12 = vmul.f32 %v3716_v1, %v3704_v33  ;;  %v3552_v33 = vld [vmem:[%s4879_s6 + $0x38] sm:$0xff]  }
 0x447   :  { %467 = vst.msk [vmem:[#allocation4 + $0x30] sm:$0xff] %vm384_vm1, %v462_v53  ;;  %v3720_v3 = vpop.eup %3719  ;;  %v683_v11 = vmul.f32 %v3718_v2, %v3706_v35  ;;  %v3559_v1 = vld [vmem:[%s4881_s10 + $0x20] ss:$8 sps:$4 sm:$0xff]   ;;  %v3564_v2 = vld [vmem:[%s4881_s10 + $0x34] ss:$8 sps:$4 sm:$0xff]  }
 0x448   :  { %v681_v13 = vmul.f32 %v3720_v3, %v4126_v9  ;;  %v3545_v9 = vld [vmem:[%s4879_s6] sm:$0xff]   ;;  %v3562_v3 = vld [vmem:[%s4881_s10 + $0x30] ss:$8 sps:$4 sm:$0xff]  }
 0x449   :  { %v3722_v16 = vpop.eup %3721  ;;  %v689_v17 = vpack.c.bf16 %v684_v12, %v683_v11  ;;  %v3573_v11 = vld [vmem:[%s4881_s10 + $0x64] ss:$8 sps:$4 sm:$0xff]   ;;  %v3571_v12 = vld [vmem:[%s4881_s10 + $0x60] ss:$8 sps:$4 sm:$0xff]  }
 0x44a   :  { %v464_v54 = vpop.permute.xlu1 %463  ;;  %v696_v58 = vld [vmem:[#allocation4 + $0x28] sm:$0xff]  ;;  %v688_v14 = vpack.c.bf16 %v682_v7, %v681_v13  ;;  %v3724_v18 = vpop.eup %3723  ;;  %v686_v19 = vmul.f32 %v3722_v16, %v4144_v38  ;;  %v3570_v7 = vld [vmem:[%s4881_s10 + $0x54] ss:$8 sps:$4 sm:$0xff]  }
 0x44b   :  { %468 = vst.msk [vmem:[#allocation4 + $0x38] sm:$0xff] %vm384_vm1, %v464_v54  ;;  %v701_v59 = vpack.c.bf16 %v696_v58, %v695_v55  ;;  %v685_v20 = vmul.f32 %v3724_v18, %v4137_v28  ;;  %v3558_v58 = vld [vmem:[%s4881_s10 + $0x14] ss:$8 sps:$4 sm:$0xff]  }
 0x44c   :  { %v3576_v13 = vld [vmem:[%s4881_s10 + $0x74] ss:$8 sps:$4 sm:$0xff]  }
 0x44d   :  { %3355 = vmatprep.subr.bf16.mxu1 %v701_v59  ;;  %v690_v21 = vpack.c.bf16 %v686_v19, %v685_v20 }
 0x44e   :  { %3356 = vmatpush3.bf16.msra.mxu1 %v701_v59  ;;  %v697_v4 = vld [vmem:[#allocation4 + $0x30] sm:$0xff] }
 0x44f   :  { %v3556_v59 = vld [vmem:[%s4881_s10 + $0x10] ss:$8 sps:$4 sm:$0xff]  }
 0x452   :  { %v698_v5 = vld [vmem:[#allocation4 + $0x38] sm:$0xff] }
 0x453   :  { %v702_v10 = vpack.c.bf16 %v698_v5, %v697_v4  ;;  %v3567_v4 = vld [vmem:[%s4881_s10 + $0x44] ss:$8 sps:$4 sm:$0xff]   ;;  %v3565_v5 = vld [vmem:[%s4881_s10 + $0x40] ss:$8 sps:$4 sm:$0xff]  }
 0x455   :  { %3357 = vmatprep.subr.bf16.mxu1 %v702_v10 }
 0x456   :  { %3358 = vmatpush3.bf16.msra.mxu1 %v702_v10  ;;  %v3568_v10 = vld [vmem:[%s4881_s10 + $0x50] ss:$8 sps:$4 sm:$0xff]  }
 0x457   :  { %3367 = vmatprep.subr.bf16.mxu1 %v3801_v6 }
 0x459   :  { %3360 = vmatmul.mubr.msk.bf16.vlgmr.msra.gmra.mrb[4].mxu1 %vm598_vm2, %v688_v14  ;;  %v3574_v14 = vld [vmem:[%s4881_s10 + $0x70] ss:$8 sps:$4 sm:$0xff]  }
 0x45a   :  { %3363 = vmatprep.mubr.msk.bf16.mxu1 %vm598_vm2, %v689_v17  ;;  %3368 = vmatpush3.bf16.msra.mxu1 %v3545_v9 }
 0x45b   :  { %3369 = vmatprep.subr.bf16.mxu1 %v3801_v6 }
 0x45e   :  { %3370 = vmatpush3.bf16.msra.mxu1 %v3546_v22 }
 0x45f   :  { %3371 = vmatprep.subr.bf16.mxu1 %v3801_v6 }
 0x461   :  { %3364 = vmatmul.mubr.msk.bf16.gmra.mrb[8].mxu1 %vm598_vm2, %v690_v21 }
 0x462   :  { %3383 = vmatprep.mubr.msk.bf16.mxu1 %vm3803_vm0, %v3801_v6  ;;  %3372 = vmatpush3.bf16.msra.mxu1 %v3547_v23 }
 0x463   :  { %3373 = vmatprep.subr.bf16.mxu1 %v3801_v6 }
 0x466   :  { %3374 = vmatpush3.bf16.msra.mxu1 %v3548_v24 }
 0x467   :  { %3375 = vmatprep.subr.bf16.mxu1 %v3801_v6 }
 0x46a   :  { %3376 = vmatpush3.bf16.msra.mxu1 %v3549_v26 }
 0x46b   :  { %3377 = vmatprep.subr.bf16.mxu1 %v3801_v6 }
 0x46e   :  { %3378 = vmatpush3.bf16.msra.mxu1 %v3550_v29 }
 0x46f   :  { %3379 = vmatprep.subr.bf16.mxu1 %v3801_v6 }
 0x472   :  { %3380 = vmatpush3.bf16.msra.mxu1 %v3551_v32 }
 0x473   :  { %3381 = vmatprep.subr.bf16.mxu1 %v3801_v6 }
 0x476   :  { %3382 = vmatpush3.bf16.msra.mxu1 %v3552_v33 }
 0x52c   :  { %v3361_v27 = vpop.f32.mrb[4].mxu1 }
 0x52d   :  { %784 = vrot.lane.b32.xlu0 %v3361_v27, %s3805_s27  ;;  %v749_v28 = vpop.f32.mrb[5].mxu1 }
 0x52e   :  { %780 = vst.msk [vmem:[#allocation5] sm:$0xff] %vm384_vm1, %v749_v28  ;;  %v3362_v30 = vpop.f32.mrb[6].mxu1 }
 0x52f   :  { %786 = vrot.lane.b32.xlu1 %v3362_v30, %s3805_s27  ;;  %v752_v31 = vpop.f32.mrb[7].mxu1 }
 0x530   :  { %781 = vst.msk [vmem:[#allocation5 + $0x8] sm:$0xff] %vm384_vm1, %v752_v31 }
 0x534   :  { %v3365_v34 = vpop.f32.mrb[8].mxu1 }
 0x535   :  { %v765_v35 = vpop.f32.mrb[9].mxu1 }
 0x536   :  { %795 = vrot.lane.b32.xlu0 %v765_v35, %s3806_s28  ;;  %v3366_v36 = vpop.f32.mrb[10].mxu1  ;;  %v2948_v35 = vld [vmem:[%s4882_s8] ss:$0 sm:$0xff] }
 0x537   :  { %v768_v37 = vpop.f32.mrb[11].mxu1 }
 0x538   :  { %797 = vrot.lane.b32.xlu1 %v768_v37, %s3806_s28 }
 0x53a   :  { %806 = vrot.lane.b32.xlu0 %v3365_v34, %s3804_s3 }
 0x53c   :  { %808 = vrot.lane.b32.xlu1 %v3366_v36, %s3804_s3 }
 0x59f   :  { %v785_v38 = vpop.permute.xlu0 %784 }
 0x5a0   :  { %791 = vst.msk [vmem:[#allocation5] sm:$0xff] %vm790_vm3, %v785_v38 }
 0x5a1   :  { %v787_v39 = vpop.permute.xlu1 %786 }
 0x5a2   :  { %792 = vst.msk [vmem:[#allocation5 + $0x8] sm:$0xff] %vm790_vm3, %v787_v39 }
 0x5a8   :  { %v796_v40 = vpop.permute.xlu0 %795 }
 0x5a9   :  { %802 = vst.msk [vmem:[#allocation5] sm:$0xff] %vm801_vm4, %v796_v40  ;;  %v2949_v40 = vld [vmem:[%s4883_s9] ss:$0 sm:$0xff] }
 0x5aa   :  { %v798_v41 = vpop.permute.xlu1 %797 }
 0x5ab   :  { %803 = vst.msk [vmem:[#allocation5 + $0x8] sm:$0xff] %vm801_vm4, %v798_v41 }
 0x5ac   :  { %v807_v42 = vpop.permute.xlu0 %806 }
 0x5ad   :  { %813 = vst.msk [vmem:[#allocation5] sm:$0xff] %vm812_vm5, %v807_v42 }
 0x5ae   :  { %v809_v43 = vpop.permute.xlu1 %808 }
 0x5af   :  { %814 = vst.msk [vmem:[#allocation5 + $0x8] sm:$0xff] %vm812_vm5, %v809_v43 }
 0x5b4   :  { %v815_v44 = vld [vmem:[#allocation5] sm:$0xff] }
 0x5b6   :  { %v816_v45 = vld [vmem:[#allocation5 + $0x8] sm:$0xff] }
 0x5b7   :  { %v817_v46 = vpack.c.bf16 %v816_v45, %v815_v44  ;;  %v3577_v45 = vld [vmem:[%s4884_s12 + $0x40] sm:$0xff]  }
 0x5b8   :  { %3219 = vmatprep.subr.bf16.mxu1 %v3577_v45 }
 0x5b9   :  { %3384 = vmatmul.mubr.bf16.vlgmr.msra.gmra.mrb[12].mxu1 %v817_v46  ;;  %v3578_v46 = vld [vmem:[%s4884_s12] sm:$0xff]  }
 0x5ba   :  { %3220 = vmatpush3.bf16.msra.mxu1 %v3578_v46 }
 0x68c   :  { %v923_v48 = vpop.f32.mrb[12].mxu1 }
 0x68d   :  { %v924_v49 = vadd.f32 %v2939_v47, %v923_v48  ;;  %v3385_v50 = vpop.f32.mrb[13].mxu1  ;;  %v3580_v48 = vld [vmem:[%s4884_s12 + $0x8] sm:$0xff]  }
 0x68e   :  { %v926_v51 = vpop.f32.mrb[14].mxu1  ;;  %v3582_v50 = vld [vmem:[%s4884_s12 + $0x10] sm:$0xff]  }
 0x68f   :  { %v4220_v8 = vadd.f32 %v924_v49, %v4019_v56  ;;  %v927_v15 = vadd.f32 %v2939_v47, %v926_v51  ;;  %v3386_v52 = vpop.f32.mrb[15].mxu1  ;;  %v3555_v56 = vld [vmem:[%s4881_s10 + $0x4] ss:$8 sps:$4 sm:$0xff]   ;;  %v3581_v49 = vld [vmem:[%s4884_s12 + $0x50] sm:$0xff]   ;;  %v3583_v51 = vld [vmem:[%s4884_s12 + $0x58] sm:$0xff]  }
 0x690   :  { %1087 = vmatprep.subr.bf16.mxu0 %v3555_v56  ;;  %v3579_v47 = vld [vmem:[%s4884_s12 + $0x48] sm:$0xff]   ;;  %v3586_v52 = vld [vmem:[%s4884_s12 + $0x20] sm:$0xff]   ;;  %v3590_v56 = vld [vmem:[%s4884_s12 + $0x30] sm:$0xff]  }
 0x691   :  { %v4223_v53 = vadd.f32 %v927_v15, %v4021_v57  ;;  %934 = vadd.xlane.f32.xlu0 %v4220_v8  ;;  %v940_v54 = vmul.f32 %v4220_v8, %v4220_v8  ;;  %v3553_v57 = vld [vmem:[%s4881_s10] ss:$8 sps:$4 sm:$0xff]   ;;  %3221 = vmatprep.subr.bf16.mxu1 %v3579_v47 }
 0x692   :  { %1088 = vmatpush1.bf16.msra.mxu0 %v3553_v57  ;;  %3222 = vmatpush3.bf16.msra.mxu1 %v3580_v48  ;;  %v3585_v15 = vld [vmem:[%s4884_s12 + $0x60] sm:$0xff]   ;;  %v3591_v57 = vld [vmem:[%s4884_s12 + $0x78] sm:$0xff]  }
 0x693   :  { %936 = vadd.xlane.f32.xlu1 %v4223_v53  ;;  %v941_v55 = vmul.f32 %v4223_v53, %v4223_v53  ;;  %1089 = vmatprep.subr.bf16.mxu0 %v3558_v58  ;;  %v3592_v58 = vld [vmem:[%s4884_s12 + $0x38] sm:$0xff]  }
 0x694   :  { %3223 = vmatprep.subr.bf16.mxu1 %v3581_v49 }
 0x695   :  { %942 = vadd.xlane.f32.xlu0 %v940_v54  ;;  %v3588_v54 = vld [vmem:[%s4884_s12 + $0x28] sm:$0xff]  }
 0x696   :  { %1090 = vmatpush1.bf16.msra.mxu0 %v3556_v59  ;;  %3224 = vmatpush3.bf16.msra.mxu1 %v3582_v50  ;;  %v995_v59 = vld [vmem:[%s4885_s11] sm:$0x3] }
 0x697   :  { %1091 = vmatprep.subr.bf16.mxu0 %v3561_v63  ;;  %3225 = vmatprep.subr.bf16.mxu1 %v3583_v51  ;;  %v1000_v63 = vrot.slane %v995_v59, %v4028_v61 }
 0x699   :  { %944 = vadd.xlane.f32.xlu0 %v941_v55  ;;  %v3589_v55 = vld [vmem:[%s4884_s12 + $0x70] sm:$0xff]  }
 0x69a   :  { %1092 = vmatpush1.bf16.msra.mxu0 %v3559_v1  ;;  %v1004_v1 = vrot.slane %v995_v59, %v4035_v0 }
 0x69b   :  { %1093 = vmatprep.subr.bf16.mxu0 %v3564_v2 }
 0x69e   :  { %1094 = vmatpush1.bf16.msra.mxu0 %v3562_v3 }
 0x69f   :  { %1095 = vmatprep.subr.bf16.mxu0 %v3567_v4 }
 0x6a2   :  { %1096 = vmatpush1.bf16.msra.mxu0 %v3565_v5 }
 0x6a3   :  { %1097 = vmatprep.subr.bf16.mxu0 %v3570_v7 }
 0x6a6   :  { %1098 = vmatpush1.bf16.msra.mxu0 %v3568_v10 }
 0x6a7   :  { %1099 = vmatprep.subr.bf16.mxu0 %v3573_v11 }
 0x6aa   :  { %1100 = vmatpush1.bf16.msra.mxu0 %v3571_v12 }
 0x6ab   :  { %1101 = vmatprep.subr.bf16.mxu0 %v3576_v13 }
 0x6ae   :  { %1102 = vmatpush1.bf16.msra.mxu0 %v3574_v14 }
 0x71e   :  { %v935_v16 = vpop.xlane.xlu0 %934 }
 0x71f   :  { %v938_v17 = vmul.f32 0.0078125, %v935_v16 }
 0x720   :  { %v937_v18 = vpop.xlane.xlu1 %936 }
 0x721   :  { %v948_v20 = vmul.f32 %v938_v17, %v938_v17  ;;  %v939_v21 = vmul.f32 0.0078125, %v937_v18  ;;  %v954_v32 = vsub.f32 %v4220_v8, %v938_v17  ;;  %v3584_v8 = vld [vmem:[%s4884_s12 + $0x18] sm:$0xff]  }
 0x722   :  { %v943_v19 = vpop.xlane.xlu0 %942  ;;  %3226 = vmatpush3.bf16.msra.mxu1 %v3584_v8 }
 0x723   :  { %v946_v9 = vmul.f32 0.0078125, %v943_v19  ;;  %v949_v24 = vmul.f32 %v939_v21, %v939_v21  ;;  %v955_v36 = vsub.f32 %v4223_v53, %v939_v21  ;;  %3227 = vmatprep.subr.bf16.mxu1 %v3585_v15  ;;  %v3587_v53 = vld [vmem:[%s4884_s12 + $0x68] sm:$0xff]  }
 0x725   :  { %v950_v22 = vsub.f32 %v946_v9, %v948_v20 }
 0x726   :  { %v945_v23 = vpop.xlane.xlu0 %944  ;;  %3228 = vmatpush3.bf16.msra.mxu1 %v3586_v52 }
 0x727   :  { %v952_v26 = vmax.f32 %v950_v22, 0.0  ;;  %v947_v27 = vmul.f32 0.0078125, %v945_v23  ;;  %3229 = vmatprep.subr.bf16.mxu1 %v3587_v53  ;;  %v2966_v53 = vld [vmem:[%s4886_s13] ss:$0 sm:$0xff] }
 0x729   :  { %v956_v28 = vadd.f32 1e-12, %v952_v26  ;;  %v951_v29 = vsub.f32 %v947_v27, %v949_v24 }
 0x72a   :  { %3230 = vmatpush3.bf16.msra.mxu1 %v3588_v54 }
 0x72b   :  { %3725 = vrsqrt.f32 %v956_v28  ;;  %v953_v30 = vmax.f32 %v951_v29, 0.0  ;;  %3231 = vmatprep.subr.bf16.mxu1 %v3589_v55 }
 0x72d   :  { %v957_v31 = vadd.f32 1e-12, %v953_v30 }
 0x72e   :  { %3232 = vmatpush3.bf16.msra.mxu1 %v3590_v56 }
 0x72f   :  { %3727 = vrsqrt.f32 %v957_v31  ;;  %3233 = vmatprep.subr.bf16.mxu1 %v3591_v57 }
 0x732   :  { %3234 = vmatpush3.bf16.msra.mxu1 %v3592_v58 }
 0x733   :  { %3387 = vmatprep.subr.bf16.mxu1 %v3801_v6 }
 0x735   :  { %v3726_v33 = vpop.eup %3725 }
 0x736   :  { %v960_v34 = vmul.f32 %v3726_v33, %v954_v32 }
 0x738   :  { %v968_v39 = vmul.f32 %v2948_v35, %v960_v34 }
 0x739   :  { %v3728_v37 = vpop.eup %3727 }
 0x73a   :  { %v961_v38 = vmul.f32 %v3728_v37, %v955_v36  ;;  %v4287_v42 = vadd.f32 %v2949_v40, %v968_v39 }
 0x73c   :  { %v969_v41 = vmul.f32 %v2948_v35, %v961_v38 }
 0x73e   :  { %v4289_v43 = vadd.f32 %v2949_v40, %v969_v41 }
 0x740   :  { %v978_v44 = vpack.c.bf16 %v4289_v43, %v4287_v42 }
 0x742   :  { %1120 = vmatmul.mubr.bf16.vlgmr.msra.gmra.mrb[12].mxu0 %v978_v44 }
 0x743   :  { %1604 = vmatprep.mubr.bf16.mxu0 %v3802_v25 }
 0x815   :  { %v1121_v2 = vpop.f32.mrb[12].mxu0 }
 0x816   :  { %v1122_v3 = vadd.f32 %v1121_v2, %v1000_v63  ;;  %v1123_v4 = vpop.f32.mrb[13].mxu0 }
 0x817   :  { %v1124_v5 = vadd.f32 %v1123_v4, %v1004_v1  ;;  %v1125_v7 = vpop.f32.mrb[14].mxu0 }
 0x818   :  { %v1134_v10 = vmul.f32 0.044715, %v1122_v3  ;;  %v1126_v11 = vadd.f32 %v1125_v7, %v1000_v63  ;;  %v1127_v12 = vpop.f32.mrb[15].mxu0  ;;  %v1130_v40 = vmul.f32 0.5, %v1122_v3  ;;  %v3599_v7 = vld [vmem:[%s4903_s26 + $0xdc] ss:$12 sps:$4 sm:$0xff]  }
 0x819   :  { %v1135_v13 = vmul.f32 0.044715, %v1124_v5  ;;  %v1128_v14 = vadd.f32 %v1127_v12, %v1004_v1  ;;  %v1131_v45 = vmul.f32 0.5, %v1124_v5  ;;  %v3603_v12 = vld [vmem:[%s4903_s26 + $0xf4] ss:$12 sps:$4 sm:$0xff]  }
 0x81a   :  { %v1138_v16 = vmul.f32 %v1134_v10, %v1122_v3  ;;  %v1136_v17 = vmul.f32 0.044715, %v1126_v11  ;;  %v1132_v41 = vmul.f32 0.5, %v1126_v11  ;;  %v3597_v10 = vld [vmem:[%s4903_s26 + $0xd8] ss:$12 sps:$4 sm:$0xff]  }
 0x81b   :  { %v1139_v18 = vmul.f32 %v1135_v13, %v1124_v5  ;;  %v1137_v19 = vmul.f32 0.044715, %v1128_v14  ;;  %v1133_v46 = vmul.f32 0.5, %v1128_v14  ;;  %v3601_v13 = vld [vmem:[%s4903_s26 + $0xf0] ss:$12 sps:$4 sm:$0xff]  }
 0x81c   :  { %v1142_v20 = vmul.f32 %v1138_v16, %v1122_v3  ;;  %v1140_v21 = vmul.f32 %v1136_v17, %v1126_v11  ;;  %v3607_v16 = vld [vmem:[%s4903_s26 + $0x10c] ss:$12 sps:$4 sm:$0xff]   ;;  %v3605_v17 = vld [vmem:[%s4903_s26 + $0x108] ss:$12 sps:$4 sm:$0xff]  }
 0x81d   :  { %v1143_v9 = vmul.f32 %v1139_v18, %v1124_v5  ;;  %v1141_v22 = vmul.f32 %v1137_v19, %v1128_v14  ;;  %v3608_v18 = vld [vmem:[%s4903_s26 + $0x110] ss:$12 sps:$4 sm:$0xff]  }
 0x81e   :  { %v1146_v23 = vadd.f32 %v1142_v20, %v1122_v3  ;;  %v1144_v24 = vmul.f32 %v1140_v21, %v1126_v11  ;;  %v3611_v19 = vld [vmem:[%s4903_s26 + $0x124] ss:$12 sps:$4 sm:$0xff]   ;;  %v3609_v20 = vld [vmem:[%s4903_s26 + $0x120] ss:$12 sps:$4 sm:$0xff]   ;;  %v3612_v21 = vld [vmem:[%s4903_s26 + $0x128] ss:$12 sps:$4 sm:$0xff]  }
 0x81f   :  { %v1145_v26 = vmul.f32 %v1141_v22, %v1128_v14  ;;  %v1147_v27 = vadd.f32 %v1143_v9, %v1124_v5  ;;  %v3593_v5 = vld [vmem:[%s4903_s26 + $0xc0] ss:$12 sps:$4 sm:$0xff]   ;;  %v3615_v9 = vld [vmem:[%s4903_s26 + $0x13c] ss:$12 sps:$4 sm:$0xff]   ;;  %v3613_v22 = vld [vmem:[%s4903_s26 + $0x138] ss:$12 sps:$4 sm:$0xff]  }
 0x820   :  { %v1150_v28 = vmul.f32 0.7978846, %v1146_v23  ;;  %v1148_v29 = vadd.f32 %v1144_v24, %v1126_v11  ;;  %v3600_v11 = vld [vmem:[%s4903_s26 + $0xe0] ss:$12 sps:$4 sm:$0xff]  }
 0x821   :  { %v1149_v30 = vadd.f32 %v1145_v26, %v1128_v14  ;;  %v1151_v31 = vmul.f32 0.7978846, %v1147_v27  ;;  %v3604_v14 = vld [vmem:[%s4903_s26 + $0xf8] ss:$12 sps:$4 sm:$0xff]   ;;  %v3616_v23 = vld [vmem:[%s4903_s26 + $0x140] ss:$12 sps:$4 sm:$0xff]  }
 0x822   :  { %3729 = vtanh.f32 %v1150_v28  ;;  %v1152_v32 = vmul.f32 0.7978846, %v1148_v29  ;;  %v3619_v24 = vld [vmem:[%s4903_s26 + $0x154] ss:$12 sps:$4 sm:$0xff]   ;;  %v3617_v26 = vld [vmem:[%s4903_s26 + $0x150] ss:$12 sps:$4 sm:$0xff]  }
 0x823   :  { %v1153_v33 = vmul.f32 0.7978846, %v1149_v30  ;;  %3731 = vtanh.f32 %v1151_v31  ;;  %v3620_v27 = vld [vmem:[%s4903_s26 + $0x158] ss:$12 sps:$4 sm:$0xff]   ;;  %v3621_v29 = vld [vmem:[%s4903_s26 + $0x168] ss:$12 sps:$4 sm:$0xff]  }
 0x824   :  { %3733 = vtanh.f32 %v1152_v32  ;;  %v3623_v28 = vld [vmem:[%s4903_s26 + $0x16c] ss:$12 sps:$4 sm:$0xff]   ;;  %v3624_v30 = vld [vmem:[%s4903_s26 + $0x170] ss:$12 sps:$4 sm:$0xff]  }
 0x825   :  { %3735 = vtanh.f32 %v1153_v33 }
 0x82c   :  { %v3730_v34 = vpop.eup %3729 }
 0x82d   :  { %v3732_v35 = vpop.eup %3731  ;;  %v1158_v36 = vadd.f32 1.0, %v3730_v34 }
 0x82e   :  { %v3734_v37 = vpop.eup %3733  ;;  %v1159_v38 = vadd.f32 1.0, %v3732_v35 }
 0x82f   :  { %v3736_v39 = vpop.eup %3735  ;;  %v1160_v44 = vadd.f32 1.0, %v3734_v37  ;;  %v1162_v48 = vmul.f32 %v1158_v36, %v1130_v40 }
 0x830   :  { %v1161_v47 = vadd.f32 1.0, %v3736_v39  ;;  %v1163_v50 = vmul.f32 %v1159_v38, %v1131_v45 }
 0x831   :  { %v1164_v49 = vmul.f32 %v1160_v44, %v1132_v41 }
 0x832   :  { %v1165_v51 = vmul.f32 %v1161_v47, %v1133_v46 }
 0x833   :  { %v1166_v8 = vpack.c.bf16 %v1164_v49, %v1162_v48 }
 0x834   :  { %v1167_v15 = vpack.c.bf16 %v1165_v51, %v1163_v50  ;;  %v2983_v51 = vld [vmem:[%s4887_s14] ss:$0 sm:$0xff] }
 0x836   :  { %1335 = vmatprep.mubr.bf16.mxu1 %v1167_v15 }
 0x837   :  { %1336 = vmatmul.mubr.bf16.vlgmr.msra.gmra.mrb[16].mxu1 %v1166_v8 }
 0x838   :  { %3403 = vmatprep.mubr.msk.bf16.mxu1 %vm3803_vm0, %v3801_v6 }
 0x90a   :  { %v3235_v52 = vpop.f32.mrb[16].mxu1 }
 0x90b   :  { %v3236_v54 = vpop.f32.mrb[17].mxu1 }
 0x90c   :  { %v3237_v55 = vadd.f32 %v3236_v54, %v3235_v52  ;;  %v3238_v56 = vpop.f32.mrb[18].mxu1 }
 0x90d   :  { %v3239_v57 = vpop.f32.mrb[19].mxu1 }
 0x90e   :  { %v1338_v58 = vadd.f32 %v3237_v55, %v2966_v53  ;;  %v3240_v59 = vadd.f32 %v3239_v57, %v3238_v56  ;;  %v2984_v55 = vld [vmem:[%s4888_s15] ss:$0 sm:$0xff] }
 0x910   :  { %v1341_v63 = vadd.f32 %v3240_v59, %v2966_v53  ;;  %v4354_v1 = vadd.f32 %v1338_v58, %v4287_v42  ;;  %v3595_v42 = vld [vmem:[%s4903_s26 + $0xc4] ss:$12 sps:$4 sm:$0xff]  }
 0x911   :  { %1572 = vmatprep.subr.bf16.mxu0 %v3595_v42 }
 0x912   :  { %1348 = vadd.xlane.f32.xlu0 %v4354_v1  ;;  %v4358_v2 = vadd.f32 %v1341_v63, %v4289_v43  ;;  %v1354_v3 = vmul.f32 %v4354_v1, %v4354_v1  ;;  %v3596_v43 = vld [vmem:[%s4903_s26 + $0xc8] ss:$12 sps:$4 sm:$0xff]   ;;  %1573 = vmatpush1.bf16.msra.mxu0 %v3593_v5  ;;  %v3017_v63 = vld [vmem:[%s4906_s25 + $0x3] sm:$0x7] }
 0x913   :  { %3388 = vmatpush3.bf16.msra.mxu1 %v3596_v43  ;;  %1574 = vmatprep.subr.bf16.mxu0 %v3599_v7 }
 0x914   :  { %1350 = vadd.xlane.f32.xlu1 %v4358_v2  ;;  %v1355_v4 = vmul.f32 %v4358_v2, %v4358_v2  ;;  %3389 = vmatprep.subr.bf16.mxu1 %v3801_v6 }
 0x916   :  { %1356 = vadd.xlane.f32.xlu0 %v1354_v3  ;;  %1575 = vmatpush1.bf16.msra.mxu0 %v3597_v10  ;;  %v1436_v3 = vrot.slane %v3017_v63, %v4035_v0 }
 0x917   :  { %3390 = vmatpush3.bf16.msra.mxu1 %v3600_v11  ;;  %1576 = vmatprep.subr.bf16.mxu0 %v3603_v12 }
 0x918   :  { %1358 = vadd.xlane.f32.xlu1 %v1355_v4  ;;  %3391 = vmatprep.subr.bf16.mxu1 %v3801_v6 }
 0x91a   :  { %1577 = vmatpush1.bf16.msra.mxu0 %v3601_v13 }
 0x91b   :  { %3392 = vmatpush3.bf16.msra.mxu1 %v3604_v14  ;;  %1578 = vmatprep.subr.bf16.mxu0 %v3607_v16 }
 0x91c   :  { %3393 = vmatprep.subr.bf16.mxu1 %v3801_v6 }
 0x91e   :  { %1579 = vmatpush1.bf16.msra.mxu0 %v3605_v17 }
 0x91f   :  { %3394 = vmatpush3.bf16.msra.mxu1 %v3608_v18  ;;  %1580 = vmatprep.subr.bf16.mxu0 %v3611_v19 }
 0x920   :  { %3395 = vmatprep.subr.bf16.mxu1 %v3801_v6 }
 0x922   :  { %1581 = vmatpush1.bf16.msra.mxu0 %v3609_v20 }
 0x923   :  { %3396 = vmatpush3.bf16.msra.mxu1 %v3612_v21  ;;  %1582 = vmatprep.subr.bf16.mxu0 %v3615_v9 }
 0x924   :  { %3397 = vmatprep.subr.bf16.mxu1 %v3801_v6 }
 0x926   :  { %1583 = vmatpush1.bf16.msra.mxu0 %v3613_v22 }
 0x927   :  { %3398 = vmatpush3.bf16.msra.mxu1 %v3616_v23  ;;  %1584 = vmatprep.subr.bf16.mxu0 %v3619_v24 }
 0x928   :  { %3399 = vmatprep.subr.bf16.mxu1 %v3801_v6 }
 0x92a   :  { %1585 = vmatpush1.bf16.msra.mxu0 %v3617_v26 }
 0x92b   :  { %3400 = vmatpush3.bf16.msra.mxu1 %v3620_v27  ;;  %1586 = vmatprep.subr.bf16.mxu0 %v3623_v28 }
 0x92c   :  { %3401 = vmatprep.subr.bf16.mxu1 %v3801_v6 }
 0x92e   :  { %1587 = vmatpush1.bf16.msra.mxu0 %v3621_v29 }
 0x92f   :  { %3402 = vmatpush3.bf16.msra.mxu1 %v3624_v30 }
 0x99f   :  { %v1349_v31 = vpop.xlane.xlu0 %1348 }
 0x9a0   :  { %v1352_v32 = vmul.f32 0.0078125, %v1349_v31 }
 0x9a1   :  { %v1351_v33 = vpop.xlane.xlu1 %1350 }
 0x9a2   :  { %v1353_v34 = vmul.f32 0.0078125, %v1351_v33  ;;  %v1362_v36 = vmul.f32 %v1352_v32, %v1352_v32  ;;  %v1368_v49 = vsub.f32 %v4354_v1, %v1352_v32  ;;  %v1432_v1 = vrot.slane %v3017_v63, %v4028_v61 }
 0x9a3   :  { %v1357_v35 = vpop.xlane.xlu0 %1356 }
 0x9a4   :  { %v1360_v37 = vmul.f32 0.0078125, %v1357_v35  ;;  %v1363_v39 = vmul.f32 %v1353_v34, %v1353_v34  ;;  %v1369_v8 = vsub.f32 %v4358_v2, %v1353_v34  ;;  %v1440_v2 = vrot.slane %v3017_v63, %v167_v62 }
 0x9a5   :  { %v1359_v38 = vpop.xlane.xlu1 %1358 }
 0x9a6   :  { %v1364_v40 = vsub.f32 %v1360_v37, %v1362_v36  ;;  %v1361_v41 = vmul.f32 0.0078125, %v1359_v38 }
 0x9a8   :  { %v1366_v44 = vmax.f32 %v1364_v40, 0.0  ;;  %v1365_v45 = vsub.f32 %v1361_v41, %v1363_v39 }
 0x9aa   :  { %v1370_v46 = vadd.f32 1e-12, %v1366_v44  ;;  %v1367_v47 = vmax.f32 %v1365_v45, 0.0 }
 0x9ac   :  { %3737 = vrsqrt.f32 %v1370_v46  ;;  %v1371_v48 = vadd.f32 1e-12, %v1367_v47 }
 0x9ae   :  { %3739 = vrsqrt.f32 %v1371_v48 }
 0x9b6   :  { %v3738_v50 = vpop.eup %3737 }
 0x9b7   :  { %v1374_v15 = vmul.f32 %v3738_v50, %v1368_v49 }
 0x9b8   :  { %v3740_v52 = vpop.eup %3739 }
 0x9b9   :  { %v1375_v53 = vmul.f32 %v3740_v52, %v1369_v8  ;;  %v1382_v54 = vmul.f32 %v2983_v51, %v1374_v15 }
 0x9bb   :  { %v1383_v56 = vmul.f32 %v2983_v51, %v1375_v53  ;;  %v4452_v57 = vadd.f32 %v2984_v55, %v1382_v54 }
 0x9bd   :  { %v4454_v58 = vadd.f32 %v2984_v55, %v1383_v56 }
 0x9bf   :  { %v1392_v59 = vpack.c.bf16 %v4454_v58, %v4452_v57 }
 0x9c1   :  { %1605 = vmatmul.mubr.bf16.vlgmr.msra.gmra.mrb[16].mxu0 %v1392_v59  ;;  %3404 = vmatmul.mubr.bf16.vlgmr.msra.gmra.mrb[20].mxu1 %v1392_v59 }
 0xa94   :  { %v1606_v4 = vpop.f32.mrb[16].mxu0  ;;  %v1649_v42 = vpop.f32.mrb[20].mxu1 }
 0xa95   :  { %v1607_v5 = vadd.f32 %v1606_v4, %v1432_v1  ;;  %v4465_v43 = vadd.f32 %v1649_v42, %v1440_v2  ;;  %v1608_v7 = vpop.f32.mrb[17].mxu0  ;;  %v3405_v10 = vpop.f32.mrb[21].mxu1 }
 0xa96   :  { %v1609_v11 = vadd.f32 %v1608_v7, %v1436_v3  ;;  %v1610_v12 = vpop.f32.mrb[18].mxu0  ;;  %v1652_v13 = vpop.f32.mrb[22].mxu1 }
 0xa97   :  { %1656 = vst.msk [vmem:[#allocation2] sm:$0xff] %vm384_vm1, %v1607_v5  ;;  %1660 = vst.msk [vmem:[#allocation4] sm:$0xff] %vm384_vm1, %v4465_v43  ;;  %v1611_v14 = vadd.f32 %v1610_v12, %v1432_v1  ;;  %v4470_v60 = vadd.f32 %v1652_v13, %v1440_v2  ;;  %v1612_v62 = vpop.f32.mrb[19].mxu0  ;;  %v3406_v16 = vpop.f32.mrb[23].mxu1 }
 0xa98   :  { %1658 = vst.msk [vmem:[#allocation3] sm:$0xff] %vm384_vm1, %v1609_v11  ;;  %v1613_v17 = vadd.f32 %v1612_v62, %v1436_v3  ;;  %1674 = vrot.lane.b32.xlu0 %v1609_v11, %s3804_s3  ;;  %v3794_v16 = vld [vmem:[%s4878_s1] sm:$0xff] }
 0xa99   :  { %1657 = vst.msk [vmem:[#allocation2 + $0x8] sm:$0xff] %vm384_vm1, %v1611_v14  ;;  %1661 = vst.msk [vmem:[#allocation4 + $0x8] sm:$0xff] %vm384_vm1, %v4470_v60 }
 0xa9a   :  { %1659 = vst.msk [vmem:[#allocation3 + $0x8] sm:$0xff] %vm384_vm1, %v1613_v17  ;;  %1676 = vrot.lane.b32.xlu1 %v1613_v17, %s3804_s3 }
 0xa9c   :  { %1724 = vrot.lane.b32.xlu0 %v1609_v11, %s3805_s27 }
 0xa9e   :  { %1700 = vrot.lane.b32.xlu1 %v1609_v11, %s3806_s28  ;;  %v1740_v18 = vld [vmem:[#allocation2] sm:$0xff]  ;;  %v3793_v11 = vld [vmem:[%s4878_s1 + $0x10] sm:$0xff] }
 0xa9f   :  { %v1961_v20 = vld [vmem:[#allocation4] sm:$0xff] }
 0xaa0   :  { %1664 = vrot.lane.b32.xlu0 %v1607_v5, %s3804_s3  ;;  %v1741_v19 = vld [vmem:[#allocation2 + $0x8] sm:$0xff]  ;;  %v1752_v23 = vld [vmem:[#allocation3] sm:$0xff] }
 0xaa1   :  { %v1962_v21 = vld [vmem:[#allocation4 + $0x8] sm:$0xff]  ;;  %v1748_v9 = vpack.c.bf16 %v1741_v19, %v1740_v18 }
 0xaa2   :  { %v1969_v22 = vpack.c.bf16 %v1962_v21, %v1961_v20  ;;  %v1753_v24 = vld [vmem:[#allocation3 + $0x8] sm:$0xff]  ;;  %1702 = vrot.lane.b32.xlu1 %v1613_v17, %s3806_s28 }
 0xaa3   :  { %v1760_v26 = vpack.c.bf16 %v1753_v24, %v1752_v23  ;;  %3415 = vmatprep.mubr.msk.bf16.mxu0 %vm384_vm1, %v1748_v9  ;;  %v3795_v18 = vld [vmem:[%s4878_s1 + $0x8] sm:$0xff]  ;;  %v3796_v24 = vld [vmem:[%s4878_s1 + $0x18] sm:$0xff] }
 0xaa4   :  { %3423 = vmatprep.subr.bf16.mxu1 %v1969_v22  ;;  %1692 = vrot.lane.b32.xlu0 %v1607_v5, %s3806_s28 }
 0xaa5   :  { %3503 = vmatprep.subr.msk.bf16.mxu0 %vm384_vm1, %v1760_v26  ;;  %3424 = vmatpush3.bf16.msra.mxu1 %v1969_v22  ;;  %v1777_v27 = vsel %vm384_vm1, %v1760_v26, 0 }
 0xaa6   :  { %3408 = vmatpush3.bf16.xpose.msra.mxu0 %v1777_v27  ;;  %1726 = vrot.lane.b32.xlu1 %v1613_v17, %s3805_s27 }
 0xaa8   :  { %1716 = vrot.lane.b32.xlu0 %v1607_v5, %s3805_s27 }
 0xaaa   :  { %1666 = vrot.lane.b32.xlu1 %v1611_v14, %s3804_s3 }
 0xaae   :  { %1694 = vrot.lane.b32.xlu1 %v1611_v14, %s3806_s28 }
 0xab2   :  { %1718 = vrot.lane.b32.xlu1 %v1611_v14, %s3805_s27 }
 0xb0a   :  { %v1675_v28 = vpop.permute.xlu0 %1674 }
 0xb0b   :  { %1680 = vst.msk [vmem:[#allocation3 + $0x10] sm:$0xff] %vm384_vm1, %v1675_v28 }
 0xb0c   :  { %v1677_v29 = vpop.permute.xlu1 %1676 }
 0xb0d   :  { %1681 = vst.msk [vmem:[#allocation3 + $0x18] sm:$0xff] %vm384_vm1, %v1677_v29 }
 0xb0e   :  { %v1725_v30 = vpop.permute.xlu0 %1724 }
 0xb0f   :  { %1730 = vst.msk [vmem:[#allocation3 + $0x30] sm:$0xff] %vm384_vm1, %v1725_v30 }
 0xb10   :  { %v1701_v31 = vpop.permute.xlu1 %1700 }
 0xb11   :  { %1706 = vst.msk [vmem:[#allocation3 + $0x20] sm:$0xff] %vm384_vm1, %v1701_v31 }
 0xb12   :  { %v1665_v32 = vpop.permute.xlu0 %1664  ;;  %v1754_v34 = vld [vmem:[#allocation3 + $0x10] sm:$0xff] }
 0xb13   :  { %1670 = vst.msk [vmem:[#allocation2 + $0x10] sm:$0xff] %vm384_vm1, %v1665_v32 }
 0xb14   :  { %v1703_v33 = vpop.permute.xlu1 %1702  ;;  %v1755_v35 = vld [vmem:[#allocation3 + $0x18] sm:$0xff] }
 0xb15   :  { %1707 = vst.msk [vmem:[#allocation3 + $0x28] sm:$0xff] %vm384_vm1, %v1703_v33  ;;  %v1761_v36 = vpack.c.bf16 %v1755_v35, %v1754_v34  ;;  %v3797_v33 = vld [vmem:[%s4878_s1 + $0x38] sm:$0xff]  ;;  %v3798_v35 = vld [vmem:[%s4878_s1 + $0x30] sm:$0xff] }
 0xb16   :  { %v1693_v37 = vpop.permute.xlu0 %1692  ;;  %v1758_v49 = vld [vmem:[#allocation3 + $0x30] sm:$0xff] }
 0xb17   :  { %3504 = vmatprep.subr.msk.bf16.mxu0 %vm384_vm1, %v1761_v36  ;;  %v1780_v38 = vsel %vm384_vm1, %v1761_v36, 0  ;;  %1698 = vst.msk [vmem:[#allocation2 + $0x20] sm:$0xff] %vm384_vm1, %v1693_v37 }
 0xb18   :  { %v1727_v39 = vpop.permute.xlu1 %1726  ;;  %3410 = vmatpush3.bf16.xpose.msra.mxu0 %v1780_v38  ;;  %v1756_v44 = vld [vmem:[#allocation3 + $0x20] sm:$0xff]  ;;  %v3799_v38 = vld [vmem:[%s4878_s1 + $0x28] sm:$0xff] }
 0xb19   :  { %1731 = vst.msk [vmem:[#allocation3 + $0x38] sm:$0xff] %vm384_vm1, %v1727_v39 }
 0xb1a   :  { %v1717_v40 = vpop.permute.xlu0 %1716  ;;  %v1742_v54 = vld [vmem:[#allocation2 + $0x10] sm:$0xff] }
 0xb1b   :  { %1722 = vst.msk [vmem:[#allocation2 + $0x30] sm:$0xff] %vm384_vm1, %v1717_v40 }
 0xb1c   :  { %v1667_v41 = vpop.permute.xlu1 %1666  ;;  %v1757_v45 = vld [vmem:[#allocation3 + $0x28] sm:$0xff] }
 0xb1d   :  { %1671 = vst.msk [vmem:[#allocation2 + $0x18] sm:$0xff] %vm384_vm1, %v1667_v41  ;;  %v1762_v46 = vpack.c.bf16 %v1757_v45, %v1756_v44  ;;  %v3800_v41 = vld [vmem:[%s4878_s1 + $0x20] sm:$0xff] }
 0xb1e   :  { %v1744_v56 = vld [vmem:[#allocation2 + $0x20] sm:$0xff] }
 0xb1f   :  { %3505 = vmatprep.subr.msk.bf16.mxu0 %vm384_vm1, %v1762_v46  ;;  %v1783_v47 = vsel %vm384_vm1, %v1762_v46, 0 }
 0xb20   :  { %v1695_v48 = vpop.permute.xlu1 %1694  ;;  %3412 = vmatpush3.bf16.xpose.msra.mxu0 %v1783_v47  ;;  %v1759_v50 = vld [vmem:[#allocation3 + $0x38] sm:$0xff] }
 0xb21   :  { %1699 = vst.msk [vmem:[#allocation2 + $0x28] sm:$0xff] %vm384_vm1, %v1695_v48  ;;  %v1763_v51 = vpack.c.bf16 %v1759_v50, %v1758_v49 }
 0xb22   :  { %v1746_v1 = vld [vmem:[#allocation2 + $0x30] sm:$0xff] }
 0xb23   :  { %3506 = vmatprep.subr.msk.bf16.mxu0 %vm384_vm1, %v1763_v51  ;;  %v1786_v15 = vsel %vm384_vm1, %v1763_v51, 0 }
 0xb24   :  { %v1719_v8 = vpop.permute.xlu1 %1718  ;;  %v1743_v52 = vld [vmem:[#allocation2 + $0x18] sm:$0xff] }
 0xb25   :  { %1723 = vst.msk [vmem:[#allocation2 + $0x38] sm:$0xff] %vm384_vm1, %v1719_v8  ;;  %v1749_v55 = vpack.c.bf16 %v1743_v52, %v1742_v54 }
 0xb28   :  { %3414 = vmatpush3.bf16.xpose.msra.mxu0 %v1786_v15  ;;  %v1745_v53 = vld [vmem:[#allocation2 + $0x28] sm:$0xff] }
 0xb29   :  { %3439 = vmatprep.subr.bf16.mxu0 %v3801_v6  ;;  %v1750_v59 = vpack.c.bf16 %v1745_v53, %v1744_v56 }
 0xb2c   :  { %v1747_v63 = vld [vmem:[#allocation2 + $0x38] sm:$0xff] }
 0xb2d   :  { %v1751_v2 = vpack.c.bf16 %v1747_v63, %v1746_v1 }
 0xb2f   :  { %3416 = vmatmul.mubr.msk.bf16.vlgmr.msra.gmra.mrb[20].mxu0 %vm384_vm1, %v1749_v55 }
 0xb30   :  { %3419 = vmatprep.mubr.msk.bf16.mxu0 %vm384_vm1, %v1750_v59 }
 0xb37   :  { %3420 = vmatmul.mubr.msk.bf16.gmra.mrb[24].mxu0 %vm384_vm1, %v1751_v2 }
 0xb38   :  { %3455 = vmatprep.mubr.msk.bf16.mxu0 %vm3803_vm0, %v3801_v6 }
 0xc02   :  { %v3417_v3 = vpop.f32.mrb[20].mxu0 }
 0xc03   :  { %v1855_v4 = vmul.f32 0.17677669, %v3417_v3  ;;  %v1822_v42 = vpop.f32.mrb[21].mxu0 }
 0xc04   :  { %v1853_v5 = vmul.f32 0.17677669, %v1822_v42  ;;  %v3418_v7 = vpop.f32.mrb[22].mxu0 }
 0xc05   :  { %v1825_v10 = vpop.f32.mrb[23].mxu0  ;;  %v1863_v12 = vadd.f32 %v3793_v11, %v1855_v4  ;;  %v1856_v14 = vmul.f32 0.17677669, %v3418_v7 }
 0xc06   :  { %v1854_v13 = vmul.f32 0.17677669, %v1825_v10  ;;  %v1861_v17 = vadd.f32 %v3794_v16, %v1853_v5 }
 0xc07   :  { %v1875_v62 = vsel %vm598_vm2, %v1863_v12, -inf  ;;  %v1864_v26 = vadd.f32 %v3796_v24, %v1856_v14 }
 0xc08   :  { %1876 = vmax.xlane.f32.xlu0 %v1875_v62  ;;  %v1862_v19 = vadd.f32 %v3795_v18, %v1854_v13  ;;  %v1869_v23 = vsel %vm598_vm2, %v1861_v17, -inf }
 0xc09   :  { %v1878_v32 = vsel %vm598_vm2, %v1864_v26, -inf }
 0xc0a   :  { %v3421_v20 = vpop.f32.mrb[24].mxu0  ;;  %v1872_v21 = vsel %vm598_vm2, %v1862_v19, -inf }
 0xc0b   :  { %v1859_v9 = vmul.f32 0.17677669, %v3421_v20  ;;  %1873 = vmax.xlane.f32.xlu1 %v1872_v21  ;;  %v1838_v22 = vpop.f32.mrb[25].mxu0 }
 0xc0c   :  { %1870 = vmax.xlane.f32.xlu0 %v1869_v23  ;;  %v3422_v27 = vpop.f32.mrb[26].mxu0  ;;  %v1857_v31 = vmul.f32 0.17677669, %v1838_v22 }
 0xc0d   :  { %v1860_v28 = vmul.f32 0.17677669, %v3422_v27  ;;  %v1841_v29 = vpop.f32.mrb[27].mxu0  ;;  %v1867_v36 = vadd.f32 %v3798_v35, %v1859_v9 }
 0xc0e   :  { %v1858_v30 = vmul.f32 0.17677669, %v1841_v29  ;;  %v1865_v44 = vadd.f32 %v3800_v41, %v1857_v31 }
 0xc0f   :  { %v1868_v34 = vadd.f32 %v3797_v33, %v1860_v28  ;;  %v1887_v40 = vsel %vm598_vm2, %v1867_v36, -inf }
 0xc10   :  { %1879 = vmax.xlane.f32.xlu0 %v1878_v32  ;;  %v1866_v39 = vadd.f32 %v3799_v38, %v1858_v30  ;;  %v1881_v46 = vsel %vm598_vm2, %v1865_v44, -inf }
 0xc11   :  { %v1890_v37 = vsel %vm598_vm2, %v1868_v34, -inf }
 0xc12   :  { %1891 = vmax.xlane.f32.xlu1 %v1890_v37  ;;  %v1884_v45 = vsel %vm598_vm2, %v1866_v39, -inf }
 0xc14   :  { %1888 = vmax.xlane.f32.xlu0 %v1887_v40 }
 0xc16   :  { %1885 = vmax.xlane.f32.xlu1 %v1884_v45 }
 0xc18   :  { %1882 = vmax.xlane.f32.xlu0 %v1881_v46 }
 0xc27   :  { %1686 = vrot.lane.b32.xlu1 %v4470_v60, %s3804_s3 }
 0xc2e   :  { %1684 = vrot.lane.b32.xlu0 %v4465_v43, %s3804_s3 }
 0xc95   :  { %v1877_v47 = vpop.xlane.xlu0 %1876 }
 0xc96   :  { %v1895_v48 = vsub.f32 %v1863_v12, %v1877_v47 }
 0xc98   :  { %v1905_v49 = vmul.f32 1.442695, %v1895_v48  ;;  %v1874_v50 = vpop.xlane.xlu1 %1873 }
 0xc99   :  { %v1871_v51 = vpop.xlane.xlu0 %1870  ;;  %v1894_v15 = vsub.f32 %v1862_v19, %v1874_v50 }
 0xc9a   :  { %3741 = vpow2.f32 %v1905_v49  ;;  %v1893_v8 = vsub.f32 %v1861_v17, %v1871_v51 }
 0xc9b   :  { %v1903_v56 = vmul.f32 1.442695, %v1894_v15 }
 0xc9c   :  { %v1901_v52 = vmul.f32 1.442695, %v1893_v8 }
 0xc9d   :  { %v1880_v53 = vpop.xlane.xlu0 %1879 }
 0xc9e   :  { %3743 = vpow2.f32 %v1901_v52  ;;  %v1896_v54 = vsub.f32 %v1864_v26, %v1880_v53 }
 0xc9f   :  { %v1892_v55 = vpop.xlane.xlu1 %1891 }
 0xca0   :  { %v1907_v59 = vmul.f32 1.442695, %v1896_v54  ;;  %v1900_v4 = vsub.f32 %v1868_v34, %v1892_v55 }
 0xca1   :  { %v1889_v63 = vpop.xlane.xlu0 %1888 }
 0xca2   :  { %3745 = vpow2.f32 %v1907_v59  ;;  %v1899_v1 = vsub.f32 %v1867_v36, %v1889_v63  ;;  %v1915_v62 = vmul.f32 1.442695, %v1900_v4 }
 0xca3   :  { %v1886_v2 = vpop.xlane.xlu1 %1885  ;;  %3747 = vpow2.f32 %v1903_v56 }
 0xca4   :  { %v4552_v3 = vpop.eup %3741  ;;  %v1913_v42 = vmul.f32 1.442695, %v1899_v1  ;;  %v1898_v5 = vsub.f32 %v1866_v39, %v1886_v2 }
 0xca5   :  { %v1883_v7 = vpop.xlane.xlu0 %1882  ;;  %v1923_v10 = vsel %vm598_vm2, %v4552_v3, 0.0 }
 0xca6   :  { %3749 = vpow2.f32 %v1913_v42  ;;  %v1911_v11 = vmul.f32 1.442695, %v1898_v5  ;;  %v1897_v12 = vsub.f32 %v1865_v44, %v1883_v7  ;;  %1924 = vadd.xlane.f32.xlu0 %v1923_v10 }
 0xca7   :  { %v1687_v13 = vpop.permute.xlu1 %1686 }
 0xca8   :  { %v3744_v14 = vpop.eup %3743  ;;  %3751 = vpow2.f32 %v1911_v11  ;;  %v1909_v16 = vmul.f32 1.442695, %v1897_v12  ;;  %1691 = vst.msk [vmem:[#allocation4 + $0x18] sm:$0xff] %vm384_vm1, %v1687_v13 }
 0xca9   :  { %v1685_v17 = vpop.permute.xlu0 %1684  ;;  %v1917_v18 = vsel %vm598_vm2, %v3744_v14, 0.0 }
 0xcaa   :  { %3753 = vpow2.f32 %v1909_v16  ;;  %1690 = vst.msk [vmem:[#allocation4 + $0x10] sm:$0xff] %vm384_vm1, %v1685_v17  ;;  %1918 = vadd.xlane.f32.xlu0 %v1917_v18  ;;  %v3627_v16 = vld [vmem:[%s4879_s6 + $0x50] sm:$0xff]   ;;  %v3629_v17 = vld [vmem:[%s4879_s6 + $0x60] sm:$0xff]  }
 0xcab   :  { %3755 = vpow2.f32 %v1915_v62  ;;  %v3626_v62 = vld [vmem:[%s4879_s6 + $0x48] sm:$0xff]  }
 0xcac   :  { %v4559_v19 = vpop.eup %3745 }
 0xcad   :  { %v1926_v20 = vsel %vm598_vm2, %v4559_v19, 0.0  ;;  %v3748_v21 = vpop.eup %3747 }
 0xcae   :  { %1927 = vadd.xlane.f32.xlu1 %v1926_v20  ;;  %v1920_v23 = vsel %vm598_vm2, %v3748_v21, 0.0  ;;  %v3630_v20 = vld [vmem:[%s4879_s6 + $0x68] sm:$0xff]  }
 0xcaf   :  { %v1964_v26 = vld [vmem:[#allocation4 + $0x18] sm:$0xff] }
 0xcb0   :  { %v4563_v9 = vpop.eup %3749 }
 0xcb1   :  { %v1935_v22 = vsel %vm598_vm2, %v4563_v9, 0.0  ;;  %v1963_v24 = vld [vmem:[#allocation4 + $0x10] sm:$0xff] }
 0xcb2   :  { %v3752_v27 = vpop.eup %3751  ;;  %1936 = vadd.xlane.f32.xlu0 %v1935_v22  ;;  %1921 = vadd.xlane.f32.xlu1 %v1920_v23  ;;  %v1970_v28 = vpack.c.bf16 %v1964_v26, %v1963_v24  ;;  %v3631_v22 = vld [vmem:[%s4879_s6 + $0x70] sm:$0xff]   ;;  %v3632_v23 = vld [vmem:[%s4879_s6 + $0x78] sm:$0xff]  }
 0xcb3   :  { %v1932_v31 = vsel %vm598_vm2, %v3752_v27, 0.0 }
 0xcb4   :  { %v3754_v29 = vpop.eup %3753  ;;  %3425 = vmatprep.subr.bf16.mxu1 %v1970_v28 }
 0xcb5   :  { %3426 = vmatpush3.bf16.msra.mxu1 %v1970_v28  ;;  %v1929_v30 = vsel %vm598_vm2, %v3754_v29, 0.0  ;;  %v4570_v32 = vpop.eup %3755 }
 0xcb6   :  { %1930 = vadd.xlane.f32.xlu1 %v1929_v30  ;;  %1933 = vadd.xlane.f32.xlu0 %v1932_v31  ;;  %v1938_v33 = vsel %vm598_vm2, %v4570_v32, 0.0 }
 0xcba   :  { %1939 = vadd.xlane.f32.xlu1 %v1938_v33 }
 0xccb   :  { %1710 = vrot.lane.b32.xlu1 %v4470_v60, %s3806_s28 }
 0xccc   :  { %1708 = vrot.lane.b32.xlu0 %v4465_v43, %s3806_s28 }
 0xccf   :  { %1732 = vrot.lane.b32.xlu1 %v4465_v43, %s3805_s27 }
 0xcd3   :  { %1734 = vrot.lane.b32.xlu1 %v4470_v60, %s3805_s27 }
 0xd33   :  { %v1925_v34 = vpop.xlane.xlu0 %1924 }
 0xd37   :  { %v1919_v35 = vpop.xlane.xlu0 %1918 }
 0xd38   :  { %3757 = vrcp.f32 %v1919_v35 }
 0xd3b   :  { %v1928_v36 = vpop.xlane.xlu1 %1927 }
 0xd3f   :  { %v1937_v37 = vpop.xlane.xlu0 %1936  ;;  %v1922_v38 = vpop.xlane.xlu1 %1921 }
 0xd40   :  { %3759 = vrcp.f32 %v1922_v38  ;;  %v3067_v38 = vld [vmem:[%s4880_s7 + $0x1] ss:$0 sm:$0xff] }
 0xd41   :  { %3761 = vrcp.f32 %v1928_v36 }
 0xd42   :  { %v3758_v45 = vpop.eup %3757 }
 0xd43   :  { %v1934_v39 = vpop.xlane.xlu0 %1933  ;;  %v1931_v40 = vpop.xlane.xlu1 %1930  ;;  %v1949_v43 = vmul.f32 %v3758_v45, %v3744_v14 }
 0xd44   :  { %3763 = vrcp.f32 %v1934_v39 }
 0xd45   :  { %3765 = vrcp.f32 %v1931_v40 }
 0xd46   :  { %3767 = vrcp.f32 %v1925_v34 }
 0xd47   :  { %v1709_v41 = vpop.permute.xlu0 %1708  ;;  %v1940_v44 = vpop.xlane.xlu1 %1939 }
 0xd48   :  { %1714 = vst.msk [vmem:[#allocation4 + $0x20] sm:$0xff] %vm384_vm1, %v1709_v41  ;;  %3769 = vrcp.f32 %v1940_v44 }
 0xd49   :  { %3771 = vrcp.f32 %v1937_v37 }
 0xd4a   :  { %v3760_v46 = vpop.eup %3759 }
 0xd4b   :  { %v1711_v47 = vpop.permute.xlu1 %1710  ;;  %v1950_v60 = vmul.f32 %v3760_v46, %v3748_v21  ;;  %v3762_v52 = vpop.eup %3761 }
 0xd4c   :  { %1715 = vst.msk [vmem:[#allocation4 + $0x28] sm:$0xff] %vm384_vm1, %v1711_v47  ;;  %v1952_v63 = vmul.f32 %v3762_v52, %v4559_v19  ;;  %v3642_v52 = vld [vmem:[%s4881_s10 + $0xb0] ss:$8 sps:$4 sm:$0xff]  }
 0xd4d   :  { %v1957_v48 = vpack.c.bf16 %v1950_v60, %v1949_v43 }
 0xd4e   :  { %v3764_v53 = vpop.eup %3763 }
 0xd4f   :  { %v1733_v49 = vpop.permute.xlu1 %1732  ;;  %3431 = vmatprep.mubr.msk.bf16.mxu1 %vm598_vm2, %v1957_v48  ;;  %v1965_v51 = vld [vmem:[#allocation4 + $0x20] sm:$0xff]  ;;  %v3766_v54 = vpop.eup %3765  ;;  %v1954_v4 = vmul.f32 %v3764_v53, %v3752_v27 }
 0xd50   :  { %1738 = vst.msk [vmem:[#allocation4 + $0x30] sm:$0xff] %vm384_vm1, %v1733_v49  ;;  %v3768_v55 = vpop.eup %3767  ;;  %v1953_v2 = vmul.f32 %v3766_v54, %v3754_v29  ;;  %v3638_v49 = vld [vmem:[%s4881_s10 + $0x94] ss:$8 sps:$4 sm:$0xff]   ;;  %v3647_v53 = vld [vmem:[%s4881_s10 + $0xc4] ss:$8 sps:$4 sm:$0xff]  }
 0xd51   :  { %v1951_v42 = vmul.f32 %v3768_v55, %v4552_v3  ;;  %v3625_v3 = vld [vmem:[%s4879_s6 + $0x40] sm:$0xff]   ;;  %v3650_v55 = vld [vmem:[%s4881_s10 + $0xd4] ss:$8 sps:$4 sm:$0xff]  }
 0xd52   :  { %v3770_v7 = vpop.eup %3769  ;;  %v1959_v10 = vpack.c.bf16 %v1954_v4, %v1953_v2  ;;  %3440 = vmatpush3.bf16.msra.mxu0 %v3625_v3  ;;  %v3645_v54 = vld [vmem:[%s4881_s10 + $0xc0] ss:$8 sps:$4 sm:$0xff]   ;;  %v3654_v2 = vld [vmem:[%s4881_s10 + $0xf0] ss:$8 sps:$4 sm:$0xff]  }
 0xd53   :  { %v1735_v50 = vpop.permute.xlu1 %1734  ;;  %v1966_v8 = vld [vmem:[#allocation4 + $0x28] sm:$0xff]  ;;  %v1958_v5 = vpack.c.bf16 %v1952_v63, %v1951_v42  ;;  %v3772_v11 = vpop.eup %3771  ;;  %v1956_v12 = vmul.f32 %v3770_v7, %v4570_v32  ;;  %3441 = vmatprep.subr.bf16.mxu0 %v3801_v6 }
 0xd54   :  { %1739 = vst.msk [vmem:[#allocation4 + $0x38] sm:$0xff] %vm384_vm1, %v1735_v50  ;;  %v1971_v15 = vpack.c.bf16 %v1966_v8, %v1965_v51  ;;  %v1955_v13 = vmul.f32 %v3772_v11, %v4563_v9  ;;  %v3636_v50 = vld [vmem:[%s4881_s10 + $0x90] ss:$8 sps:$4 sm:$0xff]   ;;  %v3641_v51 = vld [vmem:[%s4881_s10 + $0xa4] ss:$8 sps:$4 sm:$0xff]  }
 0xd55   :  { %v3639_v8 = vld [vmem:[%s4881_s10 + $0xa0] ss:$8 sps:$4 sm:$0xff]  }
 0xd56   :  { %3427 = vmatprep.subr.bf16.mxu1 %v1971_v15  ;;  %v1960_v14 = vpack.c.bf16 %v1956_v12, %v1955_v13  ;;  %3442 = vmatpush3.bf16.msra.mxu0 %v3626_v62  ;;  %v3651_v63 = vld [vmem:[%s4881_s10 + $0xe0] ss:$8 sps:$4 sm:$0xff]  }
 0xd57   :  { %3428 = vmatpush3.bf16.msra.mxu1 %v1971_v15  ;;  %v1967_v56 = vld [vmem:[#allocation4 + $0x30] sm:$0xff]  ;;  %3443 = vmatprep.subr.bf16.mxu0 %v3801_v6 }
 0xd58   :  { %v3644_v15 = vld [vmem:[%s4881_s10 + $0xb4] ss:$8 sps:$4 sm:$0xff]  }
 0xd5a   :  { %3444 = vmatpush3.bf16.msra.mxu0 %v3627_v16 }
 0xd5b   :  { %v1968_v59 = vld [vmem:[#allocation4 + $0x38] sm:$0xff]  ;;  %3445 = vmatprep.subr.bf16.mxu0 %v3801_v6 }
 0xd5c   :  { %v1972_v1 = vpack.c.bf16 %v1968_v59, %v1967_v56  ;;  %v3648_v56 = vld [vmem:[%s4881_s10 + $0xd0] ss:$8 sps:$4 sm:$0xff]   ;;  %v3653_v59 = vld [vmem:[%s4881_s10 + $0xe4] ss:$8 sps:$4 sm:$0xff]  }
 0xd5e   :  { %3429 = vmatprep.subr.bf16.mxu1 %v1972_v1 }
 0xd5f   :  { %3430 = vmatpush3.bf16.msra.mxu1 %v1972_v1  ;;  %v3656_v1 = vld [vmem:[%s4881_s10 + $0xf4] ss:$8 sps:$4 sm:$0xff]  }
 0xd62   :  { %3432 = vmatmul.mubr.msk.bf16.vlgmr.msra.gmra.mrb[24].mxu1 %vm598_vm2, %v1958_v5 }
 0xd63   :  { %3435 = vmatprep.mubr.msk.bf16.mxu1 %vm598_vm2, %v1959_v10 }
 0xd6a   :  { %3436 = vmatmul.mubr.msk.bf16.gmra.mrb[28].mxu1 %vm598_vm2, %v1960_v14 }
 0xd6b   :  { %2392 = vmatprep.mubr.bf16.mxu1 %v3802_v25  ;;  %v3628_v25 = vld [vmem:[%s4879_s6 + $0x58] sm:$0xff]  }
 0xd6c   :  { %3446 = vmatpush3.bf16.msra.mxu0 %v3628_v25 }
 0xd6d   :  { %3447 = vmatprep.subr.bf16.mxu0 %v3801_v6 }
 0xd70   :  { %3448 = vmatpush3.bf16.msra.mxu0 %v3629_v17 }
 0xd71   :  { %3449 = vmatprep.subr.bf16.mxu0 %v3801_v6 }
 0xd74   :  { %3450 = vmatpush3.bf16.msra.mxu0 %v3630_v20 }
 0xd75   :  { %3451 = vmatprep.subr.bf16.mxu0 %v3801_v6 }
 0xd78   :  { %3452 = vmatpush3.bf16.msra.mxu0 %v3631_v22  ;;  %v3078_v22 = vld [vmem:[%s4882_s8 + $0x1] ss:$0 sm:$0xff] }
 0xd79   :  { %3453 = vmatprep.subr.bf16.mxu0 %v3801_v6 }
 0xd7c   :  { %3454 = vmatpush3.bf16.msra.mxu0 %v3632_v23 }
 0xe35   :  { %v3433_v18 = vpop.f32.mrb[24].mxu1 }
 0xe36   :  { %2054 = vrot.lane.b32.xlu0 %v3433_v18, %s3805_s27  ;;  %v2019_v19 = vpop.f32.mrb[25].mxu1 }
 0xe37   :  { %2050 = vst.msk [vmem:[#allocation5] sm:$0xff] %vm384_vm1, %v2019_v19  ;;  %v3434_v21 = vpop.f32.mrb[26].mxu1 }
 0xe38   :  { %2056 = vrot.lane.b32.xlu1 %v3434_v21, %s3805_s27  ;;  %v2022_v9 = vpop.f32.mrb[27].mxu1 }
 0xe39   :  { %2051 = vst.msk [vmem:[#allocation5 + $0x8] sm:$0xff] %vm384_vm1, %v2022_v9 }
 0xe3d   :  { %v3437_v24 = vpop.f32.mrb[28].mxu1 }
 0xe3e   :  { %v2035_v26 = vpop.f32.mrb[29].mxu1 }
 0xe3f   :  { %2064 = vrot.lane.b32.xlu0 %v2035_v26, %s3806_s28  ;;  %v3438_v27 = vpop.f32.mrb[30].mxu1 }
 0xe40   :  { %v2038_v28 = vpop.f32.mrb[31].mxu1 }
 0xe41   :  { %2066 = vrot.lane.b32.xlu1 %v2038_v28, %s3806_s28  ;;  %v3079_v28 = vld [vmem:[%s4883_s9 + $0x1] ss:$0 sm:$0xff] }
 0xe43   :  { %2074 = vrot.lane.b32.xlu0 %v3437_v24, %s3804_s3 }
 0xe45   :  { %2076 = vrot.lane.b32.xlu1 %v3438_v27, %s3804_s3 }
 0xea8   :  { %v2055_v29 = vpop.permute.xlu0 %2054 }
 0xea9   :  { %2060 = vst.msk [vmem:[#allocation5] sm:$0xff] %vm790_vm3, %v2055_v29 }
 0xeaa   :  { %v2057_v30 = vpop.permute.xlu1 %2056 }
 0xeab   :  { %2061 = vst.msk [vmem:[#allocation5 + $0x8] sm:$0xff] %vm790_vm3, %v2057_v30 }
 0xeb1   :  { %v2065_v31 = vpop.permute.xlu0 %2064 }
 0xeb2   :  { %2070 = vst.msk [vmem:[#allocation5] sm:$0xff] %vm801_vm4, %v2065_v31 }
 0xeb3   :  { %v2067_v32 = vpop.permute.xlu1 %2066 }
 0xeb4   :  { %2071 = vst.msk [vmem:[#allocation5 + $0x8] sm:$0xff] %vm801_vm4, %v2067_v32 }
 0xeb5   :  { %v2075_v33 = vpop.permute.xlu0 %2074 }
 0xeb6   :  { %2080 = vst.msk [vmem:[#allocation5] sm:$0xff] %vm812_vm5, %v2075_v33  ;;  %v3657_v33 = vld [vmem:[%s4884_s12 + $0xc0] sm:$0xff]  }
 0xeb7   :  { %v2077_v34 = vpop.permute.xlu1 %2076  ;;  %3275 = vmatprep.subr.bf16.mxu0 %v3657_v33 }
 0xeb8   :  { %2081 = vst.msk [vmem:[#allocation5 + $0x8] sm:$0xff] %vm812_vm5, %v2077_v34  ;;  %v3658_v34 = vld [vmem:[%s4884_s12 + $0x80] sm:$0xff]  }
 0xebd   :  { %v2082_v35 = vld [vmem:[#allocation5] sm:$0xff] }
 0xebf   :  { %v2083_v36 = vld [vmem:[#allocation5 + $0x8] sm:$0xff] }
 0xec0   :  { %v2084_v37 = vpack.c.bf16 %v2083_v36, %v2082_v35  ;;  %v3659_v35 = vld [vmem:[%s4884_s12 + $0xc8] sm:$0xff]  }
 0xec1   :  { %v3660_v36 = vld [vmem:[%s4884_s12 + $0x88] sm:$0xff]  }
 0xec2   :  { %3456 = vmatmul.mubr.bf16.vlgmr.msra.gmra.mrb[28].mxu0 %v2084_v37  ;;  %v3661_v37 = vld [vmem:[%s4884_s12 + $0xd0] sm:$0xff]  }
 0xec3   :  { %3276 = vmatpush3.bf16.msra.mxu0 %v3658_v34 }
 0xec4   :  { %3277 = vmatprep.subr.bf16.mxu0 %v3659_v35 }
 0xec7   :  { %3278 = vmatpush3.bf16.msra.mxu0 %v3660_v36 }
 0xec8   :  { %3279 = vmatprep.subr.bf16.mxu0 %v3661_v37 }
 0xf95   :  { %v2192_v39 = vpop.f32.mrb[28].mxu0 }
 0xf96   :  { %v2193_v40 = vadd.f32 %v3067_v38, %v2192_v39  ;;  %v3457_v41 = vpop.f32.mrb[29].mxu0  ;;  %v3663_v39 = vld [vmem:[%s4884_s12 + $0xd8] sm:$0xff]  }
 0xf97   :  { %v2195_v44 = vpop.f32.mrb[30].mxu0  ;;  %v3665_v41 = vld [vmem:[%s4884_s12 + $0xe0] sm:$0xff]  }
 0xf98   :  { %v4644_v45 = vadd.f32 %v2193_v40, %v4452_v57  ;;  %v2196_v46 = vadd.f32 %v3067_v38, %v2195_v44  ;;  %v3458_v47 = vpop.f32.mrb[31].mxu0  ;;  %v3635_v57 = vld [vmem:[%s4881_s10 + $0x84] ss:$8 sps:$4 sm:$0xff]   ;;  %v3662_v38 = vld [vmem:[%s4884_s12 + $0x90] sm:$0xff]   ;;  %v3664_v40 = vld [vmem:[%s4884_s12 + $0x98] sm:$0xff]  }
 0xf99   :  { %2360 = vmatprep.subr.bf16.mxu1 %v3635_v57  ;;  %3280 = vmatpush3.bf16.msra.mxu0 %v3662_v38  ;;  %v3666_v44 = vld [vmem:[%s4884_s12 + $0xa0] sm:$0xff]   ;;  %v3669_v47 = vld [vmem:[%s4884_s12 + $0xf0] sm:$0xff]  }
 0xf9a   :  { %v4647_v43 = vadd.f32 %v2196_v46, %v4454_v58  ;;  %2205 = vadd.xlane.f32.xlu0 %v4644_v45  ;;  %v2211_v60 = vmul.f32 %v4644_v45, %v4644_v45  ;;  %v3633_v58 = vld [vmem:[%s4881_s10 + $0x80] ss:$8 sps:$4 sm:$0xff]   ;;  %3281 = vmatprep.subr.bf16.mxu0 %v3663_v39 }
 0xf9b   :  { %2361 = vmatpush1.bf16.msra.mxu1 %v3633_v58  ;;  %v3668_v46 = vld [vmem:[%s4884_s12 + $0xa8] sm:$0xff]   ;;  %v3096_v57 = vld [vmem:[%s4885_s11 + $0x2] sm:$0x3]  ;;  %v3146_v38 = vld [vmem:[%s4886_s13 + $0x1] ss:$0 sm:$0xff] }
 0xf9c   :  { %2207 = vadd.xlane.f32.xlu1 %v4647_v43  ;;  %v2212_v48 = vmul.f32 %v4647_v43, %v4647_v43  ;;  %2362 = vmatprep.subr.bf16.mxu1 %v3638_v49  ;;  %v2273_v58 = vrot.slane %v3096_v57, %v4028_v61  ;;  %v2277_v49 = vrot.slane %v3096_v57, %v4035_v0 }
 0xf9d   :  { %3282 = vmatpush3.bf16.msra.mxu0 %v3664_v40 }
 0xf9e   :  { %2213 = vadd.xlane.f32.xlu0 %v2211_v60  ;;  %3283 = vmatprep.subr.bf16.mxu0 %v3665_v41  ;;  %v3671_v60 = vld [vmem:[%s4884_s12 + $0xf8] sm:$0xff]  }
 0xf9f   :  { %2363 = vmatpush1.bf16.msra.mxu1 %v3636_v50 }
 0xfa0   :  { %2364 = vmatprep.subr.bf16.mxu1 %v3641_v51 }
 0xfa1   :  { %3284 = vmatpush3.bf16.msra.mxu0 %v3666_v44 }
 0xfa2   :  { %2215 = vadd.xlane.f32.xlu0 %v2212_v48  ;;  %v3672_v48 = vld [vmem:[%s4884_s12 + $0xb8] sm:$0xff]  }
 0xfa3   :  { %2365 = vmatpush1.bf16.msra.mxu1 %v3639_v8 }
 0xfa4   :  { %2366 = vmatprep.subr.bf16.mxu1 %v3644_v15 }
 0xfa7   :  { %2367 = vmatpush1.bf16.msra.mxu1 %v3642_v52 }
 0xfa8   :  { %2368 = vmatprep.subr.bf16.mxu1 %v3647_v53 }
 0xfab   :  { %2369 = vmatpush1.bf16.msra.mxu1 %v3645_v54 }
 0xfac   :  { %2370 = vmatprep.subr.bf16.mxu1 %v3650_v55 }
 0xfaf   :  { %2371 = vmatpush1.bf16.msra.mxu1 %v3648_v56 }
 0xfb0   :  { %2372 = vmatprep.subr.bf16.mxu1 %v3653_v59 }
 0xfb3   :  { %2373 = vmatpush1.bf16.msra.mxu1 %v3651_v63 }
 0xfb4   :  { %2374 = vmatprep.subr.bf16.mxu1 %v3656_v1 }
 0xfb7   :  { %2375 = vmatpush1.bf16.msra.mxu1 %v3654_v2 }
 0xfb8   :  { %3459 = vmatprep.subr.bf16.mxu1 %v3801_v6 }
0x1027   :  { %v2206_v4 = vpop.xlane.xlu0 %2205 }
0x1028   :  { %v2209_v42 = vmul.f32 0.0078125, %v2206_v4 }
0x1029   :  { %v2208_v5 = vpop.xlane.xlu1 %2207 }
0x102a   :  { %v2219_v10 = vmul.f32 %v2209_v42, %v2209_v42  ;;  %v2210_v11 = vmul.f32 0.0078125, %v2208_v5  ;;  %v2225_v20 = vsub.f32 %v4644_v45, %v2209_v42  ;;  %v3667_v45 = vld [vmem:[%s4884_s12 + $0xe8] sm:$0xff]  }
0x102b   :  { %v2214_v7 = vpop.xlane.xlu0 %2213  ;;  %3285 = vmatprep.subr.bf16.mxu0 %v3667_v45 }
0x102c   :  { %v2217_v12 = vmul.f32 0.0078125, %v2214_v7  ;;  %v2220_v3 = vmul.f32 %v2210_v11, %v2210_v11  ;;  %v2226_v23 = vsub.f32 %v4647_v43, %v2210_v11  ;;  %3286 = vmatpush3.bf16.msra.mxu0 %v3668_v46  ;;  %v3670_v43 = vld [vmem:[%s4884_s12 + $0xb0] sm:$0xff]  }
0x102d   :  { %3287 = vmatprep.subr.bf16.mxu0 %v3669_v47 }
0x102e   :  { %v2221_v13 = vsub.f32 %v2217_v12, %v2219_v10 }
0x102f   :  { %v2216_v14 = vpop.xlane.xlu0 %2215 }
0x1030   :  { %v2223_v62 = vmax.f32 %v2221_v13, 0.0  ;;  %v2218_v16 = vmul.f32 0.0078125, %v2216_v14  ;;  %3288 = vmatpush3.bf16.msra.mxu0 %v3670_v43 }
0x1031   :  { %3289 = vmatprep.subr.bf16.mxu0 %v3671_v60 }
0x1032   :  { %v2227_v25 = vadd.f32 1e-12, %v2223_v62  ;;  %v2222_v17 = vsub.f32 %v2218_v16, %v2220_v3 }
0x1034   :  { %3773 = vrsqrt.f32 %v2227_v25  ;;  %v2224_v18 = vmax.f32 %v2222_v17, 0.0  ;;  %3290 = vmatpush3.bf16.msra.mxu0 %v3672_v48 }
0x1035   :  { %3479 = vmatprep.subr.bf16.mxu0 %v3801_v6 }
0x1036   :  { %v2228_v19 = vadd.f32 1e-12, %v2224_v18 }
0x1038   :  { %3775 = vrsqrt.f32 %v2228_v19 }
0x103e   :  { %v3774_v21 = vpop.eup %3773 }
0x103f   :  { %v2231_v9 = vmul.f32 %v3774_v21, %v2225_v20 }
0x1041   :  { %v2239_v27 = vmul.f32 %v3078_v22, %v2231_v9 }
0x1042   :  { %v3776_v24 = vpop.eup %3775 }
0x1043   :  { %v2232_v26 = vmul.f32 %v3776_v24, %v2226_v23  ;;  %v4712_v30 = vadd.f32 %v3079_v28, %v2239_v27 }
0x1045   :  { %v2240_v29 = vmul.f32 %v3078_v22, %v2232_v26 }
0x1047   :  { %v4714_v31 = vadd.f32 %v3079_v28, %v2240_v29 }
0x1049   :  { %v2249_v32 = vpack.c.bf16 %v4714_v31, %v4712_v30 }
0x104b   :  { %2393 = vmatmul.mubr.bf16.vlgmr.msra.gmra.mrb[32].mxu1 %v2249_v32 }
0x104c   :  { %3475 = vmatprep.mubr.msk.bf16.mxu1 %vm3803_vm0, %v3801_v6 }
0x111e   :  { %v2394_v50 = vpop.f32.mrb[32].mxu1 }
0x111f   :  { %v2395_v51 = vadd.f32 %v2394_v50, %v2273_v58  ;;  %v2396_v8 = vpop.f32.mrb[33].mxu1  ;;  %v3677_v50 = vld [vmem:[%s4889_s16 + $0x20] sm:$0xff]  }
0x1120   :  { %v2397_v15 = vadd.f32 %v2396_v8, %v2277_v49  ;;  %v2398_v52 = vpop.f32.mrb[34].mxu1  ;;  %v3679_v8 = vld [vmem:[%s4889_s16 + $0x30] sm:$0xff]  }
0x1121   :  { %v2407_v53 = vmul.f32 0.044715, %v2395_v51  ;;  %v2399_v54 = vadd.f32 %v2398_v52, %v2273_v58  ;;  %v2400_v55 = vpop.f32.mrb[35].mxu1  ;;  %v2403_v22 = vmul.f32 0.5, %v2395_v51  ;;  %v3675_v58 = vld [vmem:[%s4889_s16 + $0x10] sm:$0xff]   ;;  %v3681_v52 = vld [vmem:[%s4890_s18] sm:$0xff]  }
0x1122   :  { %v2408_v56 = vmul.f32 0.044715, %v2397_v15  ;;  %v2401_v59 = vadd.f32 %v2400_v55, %v2277_v49  ;;  %v2404_v26 = vmul.f32 0.5, %v2397_v15  ;;  %v3676_v49 = vld [vmem:[%s4889_s16 + $0x18] sm:$0xff]  }
0x1123   :  { %v2411_v63 = vmul.f32 %v2407_v53, %v2395_v51  ;;  %v2409_v1 = vmul.f32 0.044715, %v2399_v54  ;;  %v2405_v23 = vmul.f32 0.5, %v2399_v54  ;;  %v3682_v53 = vld [vmem:[%s4890_s18 + $0x8] sm:$0xff]   ;;  %v3684_v55 = vld [vmem:[%s4890_s18 + $0x18] sm:$0xff]  }
0x1124   :  { %v2412_v2 = vmul.f32 %v2408_v56, %v2397_v15  ;;  %v2410_v4 = vmul.f32 0.044715, %v2401_v59  ;;  %v2406_v27 = vmul.f32 0.5, %v2401_v59 }
0x1125   :  { %v2415_v42 = vmul.f32 %v2411_v63, %v2395_v51  ;;  %v2413_v5 = vmul.f32 %v2409_v1, %v2399_v54 }
0x1126   :  { %v2416_v7 = vmul.f32 %v2412_v2, %v2397_v15  ;;  %v2414_v61 = vmul.f32 %v2410_v4, %v2401_v59 }
0x1127   :  { %v2419_v10 = vadd.f32 %v2415_v42, %v2395_v51  ;;  %v2417_v0 = vmul.f32 %v2413_v5, %v2399_v54  ;;  %v3678_v51 = vld [vmem:[%s4889_s16 + $0x28] sm:$0xff]  }
0x1128   :  { %v2418_v11 = vmul.f32 %v2414_v61, %v2401_v59  ;;  %v2420_v12 = vadd.f32 %v2416_v7, %v2397_v15  ;;  %v3680_v15 = vld [vmem:[%s4889_s16 + $0x38] sm:$0xff]  }
0x1129   :  { %v2423_v13 = vmul.f32 0.7978846, %v2419_v10  ;;  %v2421_v14 = vadd.f32 %v2417_v0, %v2399_v54  ;;  %v3683_v54 = vld [vmem:[%s4890_s18 + $0x10] sm:$0xff]  }
0x112a   :  { %v2422_v3 = vadd.f32 %v2418_v11, %v2401_v59  ;;  %v2424_v62 = vmul.f32 0.7978846, %v2420_v12 }
0x112b   :  { %3777 = vtanh.f32 %v2423_v13  ;;  %v2425_v16 = vmul.f32 0.7978846, %v2421_v14 }
0x112c   :  { %v2426_v25 = vmul.f32 0.7978846, %v2422_v3  ;;  %3779 = vtanh.f32 %v2424_v62 }
0x112d   :  { %3781 = vtanh.f32 %v2425_v16  ;;  %v3165_v16 = vld [vmem:[%s4887_s14 + $0x1] ss:$0 sm:$0xff] }
0x112e   :  { %3783 = vtanh.f32 %v2426_v25 }
0x1135   :  { %v3778_v17 = vpop.eup %3777 }
0x1136   :  { %v3780_v18 = vpop.eup %3779  ;;  %v2431_v19 = vadd.f32 1.0, %v3778_v17 }
0x1137   :  { %v3782_v20 = vpop.eup %3781  ;;  %v2432_v21 = vadd.f32 1.0, %v3780_v18 }
0x1138   :  { %v3784_v9 = vpop.eup %3783  ;;  %v2433_v24 = vadd.f32 1.0, %v3782_v20  ;;  %v2435_v29 = vmul.f32 %v2431_v19, %v2403_v22 }
0x1139   :  { %v2434_v28 = vadd.f32 1.0, %v3784_v9  ;;  %v2436_v33 = vmul.f32 %v2432_v21, %v2404_v26  ;;  %v3166_v21 = vld [vmem:[%s4888_s15 + $0x1] ss:$0 sm:$0xff] }
0x113a   :  { %v2437_v32 = vmul.f32 %v2433_v24, %v2405_v23  ;;  %v3685_v26 = vld [vmem:[%s4890_s18 + $0x20] sm:$0xff]  }
0x113b   :  { %v2438_v34 = vmul.f32 %v2434_v28, %v2406_v27  ;;  %v3686_v27 = vld [vmem:[%s4890_s18 + $0x28] sm:$0xff]   ;;  %v3687_v28 = vld [vmem:[%s4890_s18 + $0x30] sm:$0xff]  }
0x113c   :  { %v2439_v35 = vpack.c.bf16 %v2437_v32, %v2435_v29  ;;  %v3688_v29 = vld [vmem:[%s4890_s18 + $0x38] sm:$0xff]   ;;  %v3167_v32 = vld [vmem:[%s4891_s17] ss:$0 sm:$0xff] }
0x113d   :  { %v2440_v36 = vpack.c.bf16 %v2438_v34, %v2436_v33 }
0x113f   :  { %2610 = vmatprep.mubr.bf16.mxu0 %v2440_v36 }
0x1140   :  { %2611 = vmatmul.mubr.bf16.vlgmr.msra.gmra.mrb[32].mxu0 %v2439_v35 }
0x1141   :  { %3495 = vmatprep.mubr.msk.bf16.mxu0 %vm3803_vm0, %v3801_v6  ;;  %3480 = vmatpush3.bf16.msra.mxu0 %v3681_v52 }
0x1142   :  { %3481 = vmatprep.subr.bf16.mxu0 %v3801_v6 }
0x1145   :  { %3482 = vmatpush3.bf16.msra.mxu0 %v3682_v53 }
0x1146   :  { %3483 = vmatprep.subr.bf16.mxu0 %v3801_v6 }
0x1149   :  { %3484 = vmatpush3.bf16.msra.mxu0 %v3683_v54 }
0x114a   :  { %3485 = vmatprep.subr.bf16.mxu0 %v3801_v6 }
0x114d   :  { %3486 = vmatpush3.bf16.msra.mxu0 %v3684_v55 }
0x114e   :  { %3487 = vmatprep.subr.bf16.mxu0 %v3801_v6 }
0x1151   :  { %3488 = vmatpush3.bf16.msra.mxu0 %v3685_v26 }
0x1152   :  { %3489 = vmatprep.subr.bf16.mxu0 %v3801_v6 }
0x1155   :  { %3490 = vmatpush3.bf16.msra.mxu0 %v3686_v27 }
0x1156   :  { %3491 = vmatprep.subr.bf16.mxu0 %v3801_v6 }
0x1159   :  { %3492 = vmatpush3.bf16.msra.mxu0 %v3687_v28 }
0x115a   :  { %3493 = vmatprep.subr.bf16.mxu0 %v3801_v6 }
0x115d   :  { %3494 = vmatpush3.bf16.msra.mxu0 %v3688_v29 }
0x1213   :  { %v3291_v37 = vpop.f32.mrb[32].mxu0 }
0x1214   :  { %v3292_v39 = vpop.f32.mrb[33].mxu0 }
0x1215   :  { %v3293_v40 = vadd.f32 %v3292_v39, %v3291_v37  ;;  %v3294_v41 = vpop.f32.mrb[34].mxu0 }
0x1216   :  { %v3295_v44 = vpop.f32.mrb[35].mxu0 }
0x1217   :  { %v2613_v45 = vadd.f32 %v3293_v40, %v3146_v38  ;;  %v3296_v46 = vadd.f32 %v3295_v44, %v3294_v41 }
0x1219   :  { %v2616_v47 = vadd.f32 %v3296_v46, %v3146_v38  ;;  %v4780_v43 = vadd.f32 %v2613_v45, %v4712_v30  ;;  %v3673_v30 = vld [vmem:[%s4889_s16] sm:$0xff]  }
0x121a   :  { %3460 = vmatpush3.bf16.msra.mxu1 %v3673_v30 }
0x121b   :  { %2625 = vadd.xlane.f32.xlu0 %v4780_v43  ;;  %v4784_v60 = vadd.f32 %v2616_v47, %v4714_v31  ;;  %v2631_v48 = vmul.f32 %v4780_v43, %v4780_v43  ;;  %3461 = vmatprep.subr.bf16.mxu1 %v3801_v6  ;;  %v3674_v31 = vld [vmem:[%s4889_s16 + $0x8] sm:$0xff]  }
0x121d   :  { %2627 = vadd.xlane.f32.xlu1 %v4784_v60  ;;  %v2632_v57 = vmul.f32 %v4784_v60, %v4784_v60 }
0x121e   :  { %3462 = vmatpush3.bf16.msra.mxu1 %v3674_v31 }
0x121f   :  { %2633 = vadd.xlane.f32.xlu0 %v2631_v48  ;;  %3463 = vmatprep.subr.bf16.mxu1 %v3801_v6 }
0x1221   :  { %2635 = vadd.xlane.f32.xlu1 %v2632_v57 }
0x1222   :  { %3464 = vmatpush3.bf16.msra.mxu1 %v3675_v58 }
0x1223   :  { %3465 = vmatprep.subr.bf16.mxu1 %v3801_v6 }
0x1226   :  { %3466 = vmatpush3.bf16.msra.mxu1 %v3676_v49 }
0x1227   :  { %3467 = vmatprep.subr.bf16.mxu1 %v3801_v6 }
0x122a   :  { %3468 = vmatpush3.bf16.msra.mxu1 %v3677_v50 }
0x122b   :  { %3469 = vmatprep.subr.bf16.mxu1 %v3801_v6 }
0x122e   :  { %3470 = vmatpush3.bf16.msra.mxu1 %v3678_v51 }
0x122f   :  { %3471 = vmatprep.subr.bf16.mxu1 %v3801_v6 }
0x1232   :  { %3472 = vmatpush3.bf16.msra.mxu1 %v3679_v8 }
0x1233   :  { %3473 = vmatprep.subr.bf16.mxu1 %v3801_v6  ;;  %v3176_v6 = vld [vmem:[%s4892_s19] ss:$0 sm:$0xff] }
0x1236   :  { %3474 = vmatpush3.bf16.msra.mxu1 %v3680_v15 }
0x12a8   :  { %v2626_v56 = vpop.xlane.xlu0 %2625 }
0x12a9   :  { %v2629_v59 = vmul.f32 0.0078125, %v2626_v56 }
0x12aa   :  { %v2628_v63 = vpop.xlane.xlu1 %2627 }
0x12ab   :  { %v2630_v1 = vmul.f32 0.0078125, %v2628_v63  ;;  %v2639_v4 = vmul.f32 %v2629_v59, %v2629_v59  ;;  %v2645_v3 = vsub.f32 %v4780_v43, %v2629_v59 }
0x12ac   :  { %v2634_v2 = vpop.xlane.xlu0 %2633 }
0x12ad   :  { %v2637_v42 = vmul.f32 0.0078125, %v2634_v2  ;;  %v2640_v7 = vmul.f32 %v2630_v1, %v2630_v1  ;;  %v2646_v25 = vsub.f32 %v4784_v60, %v2630_v1 }
0x12ae   :  { %v2636_v5 = vpop.xlane.xlu1 %2635 }
0x12af   :  { %v2641_v61 = vsub.f32 %v2637_v42, %v2639_v4  ;;  %v2638_v10 = vmul.f32 0.0078125, %v2636_v5 }
0x12b1   :  { %v2643_v0 = vmax.f32 %v2641_v61, 0.0  ;;  %v2642_v11 = vsub.f32 %v2638_v10, %v2640_v7 }
0x12b3   :  { %v2647_v12 = vadd.f32 1e-12, %v2643_v0  ;;  %v2644_v13 = vmax.f32 %v2642_v11, 0.0 }
0x12b5   :  { %3785 = vrsqrt.f32 %v2647_v12  ;;  %v2648_v14 = vadd.f32 1e-12, %v2644_v13 }
0x12b7   :  { %3787 = vrsqrt.f32 %v2648_v14 }
0x12bf   :  { %v3786_v62 = vpop.eup %3785 }
0x12c0   :  { %v2651_v17 = vmul.f32 %v3786_v62, %v2645_v3 }
0x12c1   :  { %v3788_v18 = vpop.eup %3787 }
0x12c2   :  { %v2652_v19 = vmul.f32 %v3788_v18, %v2646_v25  ;;  %v2659_v20 = vmul.f32 %v3165_v16, %v2651_v17 }
0x12c4   :  { %v2660_v9 = vmul.f32 %v3165_v16, %v2652_v19  ;;  %v2667_v22 = vadd.f32 %v3166_v21, %v2659_v20 }
0x12c6   :  { %v2668_v23 = vadd.f32 %v3166_v21, %v2660_v9 }
0x12c8   :  { %v2669_v24 = vpack.c.bf16 %v2668_v23, %v2667_v22 }
0x12ca   :  { %3476 = vmatmul.mubr.bf16.vlgmr.msra.gmra.mrb[36].mxu1 %v2669_v24 }
0x139d   :  { %v2775_v33 = vpop.f32.mrb[36].mxu1 }
0x139e   :  { %v2776_v34 = vadd.f32 %v3167_v32, %v2775_v33  ;;  %v3477_v35 = vpop.f32.mrb[37].mxu1 }
0x139f   :  { %v2778_v36 = vpop.f32.mrb[38].mxu1 }
0x13a0   :  { %v2779_v37 = vadd.f32 %v3167_v32, %v2778_v36  ;;  %v3478_v38 = vpop.f32.mrb[39].mxu1  ;;  %3789 = vtanh.f32 %v2776_v34 }
0x13a2   :  { %3791 = vtanh.f32 %v2779_v37 }
0x13aa   :  { %v3790_v39 = vpop.eup %3789 }
0x13ac   :  { %v3792_v40 = vpop.eup %3791 }
0x13ad   :  { %v2784_v41 = vpack.c.bf16 %v3792_v40, %v3790_v39 }
0x13af   :  { %3496 = vmatmul.mubr.bf16.vlgmr.msra.gmra.mrb[36].mxu0 %v2784_v41 }
0x1482   :  { %v2890_v44 = vpop.f32.mrb[36].mxu0 }
0x1483   :  { %v2891_v45 = vadd.f32 %v3176_v6, %v2890_v44  ;;  %v3497_v46 = vpop.f32.mrb[37].mxu0 }
0x1484   :  { %v2893_v47 = vpop.f32.mrb[38].mxu0 }
0x1485   :  { %v2897_v43 = vmax.f32 %v2891_v45, 0.0  ;;  %v2894_v60 = vadd.f32 %v3176_v6, %v2893_v47  ;;  %v3498_v48 = vpop.f32.mrb[39].mxu0 }
0x1487   :  { %2899 = vst [vmem:[%s4893_s20] sm:$0xff] %v2897_v43  ;;  %v2898_v57 = vmax.f32 %v2894_v60, 0.0 }
0x1489   :  { %2900 = vst [vmem:[%s4893_s20 + $0x8] sm:$0xff] %v2898_v57 }

</bundles_post_ra>
